<compile_context>
chip_gen: v5e
topology: v5e:2x2
jax: 0.10.0
libtpu: 0.0.40
codegen_flags: <defaults>
</compile_context>

<pallas_src>
import functools
import math

import jax
import jax.numpy as jnp
from jax.experimental import pallas as pl
from jax.experimental.pallas import tpu as pltpu

_BN_EPS = 1e-5
_VMEM_LIMIT = 32 * 1024 * 1024


# ----------------------------------------------------------------------------
# Small helpers (used both in-kernel and on the XLA side)
# ----------------------------------------------------------------------------
def _leaky(x):
    return jnp.where(x >= 0, x, 0.2 * x)


def _relu(x):
    return jnp.maximum(x, 0.0)


def _group_bn(y, gamma, beta, groups, eps):
    """Train-mode BatchNorm fused epilogue on y (M, groups*C) f32.

    Output channel c's statistics are pooled over all M rows and the `groups`
    lane-groups (the groups are output-parity phases / spatial positions that
    belong to the same BatchNorm2d channel)."""
    m = y.shape[0]
    c = y.shape[1] // groups
    count = float(m * groups)
    s = jnp.sum(y, axis=0, keepdims=True)                       # (1, G*C)
    s = sum([s[:, g * c:(g + 1) * c] for g in range(groups)])   # (1, C)
    mean = s / count
    mean_t = jnp.concatenate([mean] * groups, axis=-1) if groups > 1 else mean
    d = y - mean_t
    sq = jnp.sum(d * d, axis=0, keepdims=True)
    sq = sum([sq[:, g * c:(g + 1) * c] for g in range(groups)])
    var = sq / count
    scale = gamma * jax.lax.rsqrt(var + eps)                    # (1, C)
    shift = beta - mean * scale
    if groups > 1:
        scale = jnp.concatenate([scale] * groups, axis=-1)
        shift = jnp.concatenate([shift] * groups, axis=-1)
    return y * scale + shift


# ----------------------------------------------------------------------------
# Pallas kernels
# ----------------------------------------------------------------------------
def _gemm_kernel(*refs, groups, has_bn, has_bias, post_act, eps):
    """out = act( BN_or_bias( patches @ W ) ); bf16 MXU operands, f32 acc."""
    it = iter(refs)
    p_ref = next(it)
    w_ref = next(it)
    b_ref = next(it) if has_bias else None
    g_ref = next(it) if has_bn else None
    be_ref = next(it) if has_bn else None
    o_ref = next(it)

    y = jnp.dot(p_ref[...], w_ref[...], preferred_element_type=jnp.float32)
    if has_bias:
        y = y + b_ref[...]
    if has_bn:
        y = _group_bn(y, g_ref[...], be_ref[...], groups, eps)
    if post_act == "sigmoid":
        y = jax.nn.sigmoid(y)
    o_ref[...] = y.astype(o_ref.dtype)


def _inner_core_kernel(x2_ref, w3d_ref, g3d_ref, b3d_ref,
                       wid_ref, bid_ref,
                       wiu_ref, giu_ref, biu_ref,
                       w3a_ref, w3b_ref, g3u_ref, b3u_ref,
                       o_ref, *, eps):
    """Fused block3.down + innermost block + block3.up (4 conv layers, 3 BNs).

    All spatial structure is folded into the weight matrices at init, so the
    whole subtree is matmuls + elementwise on (N, cols) matrices."""
    # block3.down:  LeakyReLU -> Conv(4,2,1) [folded] -> BN (4 spatial groups)
    x2 = _leaky(x2_ref[...]).astype(jnp.bfloat16)               # (N, 16*H*W? ) flattened
    d3 = jnp.dot(x2, w3d_ref[...], preferred_element_type=jnp.float32)
    x3 = _group_bn(d3, g3d_ref[...], b3d_ref[...], 4, eps)      # (N, 2*2*C)

    # innermost block: LeakyReLU -> Conv (bias, no BN) -> ReLU -> ConvT -> BN
    xi = _leaky(x3).astype(jnp.bfloat16)
    di = jnp.dot(xi, wid_ref[...], preferred_element_type=jnp.float32) + bid_ref[...]
    ui = jnp.dot(_relu(di).astype(jnp.bfloat16), wiu_ref[...],
                 preferred_element_type=jnp.float32)
    ui = _group_bn(ui, giu_ref[...], biu_ref[...], 4, eps)      # (N, 2*2*C)

    # block3.up on cat([x3, ui]): ReLU -> ConvT [folded, split by cin] -> BN
    u3 = (jnp.dot(_relu(x3).astype(jnp.bfloat16), w3a_ref[...],
                  preferred_element_type=jnp.float32)
          + jnp.dot(_relu(ui).astype(jnp.bfloat16), w3b_ref[...],
                    preferred_element_type=jnp.float32))
    u3 = _group_bn(u3, g3u_ref[...], b3u_ref[...], 16, eps)     # (N, 4*4*C)
    o_ref[...] = u3.astype(o_ref.dtype)


# ----------------------------------------------------------------------------
# pallas_call wrappers
# ----------------------------------------------------------------------------
def _gemm_call(patches, w, bias=None, gamma=None, beta=None, *,
               groups=1, post_act="none", out_dtype=jnp.bfloat16,
               row_tile=None):
    m, k = patches.shape
    n = w.shape[1]
    has_bias = bias is not None
    has_bn = gamma is not None
    # Row-grid only for BN-free layers (stats span all rows) with divisible M.
    if row_tile is not None and (has_bn or m % row_tile != 0 or row_tile % 8 != 0):
        row_tile = None

    args = [patches, w]
    if has_bias:
        args.append(bias.reshape(1, n).astype(jnp.float32))
    if has_bn:
        args += [gamma.reshape(1, n // groups).astype(jnp.float32),
                 beta.reshape(1, n // groups).astype(jnp.float32)]

    kern = functools.partial(_gemm_kernel, groups=groups, has_bn=has_bn,
                             has_bias=has_bias, post_act=post_act, eps=_BN_EPS)
    cost = pl.CostEstimate(
        flops=int(2 * m * k * n),
        transcendentals=int(m * n if post_act == "sigmoid" else 0),
        bytes_accessed=int(patches.size * patches.dtype.itemsize
                           + w.size * w.dtype.itemsize
                           + m * n * jnp.dtype(out_dtype).itemsize))
    out_shape = jax.ShapeDtypeStruct((m, n), out_dtype)

    if row_tile is None:
        vmem = pl.BlockSpec(memory_space=pltpu.MemorySpace.VMEM)
        return pl.pallas_call(
            kern, out_shape=out_shape,
            in_specs=[vmem] * len(args), out_specs=vmem,
            compiler_params=pltpu.CompilerParams(vmem_limit_bytes=_VMEM_LIMIT),
            cost_estimate=cost,
        )(*args)

    # Row-tiled path for the large BN-free outer layers: lets v7x's two
    # TensorCores split the independent row dimension.
    grid = (m // row_tile,)
    in_specs = [pl.BlockSpec((row_tile, k), lambda i: (i, 0)),
                pl.BlockSpec((k, n), lambda i: (0, 0))]
    if has_bias:
        in_specs.append(pl.BlockSpec((1, n), lambda i: (0, 0)))
    out_specs = pl.BlockSpec((row_tile, n), lambda i: (i, 0))
    return pl.pallas_call(
        kern, out_shape=out_shape, grid=grid,
        in_specs=in_specs, out_specs=out_specs,
        compiler_params=pltpu.CompilerParams(
            dimension_semantics=("parallel",), vmem_limit_bytes=_VMEM_LIMIT),
        cost_estimate=cost,
    )(*args)


def _inner_core_call(x2_flat, ic):
    n_rows = x2_flat.shape[0]
    n_out = ic["w3ua"].shape[1]
    args = [x2_flat,
            ic["w3d"], ic["g3d"], ic["b3d"],
            ic["wid"], ic["bid"],
            ic["wiu"], ic["giu"], ic["biu"],
            ic["w3ua"], ic["w3ub"], ic["g3u"], ic["b3u"]]
    flops = int(sum(2 * n_rows * ic[k].shape[0] * ic[k].shape[1]
                    for k in ("w3d", "wid", "wiu", "w3ua", "w3ub")))
    bytes_acc = int(sum(a.size * a.dtype.itemsize for a in args)
                    + n_rows * n_out * 2)
    vmem = pl.BlockSpec(memory_space=pltpu.MemorySpace.VMEM)
    return pl.pallas_call(
        functools.partial(_inner_core_kernel, eps=_BN_EPS),
        out_shape=jax.ShapeDtypeStruct((n_rows, n_out), jnp.bfloat16),
        in_specs=[vmem] * len(args), out_specs=vmem,
        compiler_params=pltpu.CompilerParams(vmem_limit_bytes=_VMEM_LIMIT),
        cost_estimate=pl.CostEstimate(flops=flops, transcendentals=0,
                                      bytes_accessed=bytes_acc),
    )(*args)


# ----------------------------------------------------------------------------
# Layer wrappers: XLA-side window extraction + fused Pallas GEMM epilogue
# ----------------------------------------------------------------------------
def conv2d_s2(x, w_flat, bias=None, gamma=None, beta=None, *,
              pre_act="none", post_act="none", out_dtype=jnp.bfloat16,
              row_tile=None):
    """Conv2d(k=4, s=2, p=1) on NHWC x with fused bias/BN/post-activation."""
    n, h, w, cin = x.shape
    ho, wo = h // 2, w // 2
    if pre_act == "leaky":
        x = _leaky(x)
    elif pre_act == "relu":
        x = _relu(x)
    xp = jnp.pad(x, ((0, 0), (1, 1), (1, 1), (0, 0)))
    taps = [xp[:, kh:kh + 2 * ho - 1:2, kw:kw + 2 * wo - 1:2, :]
            for kh in range(4) for kw in range(4)]
    patches = jnp.concatenate(taps, axis=-1).reshape(n * ho * wo, 16 * cin)
    patches = patches.astype(jnp.bfloat16)
    out = _gemm_call(patches, w_flat, bias, gamma, beta, groups=1,
                     post_act=post_act, out_dtype=out_dtype, row_tile=row_tile)
    return out.reshape(n, ho, wo, -1)


def conv_transpose2d_s2(x, w_bd, bias4=None, gamma=None, beta=None, *,
                        pre_act="none", post_act="none",
                        out_dtype=jnp.bfloat16, row_tile=None):
    """ConvTranspose2d(k=4, s=2, p=1) on NHWC x.

    Single lane-dense block-diagonal GEMM: 9 unit-shift windows of the padded
    input (M, 9*Cin) against (9*Cin, 4*Cout); output columns are the 4
    output-parity phases (r, c), interleaved back on the XLA side."""
    n, h, w, cin = x.shape
    cout = w_bd.shape[1] // 4
    if pre_act == "relu":
        x = _relu(x)
    elif pre_act == "leaky":
        x = _leaky(x)
    xp = jnp.pad(x, ((0, 0), (1, 1), (1, 1), (0, 0)))
    wins = [xp[:, a:a + h, b:b + w, :] for a in range(3) for b in range(3)]
    patches = jnp.concatenate(wins, axis=-1).reshape(n * h * w, 9 * cin)
    patches = patches.astype(jnp.bfloat16)
    out = _gemm_call(patches, w_bd, bias4, gamma, beta, groups=4,
                     post_act=post_act, out_dtype=out_dtype, row_tile=row_tile)
    out = out.reshape(n, h, w, 2, 2, cout)
    out = jnp.transpose(out, (0, 1, 3, 2, 4, 5))
    return out.reshape(n, 2 * h, 2 * w, cout)


# ----------------------------------------------------------------------------
# Weight preparation (deterministic init + layout folds, done once at init)
# ----------------------------------------------------------------------------
def _init_conv(key, cin, cout):
    k1, k2 = jax.random.split(key)
    bound = 1.0 / math.sqrt(cin * 16)
    w = jax.random.uniform(k1, (cout, cin, 4, 4), jnp.float32, -bound, bound)
    b = jax.random.uniform(k2, (cout,), jnp.float32, -bound, bound)
    # (Cout, Cin, 4, 4) -> (16*Cin, Cout), K-order (kh, kw, cin)
    w_flat = jnp.transpose(w, (2, 3, 1, 0)).reshape(16 * cin, cout)
    return w_flat, b


def _init_convt(key, cin, cout):
    k1, k2 = jax.random.split(key)
    bound = 1.0 / math.sqrt(cin * 16)
    w = jax.random.uniform(k1, (cin, cout, 4, 4), jnp.float32, -bound, bound)
    b = jax.random.uniform(k2, (cout,), jnp.float32, -bound, bound)
    return w, b


def _convt_blockdiag(w):
    """ConvT weight (Cin, Cout, 4, 4) -> block-diag (9*Cin, 4*Cout).

    Row block = window (a, b) of the padded input (a, b in 0..2); column block
    = output parity phase (r, c); value = w[:, :, 3-2a+r, 3-2b+c] when
    a-r, b-c in {0, 1}, else 0."""
    cin, cout = w.shape[0], w.shape[1]
    wbd = jnp.zeros((9 * cin, 4 * cout), jnp.float32)
    for a in range(3):
        for b in range(3):
            for r in range(2):
                for c in range(2):
                    if (a - r) in (0, 1) and (b - c) in (0, 1):
                        blk = w[:, :, 3 - 2 * a + r, 3 - 2 * b + c]
                        wbd = wbd.at[(a * 3 + b) * cin:(a * 3 + b + 1) * cin,
                                     (r * 2 + c) * cout:(r * 2 + c + 1) * cout
                                     ].set(blk)
    return wbd.astype(jnp.bfloat16)


def _conv_fold(w_flat, cin, cout, h, wsz):
    """Fold Conv2d(4,2,1) on an (h, wsz) input into one dense GEMM weight:
    rows = flattened (hi, wi, cin) input, cols = flattened (ho, wo, cout)."""
    ho, wo = h // 2, wsz // 2
    wf = jnp.zeros((h * wsz * cin, ho * wo * cout), jnp.float32)
    for oi in range(ho):
        for oj in range(wo):
            for kh in range(4):
                for kw in range(4):
                    hi = 2 * oi + kh - 1
                    wi = 2 * oj + kw - 1
                    if 0 <= hi < h and 0 <= wi < wsz:
                        blk = w_flat[(kh * 4 + kw) * cin:(kh * 4 + kw + 1) * cin, :]
                        wf = wf.at[(hi * wsz + wi) * cin:(hi * wsz + wi + 1) * cin,
                                   (oi * wo + oj) * cout:(oi * wo + oj + 1) * cout
                                   ].set(blk)
    return wf.astype(jnp.bfloat16)


def _convt_fold(w, h, wsz):
    """Fold ConvTranspose2d(4,2,1) on an (h, wsz) input into one dense GEMM
    weight: rows = flattened (hi, wi, cin), cols = (p, q, r, c, cout) where the
    output pixel is (2p+r, 2q+c)."""
    cin, cout = w.shape[0], w.shape[1]
    wf = jnp.zeros((h * wsz * cin, h * wsz * 4 * cout), jnp.float32)
    for p in range(h):
        for q in range(wsz):
            for r in range(2):
                for c in range(2):
                    for dr in range(2):
                        for dc in range(2):
                            hi = p + r + dr - 1
                            wi = q + c + dc - 1
                            if 0 <= hi < h and 0 <= wi < wsz:
                                blk = w[:, :, 3 - 2 * dr - r, 3 - 2 * dc - c]
                                col0 = ((p * wsz + q) * 4 + r * 2 + c) * cout
                                wf = wf.at[(hi * wsz + wi) * cin:
                                           (hi * wsz + wi + 1) * cin,
                                           col0:col0 + cout].set(blk)
    return wf.astype(jnp.bfloat16)


def init_params(key, in_channel=3, out_channel=3, fc=8):
    ks = jax.random.split(key, 10)
    p = {}

    # outer downconv (bias, no BN)
    w, b = _init_conv(ks[0], in_channel, fc)
    p["down_w"] = w.astype(jnp.bfloat16)
    p["down_b"] = b

    # block1.down: fc -> 2fc (BN => bias dropped: exactly cancelled)
    w, _ = _init_conv(ks[1], fc, 2 * fc)
    p["b1_dw"] = w.astype(jnp.bfloat16)
    p["b1_dg"] = jnp.ones((2 * fc,), jnp.float32)
    p["b1_db"] = jnp.zeros((2 * fc,), jnp.float32)

    # block2.down: 2fc -> 4fc (BN)
    w, _ = _init_conv(ks[2], 2 * fc, 4 * fc)
    p["b2_dw"] = w.astype(jnp.bfloat16)
    p["b2_dg"] = jnp.ones((4 * fc,), jnp.float32)
    p["b2_db"] = jnp.zeros((4 * fc,), jnp.float32)

    # ---- fused inner core: block3.down + innermost block + block3.up ----
    ic = {}
    w3d_flat, _ = _init_conv(ks[3], 4 * fc, 4 * fc)          # block3.down (BN)
    ic["w3d"] = _conv_fold(w3d_flat, 4 * fc, 4 * fc, 4, 4)   # (64fc, 16fc)
    ic["g3d"] = jnp.ones((1, 4 * fc), jnp.float32)
    ic["b3d"] = jnp.zeros((1, 4 * fc), jnp.float32)

    wid_flat, bid = _init_conv(ks[4], 4 * fc, 4 * fc)        # inner.down (bias)
    ic["wid"] = _conv_fold(wid_flat, 4 * fc, 4 * fc, 2, 2)   # (16fc, 4fc)
    ic["bid"] = bid.reshape(1, 4 * fc)

    wiu, _ = _init_convt(ks[5], 4 * fc, 4 * fc)              # inner.up (BN)
    ic["wiu"] = _convt_fold(wiu, 1, 1)                       # (4fc, 16fc)
    ic["giu"] = jnp.ones((1, 4 * fc), jnp.float32)
    ic["biu"] = jnp.zeros((1, 4 * fc), jnp.float32)

    w3u, _ = _init_convt(ks[6], 8 * fc, 4 * fc)              # block3.up (BN)
    ic["w3ua"] = _convt_fold(w3u[:4 * fc], 2, 2)             # x-skip half
    ic["w3ub"] = _convt_fold(w3u[4 * fc:], 2, 2)             # submodule half
    ic["g3u"] = jnp.ones((1, 4 * fc), jnp.float32)
    ic["b3u"] = jnp.zeros((1, 4 * fc), jnp.float32)
    p["inner_core"] = ic

    # block2.up: 8fc -> 2fc (BN), block-diag convT weight
    w, _ = _init_convt(ks[7], 8 * fc, 2 * fc)
    p["b2_uw"] = _convt_blockdiag(w)
    p["b2_ug"] = jnp.ones((2 * fc,), jnp.float32)
    p["b2_ub"] = jnp.zeros((2 * fc,), jnp.float32)

    # block1.up: 4fc -> fc (BN)
    w, _ = _init_convt(ks[8], 4 * fc, fc)
    p["b1_uw"] = _convt_blockdiag(w)
    p["b1_ug"] = jnp.ones((fc,), jnp.float32)
    p["b1_ub"] = jnp.zeros((fc,), jnp.float32)

    # outer upconv: 2fc -> out_channel (bias, sigmoid, no BN)
    w, b = _init_convt(ks[9], 2 * fc, out_channel)
    p["up_w"] = _convt_blockdiag(w)
    p["up_b4"] = jnp.tile(b, 4)    # bias replicated across the 4 phase groups
    return p


# ----------------------------------------------------------------------------
# Forward pass (7 pallas_calls)
# ----------------------------------------------------------------------------
def unet_small_base_forward(x_nchw, params):
    n = x_nchw.shape[0]
    x = jnp.transpose(x_nchw, (0, 2, 3, 1)).astype(jnp.float32)      # NHWC

    # outer downconv                                   (N, H/2, W/2, fc)
    h0 = conv2d_s2(x, params["down_w"], params["down_b"], row_tile=256)
    # block1.down: LeakyReLU -> Conv -> BN             (N, H/4, W/4, 2fc)
    x1 = conv2d_s2(h0, params["b1_dw"], None, params["b1_dg"], params["b1_db"],
                   pre_act="leaky")
    # block2.down: LeakyReLU -> Conv -> BN             (N, H/8, W/8, 4fc)
    x2 = conv2d_s2(x1, params["b2_dw"], None, params["b2_dg"], params["b2_db"],
                   pre_act="leaky")

    # fused inner core (block3.down + innermost block + block3.up)
    u3_flat = _inner_core_call(x2.reshape(n, -1), params["inner_core"])
    ch = u3_flat.shape[1] // 16                                     # 4fc
    u3 = u3_flat.reshape(n, 2, 2, 2, 2, ch)
    u3 = jnp.transpose(u3, (0, 1, 3, 2, 4, 5)).reshape(n, 4, 4, ch)

    # block2.up: ReLU -> ConvT -> BN on cat([x2, u3])  (N, H/4, W/4, 2fc)
    c2 = jnp.concatenate([x2, u3], axis=-1)
    u2 = conv_transpose2d_s2(c2, params["b2_uw"], None,
                             params["b2_ug"], params["b2_ub"], pre_act="relu")

    # block1.up: ReLU -> ConvT -> BN on cat([x1, u2])  (N, H/2, W/2, fc)
    c1 = jnp.concatenate([x1, u2], axis=-1)
    u1 = conv_transpose2d_s2(c1, params["b1_uw"], None,
                             params["b1_ug"], params["b1_ub"], pre_act="relu")

    # outer: ReLU -> ConvT -> Sigmoid on cat([h0, u1]) (N, H, W, out_ch)
    c0 = jnp.concatenate([h0, u1], axis=-1)
    y = conv_transpose2d_s2(c0, params["up_w"], params["up_b4"], None, None,
                            pre_act="relu", post_act="sigmoid",
                            out_dtype=jnp.float32, row_tile=256)
    return jnp.transpose(y, (0, 3, 1, 2))                            # NCHW


# ----------------------------------------------------------------------------
if __name__ == "__main__":
    key = jax.random.PRNGKey(0)
    k_x, k_p = jax.random.split(key)

    # 5 stride-2 downsamplings require spatial >= 32.
    N, Cin, H, W = 2, 3, 32, 32
    fc = 8
    x = jax.random.normal(k_x, (N, Cin, H, W), jnp.float32)
    params = init_params(k_p, in_channel=3, out_channel=3, fc=fc)

    fwd = jax.jit(lambda inp: unet_small_base_forward(inp, params))
    out = jax.block_until_ready(fwd(x))

    assert out.shape == (N, 3, H, W), out.shape
    assert bool(jnp.all(jnp.isfinite(out)))
    assert bool(jnp.all((out >= 0.0) & (out <= 1.0)))   # sigmoid output range
    print("KERNEL_OK")
</pallas_src>

<mosaic_0001>
module attributes {stable_mosaic.version = 11 : i64} {
  func.func @_gemm_kernel(%arg0: i32, %arg1: memref<256x48xbf16, #tpu.memory_space<vmem>>, %arg2: memref<48x8xbf16, #tpu.memory_space<vmem>>, %arg3: memref<1x8xf32, #tpu.memory_space<vmem>>, %arg4: memref<256x8xbf16, #tpu.memory_space<vmem>>) attributes {dimension_semantics = [#tpu.dimension_semantics<parallel>], iteration_bounds = array<i64: 2>, scalar_prefetch = 0 : i64, scratch_operands = 0 : i64, tpu.core_type = #tpu.core_type<tc>, window_params = [{transform_indices = @transform_0, window_bounds = array<i64: 256, 48>}, {pipeline_mode = #tpu.pipeline_mode<synchronous>, transform_indices = @transform_1, window_bounds = array<i64: 48, 8>}, {pipeline_mode = #tpu.pipeline_mode<synchronous>, transform_indices = @transform_2, window_bounds = array<i64: 1, 8>}, {transform_indices = @transform_3, window_bounds = array<i64: 256, 8>}]} {
    %c0 = arith.constant 0 : index
    %c0_0 = arith.constant 0 : index
    %0 = vector.load %arg1[%c0, %c0_0] : memref<256x48xbf16, #tpu.memory_space<vmem>>, vector<256x48xbf16>
    %c0_1 = arith.constant 0 : index
    %c0_2 = arith.constant 0 : index
    %1 = vector.load %arg2[%c0_1, %c0_2] : memref<48x8xbf16, #tpu.memory_space<vmem>>, vector<48x8xbf16>
    %cst = arith.constant dense<0.000000e+00> : vector<256x8xf32>
    %2 = tpu.matmul %0, %1, %cst {dimension_numbers = #tpu.dot_dimension_numbers<[1], [0], [0], [1], [0, 0, 1, 1], [], []>} : vector<256x48xbf16>, vector<48x8xbf16>, vector<256x8xf32> -> vector<256x8xf32>
    %c0_3 = arith.constant 0 : index
    %c0_4 = arith.constant 0 : index
    %3 = vector.load %arg3[%c0_3, %c0_4] : memref<1x8xf32, #tpu.memory_space<vmem>>, vector<1x8xf32>
    %4 = vector.broadcast %3 : vector<1x8xf32> to vector<256x8xf32>
    %5 = arith.addf %2, %4 : vector<256x8xf32>
    %6 = arith.truncf %5 : vector<256x8xf32> to vector<256x8xbf16>
    %c0_5 = arith.constant 0 : index
    %c0_6 = arith.constant 0 : index
    %7 = vector.load %arg4[%c0_5, %c0_6] : memref<256x8xbf16, #tpu.memory_space<vmem>>, vector<256x8xbf16>
    tpu.vector_store %arg4[%c0_5, %c0_6], %6 {strides = array<i32>} : memref<256x8xbf16, #tpu.memory_space<vmem>>, vector<256x8xbf16>,
    return
  }
  func.func @transform_0(%arg0: i32) -> (i32, i32) {
    %c0_i32 = arith.constant 0 : i32
    %c0_i32_0 = arith.constant 0 : i32
    return %arg0, %c0_i32 : i32, i32
  }
  func.func @transform_1(%arg0: i32) -> (i32, i32) {
    %c0_i32 = arith.constant 0 : i32
    %c0_i32_0 = arith.constant 0 : i32
    %c0_i32_1 = arith.constant 0 : i32
    return %c0_i32, %c0_i32_0 : i32, i32
  }
  func.func @transform_2(%arg0: i32) -> (i32, i32) {
    %c0_i32 = arith.constant 0 : i32
    %c0_i32_0 = arith.constant 0 : i32
    %c0_i32_1 = arith.constant 0 : i32
    return %c0_i32, %c0_i32_0 : i32, i32
  }
  func.func @transform_3(%arg0: i32) -> (i32, i32) {
    %c0_i32 = arith.constant 0 : i32
    %c0_i32_0 = arith.constant 0 : i32
    return %arg0, %c0_i32 : i32, i32
  }
}

module attributes {stable_mosaic.version = 11 : i64} {
  func.func @_gemm_kernel(%arg0: memref<128x128xbf16, #tpu.memory_space<vmem>>, %arg1: memref<128x16xbf16, #tpu.memory_space<vmem>>, %arg2: memref<1x16xf32, #tpu.memory_space<vmem>>, %arg3: memref<1x16xf32, #tpu.memory_space<vmem>>, %arg4: memref<128x16xbf16, #tpu.memory_space<vmem>>) attributes {dimension_semantics = [], scalar_prefetch = 0 : i64, scratch_operands = 0 : i64, tpu.core_type = #tpu.core_type<tc>} {
    %c0 = arith.constant 0 : index
    %c0_0 = arith.constant 0 : index
    %0 = vector.load %arg0[%c0, %c0_0] : memref<128x128xbf16, #tpu.memory_space<vmem>>, vector<128x128xbf16>
    %c0_1 = arith.constant 0 : index
    %c0_2 = arith.constant 0 : index
    %1 = vector.load %arg1[%c0_1, %c0_2] : memref<128x16xbf16, #tpu.memory_space<vmem>>, vector<128x16xbf16>
    %cst = arith.constant dense<0.000000e+00> : vector<128x16xf32>
    %2 = tpu.matmul %0, %1, %cst {dimension_numbers = #tpu.dot_dimension_numbers<[1], [0], [0], [1], [0, 0, 1, 1], [], []>} : vector<128x128xbf16>, vector<128x16xbf16>, vector<128x16xf32> -> vector<128x16xf32>
    %c0_3 = arith.constant 0 : index
    %c0_4 = arith.constant 0 : index
    %3 = vector.load %arg2[%c0_3, %c0_4] : memref<1x16xf32, #tpu.memory_space<vmem>>, vector<1x16xf32>
    %c0_5 = arith.constant 0 : index
    %c0_6 = arith.constant 0 : index
    %4 = vector.load %arg3[%c0_5, %c0_6] : memref<1x16xf32, #tpu.memory_space<vmem>>, vector<1x16xf32>
    %cst_7 = arith.constant dense<0.000000e+00> : vector<16xf32>
    %5 = vector.multi_reduction <add>, %2, %cst_7 [0] : vector<128x16xf32> to vector<16xf32>
    %6 = vector.shape_cast %5 : vector<16xf32> to vector<1x16xf32>
    %cst_8 = arith.constant 0.000000e+00 : f32
    %7 = vector.broadcast %cst_8 : f32 to vector<1x16xf32>
    %8 = arith.addf %7, %6 : vector<1x16xf32>
    %cst_9 = arith.constant 1.280000e+02 : f32
    %9 = vector.broadcast %cst_9 : f32 to vector<1x16xf32>
    %10 = arith.divf %8, %9 : vector<1x16xf32>
    %11 = vector.broadcast %10 : vector<1x16xf32> to vector<128x16xf32>
    %12 = arith.subf %2, %11 : vector<128x16xf32>
    %13 = arith.mulf %12, %12 : vector<128x16xf32>
    %cst_10 = arith.constant dense<0.000000e+00> : vector<16xf32>
    %14 = vector.multi_reduction <add>, %13, %cst_10 [0] : vector<128x16xf32> to vector<16xf32>
    %15 = vector.shape_cast %14 : vector<16xf32> to vector<1x16xf32>
    %cst_11 = arith.constant 0.000000e+00 : f32
    %16 = vector.broadcast %cst_11 : f32 to vector<1x16xf32>
    %17 = arith.addf %16, %15 : vector<1x16xf32>
    %cst_12 = arith.constant 1.280000e+02 : f32
    %18 = vector.broadcast %cst_12 : f32 to vector<1x16xf32>
    %19 = arith.divf %17, %18 : vector<1x16xf32>
    %cst_13 = arith.constant 9.99999974E-6 : f32
    %20 = vector.broadcast %cst_13 : f32 to vector<1x16xf32>
    %21 = arith.addf %19, %20 : vector<1x16xf32>
    %22 = math.rsqrt %21 : vector<1x16xf32>
    %23 = arith.mulf %3, %22 : vector<1x16xf32>
    %24 = arith.mulf %10, %23 : vector<1x16xf32>
    %25 = arith.subf %4, %24 : vector<1x16xf32>
    %26 = vector.broadcast %23 : vector<1x16xf32> to vector<128x16xf32>
    %27 = arith.mulf %2, %26 : vector<128x16xf32>
    %28 = vector.broadcast %25 : vector<1x16xf32> to vector<128x16xf32>
    %29 = arith.addf %27, %28 : vector<128x16xf32>
    %30 = arith.truncf %29 : vector<128x16xf32> to vector<128x16xbf16>
    %c0_14 = arith.constant 0 : index
    %c0_15 = arith.constant 0 : index
    %31 = vector.load %arg4[%c0_14, %c0_15] : memref<128x16xbf16, #tpu.memory_space<vmem>>, vector<128x16xbf16>
    tpu.vector_store %arg4[%c0_14, %c0_15], %30 {strides = array<i32>} : memref<128x16xbf16, #tpu.memory_space<vmem>>, vector<128x16xbf16>,
    return
  }
}

module attributes {stable_mosaic.version = 11 : i64} {
  func.func @_gemm_kernel(%arg0: memref<32x256xbf16, #tpu.memory_space<vmem>>, %arg1: memref<256x32xbf16, #tpu.memory_space<vmem>>, %arg2: memref<1x32xf32, #tpu.memory_space<vmem>>, %arg3: memref<1x32xf32, #tpu.memory_space<vmem>>, %arg4: memref<32x32xbf16, #tpu.memory_space<vmem>>) attributes {dimension_semantics = [], scalar_prefetch = 0 : i64, scratch_operands = 0 : i64, tpu.core_type = #tpu.core_type<tc>} {
    %c0 = arith.constant 0 : index
    %c0_0 = arith.constant 0 : index
    %0 = vector.load %arg0[%c0, %c0_0] : memref<32x256xbf16, #tpu.memory_space<vmem>>, vector<32x256xbf16>
    %c0_1 = arith.constant 0 : index
    %c0_2 = arith.constant 0 : index
    %1 = vector.load %arg1[%c0_1, %c0_2] : memref<256x32xbf16, #tpu.memory_space<vmem>>, vector<256x32xbf16>
    %cst = arith.constant dense<0.000000e+00> : vector<32x32xf32>
    %2 = tpu.matmul %0, %1, %cst {dimension_numbers = #tpu.dot_dimension_numbers<[1], [0], [0], [1], [0, 0, 1, 1], [], []>} : vector<32x256xbf16>, vector<256x32xbf16>, vector<32x32xf32> -> vector<32x32xf32>
    %c0_3 = arith.constant 0 : index
    %c0_4 = arith.constant 0 : index
    %3 = vector.load %arg2[%c0_3, %c0_4] : memref<1x32xf32, #tpu.memory_space<vmem>>, vector<1x32xf32>
    %c0_5 = arith.constant 0 : index
    %c0_6 = arith.constant 0 : index
    %4 = vector.load %arg3[%c0_5, %c0_6] : memref<1x32xf32, #tpu.memory_space<vmem>>, vector<1x32xf32>
    %cst_7 = arith.constant dense<0.000000e+00> : vector<32xf32>
    %5 = vector.multi_reduction <add>, %2, %cst_7 [0] : vector<32x32xf32> to vector<32xf32>
    %6 = vector.shape_cast %5 : vector<32xf32> to vector<1x32xf32>
    %cst_8 = arith.constant 0.000000e+00 : f32
    %7 = vector.broadcast %cst_8 : f32 to vector<1x32xf32>
    %8 = arith.addf %7, %6 : vector<1x32xf32>
    %cst_9 = arith.constant 3.200000e+01 : f32
    %9 = vector.broadcast %cst_9 : f32 to vector<1x32xf32>
    %10 = arith.divf %8, %9 : vector<1x32xf32>
    %11 = vector.broadcast %10 : vector<1x32xf32> to vector<32x32xf32>
    %12 = arith.subf %2, %11 : vector<32x32xf32>
    %13 = arith.mulf %12, %12 : vector<32x32xf32>
    %cst_10 = arith.constant dense<0.000000e+00> : vector<32xf32>
    %14 = vector.multi_reduction <add>, %13, %cst_10 [0] : vector<32x32xf32> to vector<32xf32>
    %15 = vector.shape_cast %14 : vector<32xf32> to vector<1x32xf32>
    %cst_11 = arith.constant 0.000000e+00 : f32
    %16 = vector.broadcast %cst_11 : f32 to vector<1x32xf32>
    %17 = arith.addf %16, %15 : vector<1x32xf32>
    %cst_12 = arith.constant 3.200000e+01 : f32
    %18 = vector.broadcast %cst_12 : f32 to vector<1x32xf32>
    %19 = arith.divf %17, %18 : vector<1x32xf32>
    %cst_13 = arith.constant 9.99999974E-6 : f32
    %20 = vector.broadcast %cst_13 : f32 to vector<1x32xf32>
    %21 = arith.addf %19, %20 : vector<1x32xf32>
    %22 = math.rsqrt %21 : vector<1x32xf32>
    %23 = arith.mulf %3, %22 : vector<1x32xf32>
    %24 = arith.mulf %10, %23 : vector<1x32xf32>
    %25 = arith.subf %4, %24 : vector<1x32xf32>
    %26 = vector.broadcast %23 : vector<1x32xf32> to vector<32x32xf32>
    %27 = arith.mulf %2, %26 : vector<32x32xf32>
    %28 = vector.broadcast %25 : vector<1x32xf32> to vector<32x32xf32>
    %29 = arith.addf %27, %28 : vector<32x32xf32>
    %30 = arith.truncf %29 : vector<32x32xf32> to vector<32x32xbf16>
    %c0_14 = arith.constant 0 : index
    %c0_15 = arith.constant 0 : index
    %31 = vector.load %arg4[%c0_14, %c0_15] : memref<32x32xbf16, #tpu.memory_space<vmem>>, vector<32x32xbf16>
    tpu.vector_store %arg4[%c0_14, %c0_15], %30 {strides = array<i32>} : memref<32x32xbf16, #tpu.memory_space<vmem>>, vector<32x32xbf16>,
    return
  }
}

module attributes {stable_mosaic.version = 11 : i64} {
  func.func @_inner_core_kernel(%arg0: memref<2x512xbf16, #tpu.memory_space<vmem>>, %arg1: memref<512x128xbf16, #tpu.memory_space<vmem>>, %arg2: memref<1x32xf32, #tpu.memory_space<vmem>>, %arg3: memref<1x32xf32, #tpu.memory_space<vmem>>, %arg4: memref<128x32xbf16, #tpu.memory_space<vmem>>, %arg5: memref<1x32xf32, #tpu.memory_space<vmem>>, %arg6: memref<32x128xbf16, #tpu.memory_space<vmem>>, %arg7: memref<1x32xf32, #tpu.memory_space<vmem>>, %arg8: memref<1x32xf32, #tpu.memory_space<vmem>>, %arg9: memref<128x512xbf16, #tpu.memory_space<vmem>>, %arg10: memref<128x512xbf16, #tpu.memory_space<vmem>>, %arg11: memref<1x32xf32, #tpu.memory_space<vmem>>, %arg12: memref<1x32xf32, #tpu.memory_space<vmem>>, %arg13: memref<2x512xbf16, #tpu.memory_space<vmem>>) attributes {dimension_semantics = [], scalar_prefetch = 0 : i64, scratch_operands = 0 : i64, tpu.core_type = #tpu.core_type<tc>} {
    %c0 = arith.constant 0 : index
    %c0_0 = arith.constant 0 : index
    %0 = vector.load %arg0[%c0, %c0_0] : memref<2x512xbf16, #tpu.memory_space<vmem>>, vector<2x512xbf16>
    %cst = arith.constant 0.000000e+00 : bf16
    %1 = vector.broadcast %cst : bf16 to vector<2x512xbf16>
    %2 = arith.cmpf oge, %0, %1 : vector<2x512xbf16>
    %cst_1 = arith.constant 2.001950e-01 : bf16
    %3 = vector.broadcast %cst_1 : bf16 to vector<2x512xbf16>
    %4 = arith.mulf %3, %0 : vector<2x512xbf16>
    %5 = arith.select %2, %0, %4 : vector<2x512xi1>, vector<2x512xbf16>
    %c0_2 = arith.constant 0 : index
    %c0_3 = arith.constant 0 : index
    %6 = vector.load %arg1[%c0_2, %c0_3] : memref<512x128xbf16, #tpu.memory_space<vmem>>, vector<512x128xbf16>
    %cst_4 = arith.constant dense<0.000000e+00> : vector<2x128xf32>
    %7 = tpu.matmul %5, %6, %cst_4 {dimension_numbers = #tpu.dot_dimension_numbers<[1], [0], [0], [1], [0, 0, 1, 1], [], []>} : vector<2x512xbf16>, vector<512x128xbf16>, vector<2x128xf32> -> vector<2x128xf32>
    %c0_5 = arith.constant 0 : index
    %c0_6 = arith.constant 0 : index
    %8 = vector.load %arg2[%c0_5, %c0_6] : memref<1x32xf32, #tpu.memory_space<vmem>>, vector<1x32xf32>
    %c0_7 = arith.constant 0 : index
    %c0_8 = arith.constant 0 : index
    %9 = vector.load %arg3[%c0_7, %c0_8] : memref<1x32xf32, #tpu.memory_space<vmem>>, vector<1x32xf32>
    %cst_9 = arith.constant dense<0.000000e+00> : vector<128xf32>
    %10 = vector.multi_reduction <add>, %7, %cst_9 [0] : vector<2x128xf32> to vector<128xf32>
    %11 = vector.shape_cast %10 : vector<128xf32> to vector<1x128xf32>
    %12 = vector.extract_strided_slice %11 {offsets = [0, 0], sizes = [1, 32], strides = [1, 1]} : vector<1x128xf32> to vector<1x32xf32>
    %13 = vector.extract_strided_slice %11 {offsets = [0, 32], sizes = [1, 32], strides = [1, 1]} : vector<1x128xf32> to vector<1x32xf32>
    %14 = vector.extract_strided_slice %11 {offsets = [0, 64], sizes = [1, 32], strides = [1, 1]} : vector<1x128xf32> to vector<1x32xf32>
    %15 = vector.extract_strided_slice %11 {offsets = [0, 96], sizes = [1, 32], strides = [1, 1]} : vector<1x128xf32> to vector<1x32xf32>
    %cst_10 = arith.constant 0.000000e+00 : f32
    %16 = vector.broadcast %cst_10 : f32 to vector<1x32xf32>
    %17 = arith.addf %16, %12 : vector<1x32xf32>
    %18 = arith.addf %17, %13 : vector<1x32xf32>
    %19 = arith.addf %18, %14 : vector<1x32xf32>
    %20 = arith.addf %19, %15 : vector<1x32xf32>
    %cst_11 = arith.constant 8.000000e+00 : f32
    %21 = vector.broadcast %cst_11 : f32 to vector<1x32xf32>
    %22 = arith.divf %20, %21 : vector<1x32xf32>
    %23 = tpu.concatenate %22, %22, %22, %22 in 1 : vector<1x32xf32>, vector<1x32xf32>, vector<1x32xf32>, vector<1x32xf32> -> vector<1x128xf32>
    %24 = vector.broadcast %23 : vector<1x128xf32> to vector<2x128xf32>
    %25 = arith.subf %7, %24 : vector<2x128xf32>
    %26 = arith.mulf %25, %25 : vector<2x128xf32>
    %cst_12 = arith.constant dense<0.000000e+00> : vector<128xf32>
    %27 = vector.multi_reduction <add>, %26, %cst_12 [0] : vector<2x128xf32> to vector<128xf32>
    %28 = vector.shape_cast %27 : vector<128xf32> to vector<1x128xf32>
    %29 = vector.extract_strided_slice %28 {offsets = [0, 0], sizes = [1, 32], strides = [1, 1]} : vector<1x128xf32> to vector<1x32xf32>
    %30 = vector.extract_strided_slice %28 {offsets = [0, 32], sizes = [1, 32], strides = [1, 1]} : vector<1x128xf32> to vector<1x32xf32>
    %31 = vector.extract_strided_slice %28 {offsets = [0, 64], sizes = [1, 32], strides = [1, 1]} : vector<1x128xf32> to vector<1x32xf32>
    %32 = vector.extract_strided_slice %28 {offsets = [0, 96], sizes = [1, 32], strides = [1, 1]} : vector<1x128xf32> to vector<1x32xf32>
    %cst_13 = arith.constant 0.000000e+00 : f32
    %33 = vector.broadcast %cst_13 : f32 to vector<1x32xf32>
    %34 = arith.addf %33, %29 : vector<1x32xf32>
    %35 = arith.addf %34, %30 : vector<1x32xf32>
    %36 = arith.addf %35, %31 : vector<1x32xf32>
    %37 = arith.addf %36, %32 : vector<1x32xf32>
    %cst_14 = arith.constant 8.000000e+00 : f32
    %38 = vector.broadcast %cst_14 : f32 to vector<1x32xf32>
    %39 = arith.divf %37, %38 : vector<1x32xf32>
    %cst_15 = arith.constant 9.99999974E-6 : f32
    %40 = vector.broadcast %cst_15 : f32 to vector<1x32xf32>
    %41 = arith.addf %39, %40 : vector<1x32xf32>
    %42 = math.rsqrt %41 : vector<1x32xf32>
    %43 = arith.mulf %8, %42 : vector<1x32xf32>
    %44 = arith.mulf %22, %43 : vector<1x32xf32>
    %45 = arith.subf %9, %44 : vector<1x32xf32>
    %46 = tpu.concatenate %43, %43, %43, %43 in 1 : vector<1x32xf32>, vector<1x32xf32>, vector<1x32xf32>, vector<1x32xf32> -> vector<1x128xf32>
    %47 = tpu.concatenate %45, %45, %45, %45 in 1 : vector<1x32xf32>, vector<1x32xf32>, vector<1x32xf32>, vector<1x32xf32> -> vector<1x128xf32>
    %48 = vector.broadcast %46 : vector<1x128xf32> to vector<2x128xf32>
    %49 = arith.mulf %7, %48 : vector<2x128xf32>
    %50 = vector.broadcast %47 : vector<1x128xf32> to vector<2x128xf32>
    %51 = arith.addf %49, %50 : vector<2x128xf32>
    %cst_16 = arith.constant 0.000000e+00 : f32
    %52 = vector.broadcast %cst_16 : f32 to vector<2x128xf32>
    %53 = arith.cmpf oge, %51, %52 : vector<2x128xf32>
    %cst_17 = arith.constant 2.000000e-01 : f32
    %54 = vector.broadcast %cst_17 : f32 to vector<2x128xf32>
    %55 = arith.mulf %54, %51 : vector<2x128xf32>
    %56 = arith.select %53, %51, %55 : vector<2x128xi1>, vector<2x128xf32>
    %57 = arith.truncf %56 : vector<2x128xf32> to vector<2x128xbf16>
    %c0_18 = arith.constant 0 : index
    %c0_19 = arith.constant 0 : index
    %58 = vector.load %arg4[%c0_18, %c0_19] : memref<128x32xbf16, #tpu.memory_space<vmem>>, vector<128x32xbf16>
    %cst_20 = arith.constant dense<0.000000e+00> : vector<2x32xf32>
    %59 = tpu.matmul %57, %58, %cst_20 {dimension_numbers = #tpu.dot_dimension_numbers<[1], [0], [0], [1], [0, 0, 1, 1], [], []>} : vector<2x128xbf16>, vector<128x32xbf16>, vector<2x32xf32> -> vector<2x32xf32>
    %c0_21 = arith.constant 0 : index
    %c0_22 = arith.constant 0 : index
    %60 = vector.load %arg5[%c0_21, %c0_22] : memref<1x32xf32, #tpu.memory_space<vmem>>, vector<1x32xf32>
    %61 = vector.broadcast %60 : vector<1x32xf32> to vector<2x32xf32>
    %62 = arith.addf %59, %61 : vector<2x32xf32>
    %cst_23 = arith.constant 0.000000e+00 : f32
    %63 = vector.broadcast %cst_23 : f32 to vector<2x32xf32>
    %64 = arith.maximumf %62, %63 : vector<2x32xf32>
    %65 = arith.truncf %64 : vector<2x32xf32> to vector<2x32xbf16>
    %c0_24 = arith.constant 0 : index
    %c0_25 = arith.constant 0 : index
    %66 = vector.load %arg6[%c0_24, %c0_25] : memref<32x128xbf16, #tpu.memory_space<vmem>>, vector<32x128xbf16>
    %cst_26 = arith.constant dense<0.000000e+00> : vector<2x128xf32>
    %67 = tpu.matmul %65, %66, %cst_26 {dimension_numbers = #tpu.dot_dimension_numbers<[1], [0], [0], [1], [0, 0, 1, 1], [], []>} : vector<2x32xbf16>, vector<32x128xbf16>, vector<2x128xf32> -> vector<2x128xf32>
    %c0_27 = arith.constant 0 : index
    %c0_28 = arith.constant 0 : index
    %68 = vector.load %arg7[%c0_27, %c0_28] : memref<1x32xf32, #tpu.memory_space<vmem>>, vector<1x32xf32>
    %c0_29 = arith.constant 0 : index
    %c0_30 = arith.constant 0 : index
    %69 = vector.load %arg8[%c0_29, %c0_30] : memref<1x32xf32, #tpu.memory_space<vmem>>, vector<1x32xf32>
    %cst_31 = arith.constant dense<0.000000e+00> : vector<128xf32>
    %70 = vector.multi_reduction <add>, %67, %cst_31 [0] : vector<2x128xf32> to vector<128xf32>
    %71 = vector.shape_cast %70 : vector<128xf32> to vector<1x128xf32>
    %72 = vector.extract_strided_slice %71 {offsets = [0, 0], sizes = [1, 32], strides = [1, 1]} : vector<1x128xf32> to vector<1x32xf32>
    %73 = vector.extract_strided_slice %71 {offsets = [0, 32], sizes = [1, 32], strides = [1, 1]} : vector<1x128xf32> to vector<1x32xf32>
    %74 = vector.extract_strided_slice %71 {offsets = [0, 64], sizes = [1, 32], strides = [1, 1]} : vector<1x128xf32> to vector<1x32xf32>
    %75 = vector.extract_strided_slice %71 {offsets = [0, 96], sizes = [1, 32], strides = [1, 1]} : vector<1x128xf32> to vector<1x32xf32>
    %cst_32 = arith.constant 0.000000e+00 : f32
    %76 = vector.broadcast %cst_32 : f32 to vector<1x32xf32>
    %77 = arith.addf %76, %72 : vector<1x32xf32>
    %78 = arith.addf %77, %73 : vector<1x32xf32>
    %79 = arith.addf %78, %74 : vector<1x32xf32>
    %80 = arith.addf %79, %75 : vector<1x32xf32>
    %cst_33 = arith.constant 8.000000e+00 : f32
    %81 = vector.broadcast %cst_33 : f32 to vector<1x32xf32>
    %82 = arith.divf %80, %81 : vector<1x32xf32>
    %83 = tpu.concatenate %82, %82, %82, %82 in 1 : vector<1x32xf32>, vector<1x32xf32>, vector<1x32xf32>, vector<1x32xf32> -> vector<1x128xf32>
    %84 = vector.broadcast %83 : vector<1x128xf32> to vector<2x128xf32>
    %85 = arith.subf %67, %84 : vector<2x128xf32>
    %86 = arith.mulf %85, %85 : vector<2x128xf32>
    %cst_34 = arith.constant dense<0.000000e+00> : vector<128xf32>
    %87 = vector.multi_reduction <add>, %86, %cst_34 [0] : vector<2x128xf32> to vector<128xf32>
    %88 = vector.shape_cast %87 : vector<128xf32> to vector<1x128xf32>
    %89 = vector.extract_strided_slice %88 {offsets = [0, 0], sizes = [1, 32], strides = [1, 1]} : vector<1x128xf32> to vector<1x32xf32>
    %90 = vector.extract_strided_slice %88 {offsets = [0, 32], sizes = [1, 32], strides = [1, 1]} : vector<1x128xf32> to vector<1x32xf32>
    %91 = vector.extract_strided_slice %88 {offsets = [0, 64], sizes = [1, 32], strides = [1, 1]} : vector<1x128xf32> to vector<1x32xf32>
    %92 = vector.extract_strided_slice %88 {offsets = [0, 96], sizes = [1, 32], strides = [1, 1]} : vector<1x128xf32> to vector<1x32xf32>
    %cst_35 = arith.constant 0.000000e+00 : f32
    %93 = vector.broadcast %cst_35 : f32 to vector<1x32xf32>
    %94 = arith.addf %93, %89 : vector<1x32xf32>
    %95 = arith.addf %94, %90 : vector<1x32xf32>
    %96 = arith.addf %95, %91 : vector<1x32xf32>
    %97 = arith.addf %96, %92 : vector<1x32xf32>
    %cst_36 = arith.constant 8.000000e+00 : f32
    %98 = vector.broadcast %cst_36 : f32 to vector<1x32xf32>
    %99 = arith.divf %97, %98 : vector<1x32xf32>
    %cst_37 = arith.constant 9.99999974E-6 : f32
    %100 = vector.broadcast %cst_37 : f32 to vector<1x32xf32>
    %101 = arith.addf %99, %100 : vector<1x32xf32>
    %102 = math.rsqrt %101 : vector<1x32xf32>
    %103 = arith.mulf %68, %102 : vector<1x32xf32>
    %104 = arith.mulf %82, %103 : vector<1x32xf32>
    %105 = arith.subf %69, %104 : vector<1x32xf32>
    %106 = tpu.concatenate %103, %103, %103, %103 in 1 : vector<1x32xf32>, vector<1x32xf32>, vector<1x32xf32>, vector<1x32xf32> -> vector<1x128xf32>
    %107 = tpu.concatenate %105, %105, %105, %105 in 1 : vector<1x32xf32>, vector<1x32xf32>, vector<1x32xf32>, vector<1x32xf32> -> vector<1x128xf32>
    %108 = vector.broadcast %106 : vector<1x128xf32> to vector<2x128xf32>
    %109 = arith.mulf %67, %108 : vector<2x128xf32>
    %110 = vector.broadcast %107 : vector<1x128xf32> to vector<2x128xf32>
    %111 = arith.addf %109, %110 : vector<2x128xf32>
    %cst_38 = arith.constant 0.000000e+00 : f32
    %112 = vector.broadcast %cst_38 : f32 to vector<2x128xf32>
    %113 = arith.maximumf %51, %112 : vector<2x128xf32>
    %114 = arith.truncf %113 : vector<2x128xf32> to vector<2x128xbf16>
    %c0_39 = arith.constant 0 : index
    %c0_40 = arith.constant 0 : index
    %115 = vector.load %arg9[%c0_39, %c0_40] : memref<128x512xbf16, #tpu.memory_space<vmem>>, vector<128x512xbf16>
    %cst_41 = arith.constant dense<0.000000e+00> : vector<2x512xf32>
    %116 = tpu.matmul %114, %115, %cst_41 {dimension_numbers = #tpu.dot_dimension_numbers<[1], [0], [0], [1], [0, 0, 1, 1], [], []>} : vector<2x128xbf16>, vector<128x512xbf16>, vector<2x512xf32> -> vector<2x512xf32>
    %cst_42 = arith.constant 0.000000e+00 : f32
    %117 = vector.broadcast %cst_42 : f32 to vector<2x128xf32>
    %118 = arith.maximumf %111, %117 : vector<2x128xf32>
    %119 = arith.truncf %118 : vector<2x128xf32> to vector<2x128xbf16>
    %c0_43 = arith.constant 0 : index
    %c0_44 = arith.constant 0 : index
    %120 = vector.load %arg10[%c0_43, %c0_44] : memref<128x512xbf16, #tpu.memory_space<vmem>>, vector<128x512xbf16>
    %cst_45 = arith.constant dense<0.000000e+00> : vector<2x512xf32>
    %121 = tpu.matmul %119, %120, %cst_45 {dimension_numbers = #tpu.dot_dimension_numbers<[1], [0], [0], [1], [0, 0, 1, 1], [], []>} : vector<2x128xbf16>, vector<128x512xbf16>, vector<2x512xf32> -> vector<2x512xf32>
    %122 = arith.addf %116, %121 : vector<2x512xf32>
    %c0_46 = arith.constant 0 : index
    %c0_47 = arith.constant 0 : index
    %123 = vector.load %arg11[%c0_46, %c0_47] : memref<1x32xf32, #tpu.memory_space<vmem>>, vector<1x32xf32>
    %c0_48 = arith.constant 0 : index
    %c0_49 = arith.constant 0 : index
    %124 = vector.load %arg12[%c0_48, %c0_49] : memref<1x32xf32, #tpu.memory_space<vmem>>, vector<1x32xf32>
    %cst_50 = arith.constant dense<0.000000e+00> : vector<512xf32>
    %125 = vector.multi_reduction <add>, %122, %cst_50 [0] : vector<2x512xf32> to vector<512xf32>
    %126 = vector.shape_cast %125 : vector<512xf32> to vector<1x512xf32>
    %127 = vector.extract_strided_slice %126 {offsets = [0, 0], sizes = [1, 32], strides = [1, 1]} : vector<1x512xf32> to vector<1x32xf32>
    %128 = vector.extract_strided_slice %126 {offsets = [0, 32], sizes = [1, 32], strides = [1, 1]} : vector<1x512xf32> to vector<1x32xf32>
    %129 = vector.extract_strided_slice %126 {offsets = [0, 64], sizes = [1, 32], strides = [1, 1]} : vector<1x512xf32> to vector<1x32xf32>
    %130 = vector.extract_strided_slice %126 {offsets = [0, 96], sizes = [1, 32], strides = [1, 1]} : vector<1x512xf32> to vector<1x32xf32>
    %131 = vector.extract_strided_slice %126 {offsets = [0, 128], sizes = [1, 32], strides = [1, 1]} : vector<1x512xf32> to vector<1x32xf32>
    %132 = vector.extract_strided_slice %126 {offsets = [0, 160], sizes = [1, 32], strides = [1, 1]} : vector<1x512xf32> to vector<1x32xf32>
    %133 = vector.extract_strided_slice %126 {offsets = [0, 192], sizes = [1, 32], strides = [1, 1]} : vector<1x512xf32> to vector<1x32xf32>
    %134 = vector.extract_strided_slice %126 {offsets = [0, 224], sizes = [1, 32], strides = [1, 1]} : vector<1x512xf32> to vector<1x32xf32>
    %135 = vector.extract_strided_slice %126 {offsets = [0, 256], sizes = [1, 32], strides = [1, 1]} : vector<1x512xf32> to vector<1x32xf32>
    %136 = vector.extract_strided_slice %126 {offsets = [0, 288], sizes = [1, 32], strides = [1, 1]} : vector<1x512xf32> to vector<1x32xf32>
    %137 = vector.extract_strided_slice %126 {offsets = [0, 320], sizes = [1, 32], strides = [1, 1]} : vector<1x512xf32> to vector<1x32xf32>
    %138 = vector.extract_strided_slice %126 {offsets = [0, 352], sizes = [1, 32], strides = [1, 1]} : vector<1x512xf32> to vector<1x32xf32>
    %139 = vector.extract_strided_slice %126 {offsets = [0, 384], sizes = [1, 32], strides = [1, 1]} : vector<1x512xf32> to vector<1x32xf32>
    %140 = vector.extract_strided_slice %126 {offsets = [0, 416], sizes = [1, 32], strides = [1, 1]} : vector<1x512xf32> to vector<1x32xf32>
    %141 = vector.extract_strided_slice %126 {offsets = [0, 448], sizes = [1, 32], strides = [1, 1]} : vector<1x512xf32> to vector<1x32xf32>
    %142 = vector.extract_strided_slice %126 {offsets = [0, 480], sizes = [1, 32], strides = [1, 1]} : vector<1x512xf32> to vector<1x32xf32>
    %cst_51 = arith.constant 0.000000e+00 : f32
    %143 = vector.broadcast %cst_51 : f32 to vector<1x32xf32>
    %144 = arith.addf %143, %127 : vector<1x32xf32>
    %145 = arith.addf %144, %128 : vector<1x32xf32>
    %146 = arith.addf %145, %129 : vector<1x32xf32>
    %147 = arith.addf %146, %130 : vector<1x32xf32>
    %148 = arith.addf %147, %131 : vector<1x32xf32>
    %149 = arith.addf %148, %132 : vector<1x32xf32>
    %150 = arith.addf %149, %133 : vector<1x32xf32>
    %151 = arith.addf %150, %134 : vector<1x32xf32>
    %152 = arith.addf %151, %135 : vector<1x32xf32>
    %153 = arith.addf %152, %136 : vector<1x32xf32>
    %154 = arith.addf %153, %137 : vector<1x32xf32>
    %155 = arith.addf %154, %138 : vector<1x32xf32>
    %156 = arith.addf %155, %139 : vector<1x32xf32>
    %157 = arith.addf %156, %140 : vector<1x32xf32>
    %158 = arith.addf %157, %141 : vector<1x32xf32>
    %159 = arith.addf %158, %142 : vector<1x32xf32>
    %cst_52 = arith.constant 3.200000e+01 : f32
    %160 = vector.broadcast %cst_52 : f32 to vector<1x32xf32>
    %161 = arith.divf %159, %160 : vector<1x32xf32>
    %162 = tpu.concatenate %161, %161, %161, %161, %161, %161, %161, %161, %161, %161, %161, %161, %161, %161, %161, %161 in 1 : vector<1x32xf32>, vector<1x32xf32>, vector<1x32xf32>, vector<1x32xf32>, vector<1x32xf32>, vector<1x32xf32>, vector<1x32xf32>, vector<1x32xf32>, vector<1x32xf32>, vector<1x32xf32>, vector<1x32xf32>, vector<1x32xf32>, vector<1x32xf32>, vector<1x32xf32>, vector<1x32xf32>, vector<1x32xf32> -> vector<1x512xf32>
    %163 = vector.broadcast %162 : vector<1x512xf32> to vector<2x512xf32>
    %164 = arith.subf %122, %163 : vector<2x512xf32>
    %165 = arith.mulf %164, %164 : vector<2x512xf32>
    %cst_53 = arith.constant dense<0.000000e+00> : vector<512xf32>
    %166 = vector.multi_reduction <add>, %165, %cst_53 [0] : vector<2x512xf32> to vector<512xf32>
    %167 = vector.shape_cast %166 : vector<512xf32> to vector<1x512xf32>
    %168 = vector.extract_strided_slice %167 {offsets = [0, 0], sizes = [1, 32], strides = [1, 1]} : vector<1x512xf32> to vector<1x32xf32>
    %169 = vector.extract_strided_slice %167 {offsets = [0, 32], sizes = [1, 32], strides = [1, 1]} : vector<1x512xf32> to vector<1x32xf32>
    %170 = vector.extract_strided_slice %167 {offsets = [0, 64], sizes = [1, 32], strides = [1, 1]} : vector<1x512xf32> to vector<1x32xf32>
    %171 = vector.extract_strided_slice %167 {offsets = [0, 96], sizes = [1, 32], strides = [1, 1]} : vector<1x512xf32> to vector<1x32xf32>
    %172 = vector.extract_strided_slice %167 {offsets = [0, 128], sizes = [1, 32], strides = [1, 1]} : vector<1x512xf32> to vector<1x32xf32>
    %173 = vector.extract_strided_slice %167 {offsets = [0, 160], sizes = [1, 32], strides = [1, 1]} : vector<1x512xf32> to vector<1x32xf32>
    %174 = vector.extract_strided_slice %167 {offsets = [0, 192], sizes = [1, 32], strides = [1, 1]} : vector<1x512xf32> to vector<1x32xf32>
    %175 = vector.extract_strided_slice %167 {offsets = [0, 224], sizes = [1, 32], strides = [1, 1]} : vector<1x512xf32> to vector<1x32xf32>
    %176 = vector.extract_strided_slice %167 {offsets = [0, 256], sizes = [1, 32], strides = [1, 1]} : vector<1x512xf32> to vector<1x32xf32>
    %177 = vector.extract_strided_slice %167 {offsets = [0, 288], sizes = [1, 32], strides = [1, 1]} : vector<1x512xf32> to vector<1x32xf32>
    %178 = vector.extract_strided_slice %167 {offsets = [0, 320], sizes = [1, 32], strides = [1, 1]} : vector<1x512xf32> to vector<1x32xf32>
    %179 = vector.extract_strided_slice %167 {offsets = [0, 352], sizes = [1, 32], strides = [1, 1]} : vector<1x512xf32> to vector<1x32xf32>
    %180 = vector.extract_strided_slice %167 {offsets = [0, 384], sizes = [1, 32], strides = [1, 1]} : vector<1x512xf32> to vector<1x32xf32>
    %181 = vector.extract_strided_slice %167 {offsets = [0, 416], sizes = [1, 32], strides = [1, 1]} : vector<1x512xf32> to vector<1x32xf32>
    %182 = vector.extract_strided_slice %167 {offsets = [0, 448], sizes = [1, 32], strides = [1, 1]} : vector<1x512xf32> to vector<1x32xf32>
    %183 = vector.extract_strided_slice %167 {offsets = [0, 480], sizes = [1, 32], strides = [1, 1]} : vector<1x512xf32> to vector<1x32xf32>
    %cst_54 = arith.constant 0.000000e+00 : f32
    %184 = vector.broadcast %cst_54 : f32 to vector<1x32xf32>
    %185 = arith.addf %184, %168 : vector<1x32xf32>
    %186 = arith.addf %185, %169 : vector<1x32xf32>
    %187 = arith.addf %186, %170 : vector<1x32xf32>
    %188 = arith.addf %187, %171 : vector<1x32xf32>
    %189 = arith.addf %188, %172 : vector<1x32xf32>
    %190 = arith.addf %189, %173 : vector<1x32xf32>
    %191 = arith.addf %190, %174 : vector<1x32xf32>
    %192 = arith.addf %191, %175 : vector<1x32xf32>
    %193 = arith.addf %192, %176 : vector<1x32xf32>
    %194 = arith.addf %193, %177 : vector<1x32xf32>
    %195 = arith.addf %194, %178 : vector<1x32xf32>
    %196 = arith.addf %195, %179 : vector<1x32xf32>
    %197 = arith.addf %196, %180 : vector<1x32xf32>
    %198 = arith.addf %197, %181 : vector<1x32xf32>
    %199 = arith.addf %198, %182 : vector<1x32xf32>
    %200 = arith.addf %199, %183 : vector<1x32xf32>
    %cst_55 = arith.constant 3.200000e+01 : f32
    %201 = vector.broadcast %cst_55 : f32 to vector<1x32xf32>
    %202 = arith.divf %200, %201 : vector<1x32xf32>
    %cst_56 = arith.constant 9.99999974E-6 : f32
    %203 = vector.broadcast %cst_56 : f32 to vector<1x32xf32>
    %204 = arith.addf %202, %203 : vector<1x32xf32>
    %205 = math.rsqrt %204 : vector<1x32xf32>
    %206 = arith.mulf %123, %205 : vector<1x32xf32>
    %207 = arith.mulf %161, %206 : vector<1x32xf32>
    %208 = arith.subf %124, %207 : vector<1x32xf32>
    %209 = tpu.concatenate %206, %206, %206, %206, %206, %206, %206, %206, %206, %206, %206, %206, %206, %206, %206, %206 in 1 : vector<1x32xf32>, vector<1x32xf32>, vector<1x32xf32>, vector<1x32xf32>, vector<1x32xf32>, vector<1x32xf32>, vector<1x32xf32>, vector<1x32xf32>, vector<1x32xf32>, vector<1x32xf32>, vector<1x32xf32>, vector<1x32xf32>, vector<1x32xf32>, vector<1x32xf32>, vector<1x32xf32>, vector<1x32xf32> -> vector<1x512xf32>
    %210 = tpu.concatenate %208, %208, %208, %208, %208, %208, %208, %208, %208, %208, %208, %208, %208, %208, %208, %208 in 1 : vector<1x32xf32>, vector<1x32xf32>, vector<1x32xf32>, vector<1x32xf32>, vector<1x32xf32>, vector<1x32xf32>, vector<1x32xf32>, vector<1x32xf32>, vector<1x32xf32>, vector<1x32xf32>, vector<1x32xf32>, vector<1x32xf32>, vector<1x32xf32>, vector<1x32xf32>, vector<1x32xf32>, vector<1x32xf32> -> vector<1x512xf32>
    %211 = vector.broadcast %209 : vector<1x512xf32> to vector<2x512xf32>
    %212 = arith.mulf %122, %211 : vector<2x512xf32>
    %213 = vector.broadcast %210 : vector<1x512xf32> to vector<2x512xf32>
    %214 = arith.addf %212, %213 : vector<2x512xf32>
    %215 = arith.truncf %214 : vector<2x512xf32> to vector<2x512xbf16>
    %c0_57 = arith.constant 0 : index
    %c0_58 = arith.constant 0 : index
    %216 = vector.load %arg13[%c0_57, %c0_58] : memref<2x512xbf16, #tpu.memory_space<vmem>>, vector<2x512xbf16>
    tpu.vector_store %arg13[%c0_57, %c0_58], %215 {strides = array<i32>} : memref<2x512xbf16, #tpu.memory_space<vmem>>, vector<2x512xbf16>,
    return
  }
}

module attributes {stable_mosaic.version = 11 : i64} {
  func.func @_gemm_kernel(%arg0: memref<32x576xbf16, #tpu.memory_space<vmem>>, %arg1: memref<576x64xbf16, #tpu.memory_space<vmem>>, %arg2: memref<1x16xf32, #tpu.memory_space<vmem>>, %arg3: memref<1x16xf32, #tpu.memory_space<vmem>>, %arg4: memref<32x64xbf16, #tpu.memory_space<vmem>>) attributes {dimension_semantics = [], scalar_prefetch = 0 : i64, scratch_operands = 0 : i64, tpu.core_type = #tpu.core_type<tc>} {
    %c0 = arith.constant 0 : index
    %c0_0 = arith.constant 0 : index
    %0 = vector.load %arg0[%c0, %c0_0] : memref<32x576xbf16, #tpu.memory_space<vmem>>, vector<32x576xbf16>
    %c0_1 = arith.constant 0 : index
    %c0_2 = arith.constant 0 : index
    %1 = vector.load %arg1[%c0_1, %c0_2] : memref<576x64xbf16, #tpu.memory_space<vmem>>, vector<576x64xbf16>
    %cst = arith.constant dense<0.000000e+00> : vector<32x64xf32>
    %2 = tpu.matmul %0, %1, %cst {dimension_numbers = #tpu.dot_dimension_numbers<[1], [0], [0], [1], [0, 0, 1, 1], [], []>} : vector<32x576xbf16>, vector<576x64xbf16>, vector<32x64xf32> -> vector<32x64xf32>
    %c0_3 = arith.constant 0 : index
    %c0_4 = arith.constant 0 : index
    %3 = vector.load %arg2[%c0_3, %c0_4] : memref<1x16xf32, #tpu.memory_space<vmem>>, vector<1x16xf32>
    %c0_5 = arith.constant 0 : index
    %c0_6 = arith.constant 0 : index
    %4 = vector.load %arg3[%c0_5, %c0_6] : memref<1x16xf32, #tpu.memory_space<vmem>>, vector<1x16xf32>
    %cst_7 = arith.constant dense<0.000000e+00> : vector<64xf32>
    %5 = vector.multi_reduction <add>, %2, %cst_7 [0] : vector<32x64xf32> to vector<64xf32>
    %6 = vector.shape_cast %5 : vector<64xf32> to vector<1x64xf32>
    %7 = vector.extract_strided_slice %6 {offsets = [0, 0], sizes = [1, 16], strides = [1, 1]} : vector<1x64xf32> to vector<1x16xf32>
    %8 = vector.extract_strided_slice %6 {offsets = [0, 16], sizes = [1, 16], strides = [1, 1]} : vector<1x64xf32> to vector<1x16xf32>
    %9 = vector.extract_strided_slice %6 {offsets = [0, 32], sizes = [1, 16], strides = [1, 1]} : vector<1x64xf32> to vector<1x16xf32>
    %10 = vector.extract_strided_slice %6 {offsets = [0, 48], sizes = [1, 16], strides = [1, 1]} : vector<1x64xf32> to vector<1x16xf32>
    %cst_8 = arith.constant 0.000000e+00 : f32
    %11 = vector.broadcast %cst_8 : f32 to vector<1x16xf32>
    %12 = arith.addf %11, %7 : vector<1x16xf32>
    %13 = arith.addf %12, %8 : vector<1x16xf32>
    %14 = arith.addf %13, %9 : vector<1x16xf32>
    %15 = arith.addf %14, %10 : vector<1x16xf32>
    %cst_9 = arith.constant 1.280000e+02 : f32
    %16 = vector.broadcast %cst_9 : f32 to vector<1x16xf32>
    %17 = arith.divf %15, %16 : vector<1x16xf32>
    %18 = tpu.concatenate %17, %17, %17, %17 in 1 : vector<1x16xf32>, vector<1x16xf32>, vector<1x16xf32>, vector<1x16xf32> -> vector<1x64xf32>
    %19 = vector.broadcast %18 : vector<1x64xf32> to vector<32x64xf32>
    %20 = arith.subf %2, %19 : vector<32x64xf32>
    %21 = arith.mulf %20, %20 : vector<32x64xf32>
    %cst_10 = arith.constant dense<0.000000e+00> : vector<64xf32>
    %22 = vector.multi_reduction <add>, %21, %cst_10 [0] : vector<32x64xf32> to vector<64xf32>
    %23 = vector.shape_cast %22 : vector<64xf32> to vector<1x64xf32>
    %24 = vector.extract_strided_slice %23 {offsets = [0, 0], sizes = [1, 16], strides = [1, 1]} : vector<1x64xf32> to vector<1x16xf32>
    %25 = vector.extract_strided_slice %23 {offsets = [0, 16], sizes = [1, 16], strides = [1, 1]} : vector<1x64xf32> to vector<1x16xf32>
    %26 = vector.extract_strided_slice %23 {offsets = [0, 32], sizes = [1, 16], strides = [1, 1]} : vector<1x64xf32> to vector<1x16xf32>
    %27 = vector.extract_strided_slice %23 {offsets = [0, 48], sizes = [1, 16], strides = [1, 1]} : vector<1x64xf32> to vector<1x16xf32>
    %cst_11 = arith.constant 0.000000e+00 : f32
    %28 = vector.broadcast %cst_11 : f32 to vector<1x16xf32>
    %29 = arith.addf %28, %24 : vector<1x16xf32>
    %30 = arith.addf %29, %25 : vector<1x16xf32>
    %31 = arith.addf %30, %26 : vector<1x16xf32>
    %32 = arith.addf %31, %27 : vector<1x16xf32>
    %cst_12 = arith.constant 1.280000e+02 : f32
    %33 = vector.broadcast %cst_12 : f32 to vector<1x16xf32>
    %34 = arith.divf %32, %33 : vector<1x16xf32>
    %cst_13 = arith.constant 9.99999974E-6 : f32
    %35 = vector.broadcast %cst_13 : f32 to vector<1x16xf32>
    %36 = arith.addf %34, %35 : vector<1x16xf32>
    %37 = math.rsqrt %36 : vector<1x16xf32>
    %38 = arith.mulf %3, %37 : vector<1x16xf32>
    %39 = arith.mulf %17, %38 : vector<1x16xf32>
    %40 = arith.subf %4, %39 : vector<1x16xf32>
    %41 = tpu.concatenate %38, %38, %38, %38 in 1 : vector<1x16xf32>, vector<1x16xf32>, vector<1x16xf32>, vector<1x16xf32> -> vector<1x64xf32>
    %42 = tpu.concatenate %40, %40, %40, %40 in 1 : vector<1x16xf32>, vector<1x16xf32>, vector<1x16xf32>, vector<1x16xf32> -> vector<1x64xf32>
    %43 = vector.broadcast %41 : vector<1x64xf32> to vector<32x64xf32>
    %44 = arith.mulf %2, %43 : vector<32x64xf32>
    %45 = vector.broadcast %42 : vector<1x64xf32> to vector<32x64xf32>
    %46 = arith.addf %44, %45 : vector<32x64xf32>
    %47 = arith.truncf %46 : vector<32x64xf32> to vector<32x64xbf16>
    %c0_14 = arith.constant 0 : index
    %c0_15 = arith.constant 0 : index
    %48 = vector.load %arg4[%c0_14, %c0_15] : memref<32x64xbf16, #tpu.memory_space<vmem>>, vector<32x64xbf16>
    tpu.vector_store %arg4[%c0_14, %c0_15], %47 {strides = array<i32>} : memref<32x64xbf16, #tpu.memory_space<vmem>>, vector<32x64xbf16>,
    return
  }
}

module attributes {stable_mosaic.version = 11 : i64} {
  func.func @_gemm_kernel(%arg0: memref<128x288xbf16, #tpu.memory_space<vmem>>, %arg1: memref<288x32xbf16, #tpu.memory_space<vmem>>, %arg2: memref<1x8xf32, #tpu.memory_space<vmem>>, %arg3: memref<1x8xf32, #tpu.memory_space<vmem>>, %arg4: memref<128x32xbf16, #tpu.memory_space<vmem>>) attributes {dimension_semantics = [], scalar_prefetch = 0 : i64, scratch_operands = 0 : i64, tpu.core_type = #tpu.core_type<tc>} {
    %c0 = arith.constant 0 : index
    %c0_0 = arith.constant 0 : index
    %0 = vector.load %arg0[%c0, %c0_0] : memref<128x288xbf16, #tpu.memory_space<vmem>>, vector<128x288xbf16>
    %c0_1 = arith.constant 0 : index
    %c0_2 = arith.constant 0 : index
    %1 = vector.load %arg1[%c0_1, %c0_2] : memref<288x32xbf16, #tpu.memory_space<vmem>>, vector<288x32xbf16>
    %cst = arith.constant dense<0.000000e+00> : vector<128x32xf32>
    %2 = tpu.matmul %0, %1, %cst {dimension_numbers = #tpu.dot_dimension_numbers<[1], [0], [0], [1], [0, 0, 1, 1], [], []>} : vector<128x288xbf16>, vector<288x32xbf16>, vector<128x32xf32> -> vector<128x32xf32>
    %c0_3 = arith.constant 0 : index
    %c0_4 = arith.constant 0 : index
    %3 = vector.load %arg2[%c0_3, %c0_4] : memref<1x8xf32, #tpu.memory_space<vmem>>, vector<1x8xf32>
    %c0_5 = arith.constant 0 : index
    %c0_6 = arith.constant 0 : index
    %4 = vector.load %arg3[%c0_5, %c0_6] : memref<1x8xf32, #tpu.memory_space<vmem>>, vector<1x8xf32>
    %cst_7 = arith.constant dense<0.000000e+00> : vector<32xf32>
    %5 = vector.multi_reduction <add>, %2, %cst_7 [0] : vector<128x32xf32> to vector<32xf32>
    %6 = vector.shape_cast %5 : vector<32xf32> to vector<1x32xf32>
    %7 = vector.extract_strided_slice %6 {offsets = [0, 0], sizes = [1, 8], strides = [1, 1]} : vector<1x32xf32> to vector<1x8xf32>
    %8 = vector.extract_strided_slice %6 {offsets = [0, 8], sizes = [1, 8], strides = [1, 1]} : vector<1x32xf32> to vector<1x8xf32>
    %9 = vector.extract_strided_slice %6 {offsets = [0, 16], sizes = [1, 8], strides = [1, 1]} : vector<1x32xf32> to vector<1x8xf32>
    %10 = vector.extract_strided_slice %6 {offsets = [0, 24], sizes = [1, 8], strides = [1, 1]} : vector<1x32xf32> to vector<1x8xf32>
    %cst_8 = arith.constant 0.000000e+00 : f32
    %11 = vector.broadcast %cst_8 : f32 to vector<1x8xf32>
    %12 = arith.addf %11, %7 : vector<1x8xf32>
    %13 = arith.addf %12, %8 : vector<1x8xf32>
    %14 = arith.addf %13, %9 : vector<1x8xf32>
    %15 = arith.addf %14, %10 : vector<1x8xf32>
    %cst_9 = arith.constant 5.120000e+02 : f32
    %16 = vector.broadcast %cst_9 : f32 to vector<1x8xf32>
    %17 = arith.divf %15, %16 : vector<1x8xf32>
    %18 = tpu.concatenate %17, %17, %17, %17 in 1 : vector<1x8xf32>, vector<1x8xf32>, vector<1x8xf32>, vector<1x8xf32> -> vector<1x32xf32>
    %19 = vector.broadcast %18 : vector<1x32xf32> to vector<128x32xf32>
    %20 = arith.subf %2, %19 : vector<128x32xf32>
    %21 = arith.mulf %20, %20 : vector<128x32xf32>
    %cst_10 = arith.constant dense<0.000000e+00> : vector<32xf32>
    %22 = vector.multi_reduction <add>, %21, %cst_10 [0] : vector<128x32xf32> to vector<32xf32>
    %23 = vector.shape_cast %22 : vector<32xf32> to vector<1x32xf32>
    %24 = vector.extract_strided_slice %23 {offsets = [0, 0], sizes = [1, 8], strides = [1, 1]} : vector<1x32xf32> to vector<1x8xf32>
    %25 = vector.extract_strided_slice %23 {offsets = [0, 8], sizes = [1, 8], strides = [1, 1]} : vector<1x32xf32> to vector<1x8xf32>
    %26 = vector.extract_strided_slice %23 {offsets = [0, 16], sizes = [1, 8], strides = [1, 1]} : vector<1x32xf32> to vector<1x8xf32>
    %27 = vector.extract_strided_slice %23 {offsets = [0, 24], sizes = [1, 8], strides = [1, 1]} : vector<1x32xf32> to vector<1x8xf32>
    %cst_11 = arith.constant 0.000000e+00 : f32
    %28 = vector.broadcast %cst_11 : f32 to vector<1x8xf32>
    %29 = arith.addf %28, %24 : vector<1x8xf32>
    %30 = arith.addf %29, %25 : vector<1x8xf32>
    %31 = arith.addf %30, %26 : vector<1x8xf32>
    %32 = arith.addf %31, %27 : vector<1x8xf32>
    %cst_12 = arith.constant 5.120000e+02 : f32
    %33 = vector.broadcast %cst_12 : f32 to vector<1x8xf32>
    %34 = arith.divf %32, %33 : vector<1x8xf32>
    %cst_13 = arith.constant 9.99999974E-6 : f32
    %35 = vector.broadcast %cst_13 : f32 to vector<1x8xf32>
    %36 = arith.addf %34, %35 : vector<1x8xf32>
    %37 = math.rsqrt %36 : vector<1x8xf32>
    %38 = arith.mulf %3, %37 : vector<1x8xf32>
    %39 = arith.mulf %17, %38 : vector<1x8xf32>
    %40 = arith.subf %4, %39 : vector<1x8xf32>
    %41 = tpu.concatenate %38, %38, %38, %38 in 1 : vector<1x8xf32>, vector<1x8xf32>, vector<1x8xf32>, vector<1x8xf32> -> vector<1x32xf32>
    %42 = tpu.concatenate %40, %40, %40, %40 in 1 : vector<1x8xf32>, vector<1x8xf32>, vector<1x8xf32>, vector<1x8xf32> -> vector<1x32xf32>
    %43 = vector.broadcast %41 : vector<1x32xf32> to vector<128x32xf32>
    %44 = arith.mulf %2, %43 : vector<128x32xf32>
    %45 = vector.broadcast %42 : vector<1x32xf32> to vector<128x32xf32>
    %46 = arith.addf %44, %45 : vector<128x32xf32>
    %47 = arith.truncf %46 : vector<128x32xf32> to vector<128x32xbf16>
    %c0_14 = arith.constant 0 : index
    %c0_15 = arith.constant 0 : index
    %48 = vector.load %arg4[%c0_14, %c0_15] : memref<128x32xbf16, #tpu.memory_space<vmem>>, vector<128x32xbf16>
    tpu.vector_store %arg4[%c0_14, %c0_15], %47 {strides = array<i32>} : memref<128x32xbf16, #tpu.memory_space<vmem>>, vector<128x32xbf16>,
    return
  }
}

module attributes {stable_mosaic.version = 11 : i64} {
  func.func @_gemm_kernel(%arg0: i32, %arg1: memref<256x144xbf16, #tpu.memory_space<vmem>>, %arg2: memref<144x12xbf16, #tpu.memory_space<vmem>>, %arg3: memref<1x12xf32, #tpu.memory_space<vmem>>, %arg4: memref<256x12xf32, #tpu.memory_space<vmem>>) attributes {dimension_semantics = [#tpu.dimension_semantics<parallel>], iteration_bounds = array<i64: 2>, scalar_prefetch = 0 : i64, scratch_operands = 0 : i64, tpu.core_type = #tpu.core_type<tc>, window_params = [{transform_indices = @transform_0, window_bounds = array<i64: 256, 144>}, {pipeline_mode = #tpu.pipeline_mode<synchronous>, transform_indices = @transform_1, window_bounds = array<i64: 144, 12>}, {pipeline_mode = #tpu.pipeline_mode<synchronous>, transform_indices = @transform_2, window_bounds = array<i64: 1, 12>}, {transform_indices = @transform_3, window_bounds = array<i64: 256, 12>}]} {
    %c0 = arith.constant 0 : index
    %c0_0 = arith.constant 0 : index
    %0 = vector.load %arg1[%c0, %c0_0] : memref<256x144xbf16, #tpu.memory_space<vmem>>, vector<256x144xbf16>
    %c0_1 = arith.constant 0 : index
    %c0_2 = arith.constant 0 : index
    %1 = vector.load %arg2[%c0_1, %c0_2] : memref<144x12xbf16, #tpu.memory_space<vmem>>, vector<144x12xbf16>
    %cst = arith.constant dense<0.000000e+00> : vector<256x12xf32>
    %2 = tpu.matmul %0, %1, %cst {dimension_numbers = #tpu.dot_dimension_numbers<[1], [0], [0], [1], [0, 0, 1, 1], [], []>} : vector<256x144xbf16>, vector<144x12xbf16>, vector<256x12xf32> -> vector<256x12xf32>
    %c0_3 = arith.constant 0 : index
    %c0_4 = arith.constant 0 : index
    %3 = vector.load %arg3[%c0_3, %c0_4] : memref<1x12xf32, #tpu.memory_space<vmem>>, vector<1x12xf32>
    %4 = vector.broadcast %3 : vector<1x12xf32> to vector<256x12xf32>
    %5 = arith.addf %2, %4 : vector<256x12xf32>
    %6 = arith.negf %5 : vector<256x12xf32>
    %7 = math.exp %6 : vector<256x12xf32>
    %cst_5 = arith.constant 1.000000e+00 : f32
    %8 = vector.broadcast %cst_5 : f32 to vector<256x12xf32>
    %9 = arith.addf %8, %7 : vector<256x12xf32>
    %10 = arith.divf %8, %9 : vector<256x12xf32>
    %c0_6 = arith.constant 0 : index
    %c0_7 = arith.constant 0 : index
    %11 = vector.load %arg4[%c0_6, %c0_7] : memref<256x12xf32, #tpu.memory_space<vmem>>, vector<256x12xf32>
    tpu.vector_store %arg4[%c0_6, %c0_7], %10 {strides = array<i32>} : memref<256x12xf32, #tpu.memory_space<vmem>>, vector<256x12xf32>,
    return
  }
  func.func @transform_0(%arg0: i32) -> (i32, i32) {
    %c0_i32 = arith.constant 0 : i32
    %c0_i32_0 = arith.constant 0 : i32
    return %arg0, %c0_i32 : i32, i32
  }
  func.func @transform_1(%arg0: i32) -> (i32, i32) {
    %c0_i32 = arith.constant 0 : i32
    %c0_i32_0 = arith.constant 0 : i32
    %c0_i32_1 = arith.constant 0 : i32
    return %c0_i32, %c0_i32_0 : i32, i32
  }
  func.func @transform_2(%arg0: i32) -> (i32, i32) {
    %c0_i32 = arith.constant 0 : i32
    %c0_i32_0 = arith.constant 0 : i32
    %c0_i32_1 = arith.constant 0 : i32
    return %c0_i32, %c0_i32_0 : i32, i32
  }
  func.func @transform_3(%arg0: i32) -> (i32, i32) {
    %c0_i32 = arith.constant 0 : i32
    %c0_i32_0 = arith.constant 0 : i32
    return %arg0, %c0_i32 : i32, i32
  }
}

</mosaic_0001>

<bundles_post_ra>
// kernel: _lambda_.7
= control target key start
LH: loop header
LB: loop body
LE: loop exit
PB: predicated region body
PF: predicated region fallthrough
CT: control target
= control target key end

     0   :  { %s742_s12 = smov 0   ;;  %s912_s0 = inlined_call_operand.vmem [shape: bf16[512,48], index: 0, kind: input, shape index: {}]   ;;  %s913_s1 = inlined_call_operand.vmem [shape: bf16[48,8], index: 1, kind: input, shape index: {}]   ;;  %s914_s2 = inlined_call_operand.vmem [shape: f32[1,8], index: 2, kind: input, shape index: {}]   ;;  %s915_s3 = inlined_call_operand.vmem [shape: bf16[512,8], index: 3, kind: output, shape index: {}]  }
   0x1 LB: > { %s574_s13 = sadd.s32 4294967295, %s720_s12   ;;  %p578_p0 = scmp.ge.s32.totalorder %s720_s12, 1  ;;  %s720_s12 = sphi %s742_s12, %s13_s12  }
   0x2   : > { %p138_p1 = scmp.lt.s32.totalorder %s720_s12, 3 }
   0x4   : > { %p139_p2 = pnand %p578_p0, %p138_p1 }
   0x5   : > { %s579_s16 = sshll.u32 (!%p139_p2), %s574_s13, 5 }
   0x6   : > { %142 = sbr.rel (%p139_p2) target bundleno = 218 (0xda), region = 32  ;;  %p163_p3 = scmp.lt.s32.totalorder (!%p139_p2), %s579_s16, 63 }
   0xb   : > { %v695_v0 = vld [vmem:[%s913_s1 + $0x10] sm:$0xff]  ;;  %v694_v1 = vld [vmem:[%s913_s1 + $0x8] sm:$0xff]  ;;  %s917_s16 = smov (!%p163_p3, %s579_s16), 63  ;;  %v693_v2 = vld [vmem:[%s913_s1] sm:$0xff]  ;;  %vm315_vm0 = vcmask 392192   ;;  %vm485_vm1 = vcmask 60416  }
   0xc   : > { %369 = vmatpush.bf16.msra.mxu0 %v695_v0  ;;  %696 = vmatpush.bf16.msra.mxu1 %v695_v0  ;;  %s580_s19 = sshll.u32 %s917_s16, 2  ;;  %v804_v19 = vld [vmem:[%s914_s2] ss:$0 sm:$0xff] }
   0xd   : > { %697 = vmatpush.bf16.msra.mxu2 %v695_v0  ;;  %698 = vmatpush.bf16.msra.mxu3 %v695_v0  ;;  %s767_s24 = scalar_lea.vmem %s912_s0, %s580_s19  ;;  %s813_s29 = scalar_lea.vmem %s915_s3, %s580_s19 }
   0xe   : > { %v677_v3 = vld [vmem:[%s767_s24] sm:$0xff]  ;;  %v678_v7 = vld [vmem:[%s767_s24 + $0x8] sm:$0xff]  ;;  %v679_v11 = vld [vmem:[%s767_s24 + $0x10] sm:$0xff] }
   0xf   : > { %v681_v4 = vld [vmem:[%s767_s24 + $0x20] sm:$0xff]  ;;  %v682_v8 = vld [vmem:[%s767_s24 + $0x28] sm:$0xff]  ;;  %v683_v12 = vld [vmem:[%s767_s24 + $0x30] sm:$0xff] }
  0x10   : > { %370 = vmatpush.bf16.msra.mxu0 %v694_v1  ;;  %699 = vmatpush.bf16.msra.mxu1 %v694_v1  ;;  %v685_v5 = vld [vmem:[%s767_s24 + $0x40] sm:$0xff]  ;;  %v686_v9 = vld [vmem:[%s767_s24 + $0x48] sm:$0xff]  ;;  %v687_v13 = vld [vmem:[%s767_s24 + $0x50] sm:$0xff] }
  0x11   : > { %700 = vmatpush.bf16.msra.mxu2 %v694_v1  ;;  %701 = vmatpush.bf16.msra.mxu3 %v694_v1  ;;  %v689_v6 = vld [vmem:[%s767_s24 + $0x60] sm:$0xff]  ;;  %v690_v10 = vld [vmem:[%s767_s24 + $0x68] sm:$0xff]  ;;  %v691_v14 = vld [vmem:[%s767_s24 + $0x70] sm:$0xff] }
  0x12   : > { %v680_v15 = vld [vmem:[%s767_s24 + $0x18] sm:$0xff] }
  0x13   : > { %v684_v16 = vld [vmem:[%s767_s24 + $0x38] sm:$0xff] }
  0x14   : > { %371 = vmatpush.bf16.msra.mxu0 %v693_v2  ;;  %702 = vmatpush.bf16.msra.mxu1 %v693_v2  ;;  %v688_v17 = vld [vmem:[%s767_s24 + $0x58] sm:$0xff] }
  0x15   : > { %703 = vmatpush.bf16.msra.mxu2 %v693_v2  ;;  %704 = vmatpush.bf16.msra.mxu3 %v693_v2  ;;  %v692_v18 = vld [vmem:[%s767_s24 + $0x78] sm:$0xff] }
  0x17   : > { %659 = vmatmul.msk.bf16.vlgmr.msra.gmra.mxu0 %vm315_vm0, %v677_v3  ;;  %663 = vmatmul.msk.bf16.vlgmr.msra.gmra.mxu1 %vm315_vm0, %v681_v4 }
  0x18   : > { %667 = vmatmul.msk.bf16.vlgmr.msra.gmra.mxu2 %vm315_vm0, %v685_v5  ;;  %671 = vmatmul.msk.bf16.vlgmr.msra.gmra.mxu3 %vm315_vm0, %v689_v6 }
  0x27   : > { %660 = vmatmul.msk.bf16.gmra.mxu0 %vm315_vm0, %v678_v7  ;;  %664 = vmatmul.msk.bf16.gmra.mxu1 %vm315_vm0, %v682_v8 }
  0x28   : > { %668 = vmatmul.msk.bf16.gmra.mxu2 %vm315_vm0, %v686_v9  ;;  %672 = vmatmul.msk.bf16.gmra.mxu3 %vm315_vm0, %v690_v10 }
  0x37   : > { %661 = vmatmul.msk.bf16.gmra.mxu0 %vm315_vm0, %v679_v11  ;;  %665 = vmatmul.msk.bf16.gmra.mxu1 %vm315_vm0, %v683_v12 }
  0x38   : > { %669 = vmatmul.msk.bf16.gmra.mxu2 %vm315_vm0, %v687_v13  ;;  %673 = vmatmul.msk.bf16.gmra.mxu3 %vm315_vm0, %v691_v14 }
  0x47   : > { %662 = vmatmul.msk.bf16.gmra.mxu0 %vm315_vm0, %v680_v15  ;;  %666 = vmatmul.msk.bf16.gmra.mxu1 %vm315_vm0, %v684_v16 }
  0x48   : > { %670 = vmatmul.msk.bf16.gmra.mxu2 %vm315_vm0, %v688_v17  ;;  %674 = vmatmul.msk.bf16.gmra.mxu3 %vm315_vm0, %v692_v18 }
  0x94   : > { %v373_v20 = vpop.f32.mrf.mxu0  ;;  %v393_v21 = vpop.f32.mrf.mxu1 }
  0x95   : > { %v374_v22 = vadd.f32 %v804_v19, %v373_v20  ;;  %v394_v23 = vadd.f32 %v804_v19, %v393_v21 }
  0x97   : > { %v453_v24 = vpack.c.bf16 %v374_v22, %v374_v22  ;;  %v461_v25 = vpack.c.bf16 %v394_v23, %v394_v23 }
  0x99   : > { %486 = vst.msk [vmem:[%s813_s29] sm:$0xf] %vm485_vm1, %v453_v24 }
  0x9a   : > { %494 = vst.msk [vmem:[%s813_s29 + $0x20] sm:$0xf] %vm485_vm1, %v461_v25 }
  0x9b   : > { %v413_v26 = vpop.f32.mrf.mxu2  ;;  %v433_v27 = vpop.f32.mrf.mxu3 }
  0x9c   : > { %v414_v28 = vadd.f32 %v804_v19, %v413_v26  ;;  %v434_v29 = vadd.f32 %v804_v19, %v433_v27  ;;  %v375_v30 = vpop.f32.mrf.mxu0  ;;  %v395_v31 = vpop.f32.mrf.mxu1 }
  0x9d   : > { %v376_v32 = vadd.f32 %v804_v19, %v375_v30  ;;  %v396_v33 = vadd.f32 %v804_v19, %v395_v31 }
  0x9e   : > { %v469_v34 = vpack.c.bf16 %v414_v28, %v414_v28  ;;  %v477_v35 = vpack.c.bf16 %v434_v29, %v434_v29 }
  0x9f   : > { %v454_v36 = vpack.c.bf16 %v376_v32, %v376_v32  ;;  %v462_v37 = vpack.c.bf16 %v396_v33, %v396_v33 }
  0xa0   : > { %502 = vst.msk [vmem:[%s813_s29 + $0x40] sm:$0xf] %vm485_vm1, %v469_v34 }
  0xa1   : > { %510 = vst.msk [vmem:[%s813_s29 + $0x60] sm:$0xf] %vm485_vm1, %v477_v35 }
  0xa2   : > { %487 = vst.msk [vmem:[%s813_s29 + $0x4] sm:$0xf] %vm485_vm1, %v454_v36 }
  0xa3   : > { %495 = vst.msk [vmem:[%s813_s29 + $0x24] sm:$0xf] %vm485_vm1, %v462_v37  ;;  %v415_v38 = vpop.f32.mrf.mxu2  ;;  %v435_v39 = vpop.f32.mrf.mxu3 }
  0xa4   : > { %v416_v40 = vadd.f32 %v804_v19, %v415_v38  ;;  %v436_v41 = vadd.f32 %v804_v19, %v435_v39  ;;  %v378_v42 = vpop.f32.mrf.mxu0  ;;  %v398_v43 = vpop.f32.mrf.mxu1 }
  0xa5   : > { %v379_v44 = vadd.f32 %v804_v19, %v378_v42  ;;  %v399_v45 = vadd.f32 %v804_v19, %v398_v43 }
  0xa6   : > { %v470_v46 = vpack.c.bf16 %v416_v40, %v416_v40  ;;  %v478_v47 = vpack.c.bf16 %v436_v41, %v436_v41 }
  0xa7   : > { %v455_v48 = vpack.c.bf16 %v379_v44, %v379_v44  ;;  %v463_v49 = vpack.c.bf16 %v399_v45, %v399_v45 }
  0xa8   : > { %503 = vst.msk [vmem:[%s813_s29 + $0x44] sm:$0xf] %vm485_vm1, %v470_v46 }
  0xa9   : > { %511 = vst.msk [vmem:[%s813_s29 + $0x64] sm:$0xf] %vm485_vm1, %v478_v47 }
  0xaa   : > { %488 = vst.msk [vmem:[%s813_s29 + $0x8] sm:$0xf] %vm485_vm1, %v455_v48 }
  0xab   : > { %496 = vst.msk [vmem:[%s813_s29 + $0x28] sm:$0xf] %vm485_vm1, %v463_v49  ;;  %v418_v50 = vpop.f32.mrf.mxu2  ;;  %v438_v51 = vpop.f32.mrf.mxu3 }
  0xac   : > { %v419_v52 = vadd.f32 %v804_v19, %v418_v50  ;;  %v439_v53 = vadd.f32 %v804_v19, %v438_v51  ;;  %v380_v54 = vpop.f32.mrf.mxu0  ;;  %v400_v55 = vpop.f32.mrf.mxu1 }
  0xad   : > { %v381_v56 = vadd.f32 %v804_v19, %v380_v54  ;;  %v401_v57 = vadd.f32 %v804_v19, %v400_v55 }
  0xae   : > { %v471_v58 = vpack.c.bf16 %v419_v52, %v419_v52  ;;  %v479_v59 = vpack.c.bf16 %v439_v53, %v439_v53 }
  0xaf   : > { %v456_v60 = vpack.c.bf16 %v381_v56, %v381_v56  ;;  %v464_v61 = vpack.c.bf16 %v401_v57, %v401_v57 }
  0xb0   : > { %504 = vst.msk [vmem:[%s813_s29 + $0x48] sm:$0xf] %vm485_vm1, %v471_v58 }
  0xb1   : > { %512 = vst.msk [vmem:[%s813_s29 + $0x68] sm:$0xf] %vm485_vm1, %v479_v59 }
  0xb2   : > { %489 = vst.msk [vmem:[%s813_s29 + $0xc] sm:$0xf] %vm485_vm1, %v456_v60 }
  0xb3   : > { %497 = vst.msk [vmem:[%s813_s29 + $0x2c] sm:$0xf] %vm485_vm1, %v464_v61  ;;  %v420_v62 = vpop.f32.mrf.mxu2  ;;  %v440_v63 = vpop.f32.mrf.mxu3 }
  0xb4   : > { %v421_v0 = vadd.f32 %v804_v19, %v420_v62  ;;  %v441_v1 = vadd.f32 %v804_v19, %v440_v63  ;;  %v383_v2 = vpop.f32.mrf.mxu0  ;;  %v403_v3 = vpop.f32.mrf.mxu1 }
  0xb5   : > { %v384_v4 = vadd.f32 %v804_v19, %v383_v2  ;;  %v404_v5 = vadd.f32 %v804_v19, %v403_v3 }
  0xb6   : > { %v472_v6 = vpack.c.bf16 %v421_v0, %v421_v0  ;;  %v480_v7 = vpack.c.bf16 %v441_v1, %v441_v1 }
  0xb7   : > { %v457_v8 = vpack.c.bf16 %v384_v4, %v384_v4  ;;  %v465_v9 = vpack.c.bf16 %v404_v5, %v404_v5 }
  0xb8   : > { %505 = vst.msk [vmem:[%s813_s29 + $0x4c] sm:$0xf] %vm485_vm1, %v472_v6 }
  0xb9   : > { %513 = vst.msk [vmem:[%s813_s29 + $0x6c] sm:$0xf] %vm485_vm1, %v480_v7 }
  0xba   : > { %490 = vst.msk [vmem:[%s813_s29 + $0x10] sm:$0xf] %vm485_vm1, %v457_v8 }
  0xbb   : > { %498 = vst.msk [vmem:[%s813_s29 + $0x30] sm:$0xf] %vm485_vm1, %v465_v9  ;;  %v423_v10 = vpop.f32.mrf.mxu2  ;;  %v443_v11 = vpop.f32.mrf.mxu3 }
  0xbc   : > { %v424_v12 = vadd.f32 %v804_v19, %v423_v10  ;;  %v444_v13 = vadd.f32 %v804_v19, %v443_v11  ;;  %v385_v14 = vpop.f32.mrf.mxu0  ;;  %v405_v15 = vpop.f32.mrf.mxu1 }
  0xbd   : > { %v386_v16 = vadd.f32 %v804_v19, %v385_v14  ;;  %v406_v17 = vadd.f32 %v804_v19, %v405_v15 }
  0xbe   : > { %v473_v18 = vpack.c.bf16 %v424_v12, %v424_v12  ;;  %v481_v20 = vpack.c.bf16 %v444_v13, %v444_v13 }
  0xbf   : > { %v458_v21 = vpack.c.bf16 %v386_v16, %v386_v16  ;;  %v466_v22 = vpack.c.bf16 %v406_v17, %v406_v17 }
  0xc0   : > { %506 = vst.msk [vmem:[%s813_s29 + $0x50] sm:$0xf] %vm485_vm1, %v473_v18 }
  0xc1   : > { %514 = vst.msk [vmem:[%s813_s29 + $0x70] sm:$0xf] %vm485_vm1, %v481_v20 }
  0xc2   : > { %491 = vst.msk [vmem:[%s813_s29 + $0x14] sm:$0xf] %vm485_vm1, %v458_v21 }
  0xc3   : > { %499 = vst.msk [vmem:[%s813_s29 + $0x34] sm:$0xf] %vm485_vm1, %v466_v22  ;;  %v425_v23 = vpop.f32.mrf.mxu2  ;;  %v445_v24 = vpop.f32.mrf.mxu3 }
  0xc4   : > { %v426_v25 = vadd.f32 %v804_v19, %v425_v23  ;;  %v446_v26 = vadd.f32 %v804_v19, %v445_v24  ;;  %v388_v27 = vpop.f32.mrf.mxu0  ;;  %v408_v28 = vpop.f32.mrf.mxu1 }
  0xc5   : > { %v389_v29 = vadd.f32 %v804_v19, %v388_v27  ;;  %v409_v30 = vadd.f32 %v804_v19, %v408_v28 }
  0xc6   : > { %v474_v31 = vpack.c.bf16 %v426_v25, %v426_v25  ;;  %v482_v32 = vpack.c.bf16 %v446_v26, %v446_v26 }
  0xc7   : > { %v459_v33 = vpack.c.bf16 %v389_v29, %v389_v29  ;;  %v467_v34 = vpack.c.bf16 %v409_v30, %v409_v30 }
  0xc8   : > { %507 = vst.msk [vmem:[%s813_s29 + $0x54] sm:$0xf] %vm485_vm1, %v474_v31 }
  0xc9   : > { %515 = vst.msk [vmem:[%s813_s29 + $0x74] sm:$0xf] %vm485_vm1, %v482_v32 }
  0xca   : > { %492 = vst.msk [vmem:[%s813_s29 + $0x18] sm:$0xf] %vm485_vm1, %v459_v33 }
  0xcb   : > { %500 = vst.msk [vmem:[%s813_s29 + $0x38] sm:$0xf] %vm485_vm1, %v467_v34  ;;  %v428_v35 = vpop.f32.mrf.mxu2  ;;  %v448_v36 = vpop.f32.mrf.mxu3 }
  0xcc   : > { %v429_v37 = vadd.f32 %v804_v19, %v428_v35  ;;  %v449_v38 = vadd.f32 %v804_v19, %v448_v36  ;;  %v390_v39 = vpop.f32.mrf.mxu0  ;;  %v410_v40 = vpop.f32.mrf.mxu1 }
  0xcd   : > { %v391_v41 = vadd.f32 %v804_v19, %v390_v39  ;;  %v411_v42 = vadd.f32 %v804_v19, %v410_v40 }
  0xce   : > { %v475_v43 = vpack.c.bf16 %v429_v37, %v429_v37  ;;  %v483_v44 = vpack.c.bf16 %v449_v38, %v449_v38 }
  0xcf   : > { %v460_v45 = vpack.c.bf16 %v391_v41, %v391_v41  ;;  %v468_v46 = vpack.c.bf16 %v411_v42, %v411_v42 }
  0xd0   : > { %508 = vst.msk [vmem:[%s813_s29 + $0x58] sm:$0xf] %vm485_vm1, %v475_v43 }
  0xd1   : > { %516 = vst.msk [vmem:[%s813_s29 + $0x78] sm:$0xf] %vm485_vm1, %v483_v44 }
  0xd2   : > { %493 = vst.msk [vmem:[%s813_s29 + $0x1c] sm:$0xf] %vm485_vm1, %v460_v45 }
  0xd3   : > { %501 = vst.msk [vmem:[%s813_s29 + $0x3c] sm:$0xf] %vm485_vm1, %v468_v46  ;;  %v430_v47 = vpop.f32.mrf.mxu2  ;;  %v450_v48 = vpop.f32.mrf.mxu3 }
  0xd4   : > { %v431_v49 = vadd.f32 %v804_v19, %v430_v47  ;;  %v451_v50 = vadd.f32 %v804_v19, %v450_v48 }
  0xd6   : > { %v476_v51 = vpack.c.bf16 %v431_v49, %v431_v49  ;;  %v484_v52 = vpack.c.bf16 %v451_v50, %v451_v50 }
  0xd8   : > { %509 = vst.msk [vmem:[%s813_s29 + $0x5c] sm:$0xf] %vm485_vm1, %v476_v51 }
  0xd9   : > { %517 = vst.msk [vmem:[%s813_s29 + $0x7c] sm:$0xf] %vm485_vm1, %v484_v52 }
  0xda PF: > { %s13_s12 = sadd.s32 1, %s720_s12  }
  0xdb   : > { %p10_p4 = scmp.ge.s32.totalorder %s13_s12, 4  }
  0xdd   :  { %12 = sbr.rel (!%p10_p4) target bundleno = 1 (0x1), region = 62 }

// kernel: _lambda_.8
= control target key start
LH: loop header
LB: loop body
LE: loop exit
PB: predicated region body
PF: predicated region fallthrough
CT: control target
= control target key end

     0   :  { %vm196_vm0 = vcmask 130048   ;;  %v512_v47 = vmov 128.0   ;;  %vm382_vm5 = vcmask 125952   ;;  %s791_s1 = inlined_call_operand.vmem [shape: bf16[128,16], index: 1, kind: input, shape index: {}]   ;;  %s792_s0 = inlined_call_operand.vmem [shape: bf16[128,128], index: 0, kind: input, shape index: {}]   ;;  %s793_s2 = inlined_call_operand.vmem [shape: f32[1,16], index: 2, kind: input, shape index: {}]   ;;  %s794_s3 = inlined_call_operand.vmem [shape: f32[1,16], index: 3, kind: input, shape index: {}]   ;;  %s795_s4 = inlined_call_operand.vmem [shape: bf16[128,16], index: 4, kind: output, shape index: {}]  }
   0x1   :  { %v482_v0 = vld [vmem:[%s791_s1 + $0x38] sm:$0xff]  ;;  %v481_v1 = vld [vmem:[%s791_s1 + $0x30] sm:$0xff]  ;;  %v480_v2 = vld [vmem:[%s791_s1 + $0x28] sm:$0xff]  ;;  %508 = vrcp.f32 %v512_v47 }
   0x2   :  { %145 = vmatpush.bf16.msra.mxu0 %v482_v0  ;;  %483 = vmatpush.bf16.msra.mxu1 %v482_v0  ;;  %v479_v3 = vld [vmem:[%s791_s1 + $0x20] sm:$0xff]  ;;  %v478_v4 = vld [vmem:[%s791_s1 + $0x18] sm:$0xff]  ;;  %v477_v5 = vld [vmem:[%s791_s1 + $0x10] sm:$0xff] }
   0x3   :  { %484 = vmatpush.bf16.msra.mxu2 %v482_v0  ;;  %485 = vmatpush.bf16.msra.mxu3 %v482_v0  ;;  %v476_v6 = vld [vmem:[%s791_s1 + $0x8] sm:$0xff]  ;;  %v475_v7 = vld [vmem:[%s791_s1] sm:$0xff]  ;;  %v469_v9 = vld [vmem:[%s792_s0 + $0x10] sm:$0xff] }
   0x4   :  { %v467_v8 = vld [vmem:[%s792_s0] sm:$0xff]  ;;  %v473_v11 = vld [vmem:[%s792_s0 + $0x30] sm:$0xff]  ;;  %v468_v12 = vld [vmem:[%s792_s0 + $0x8] sm:$0xff] }
   0x5   :  { %v471_v10 = vld [vmem:[%s792_s0 + $0x20] sm:$0xff]  ;;  %v470_v13 = vld [vmem:[%s792_s0 + $0x18] sm:$0xff]  ;;  %v472_v14 = vld [vmem:[%s792_s0 + $0x28] sm:$0xff] }
   0x6   :  { %146 = vmatpush.bf16.msra.mxu0 %v481_v1  ;;  %486 = vmatpush.bf16.msra.mxu1 %v481_v1  ;;  %v474_v15 = vld [vmem:[%s792_s0 + $0x38] sm:$0xff] }
   0x7   :  { %487 = vmatpush.bf16.msra.mxu2 %v481_v1  ;;  %488 = vmatpush.bf16.msra.mxu3 %v481_v1  ;;  %v509_v54 = vpop.eup %508 }
   0x8   :  { %v236_v59 = vmul.f32 128.0, %v509_v54  ;;  %vm240_vm1 = vweird.f32 %v509_v54 }
   0xa   :  { %147 = vmatpush.bf16.msra.mxu0 %v480_v2  ;;  %489 = vmatpush.bf16.msra.mxu1 %v480_v2  ;;  %v237_v1 = vsub.f32 1.0, %v236_v59 }
   0xb   :  { %490 = vmatpush.bf16.msra.mxu2 %v480_v2  ;;  %491 = vmatpush.bf16.msra.mxu3 %v480_v2 }
   0xe   :  { %148 = vmatpush.bf16.msra.mxu0 %v479_v3  ;;  %492 = vmatpush.bf16.msra.mxu1 %v479_v3 }
   0xf   :  { %493 = vmatpush.bf16.msra.mxu2 %v479_v3  ;;  %494 = vmatpush.bf16.msra.mxu3 %v479_v3 }
  0x12   :  { %149 = vmatpush.bf16.msra.mxu0 %v478_v4  ;;  %495 = vmatpush.bf16.msra.mxu1 %v478_v4 }
  0x13   :  { %496 = vmatpush.bf16.msra.mxu2 %v478_v4  ;;  %497 = vmatpush.bf16.msra.mxu3 %v478_v4  ;;  %v238_v4 = vmul.f32 %v509_v54, %v237_v1 }
  0x16   :  { %150 = vmatpush.bf16.msra.mxu0 %v477_v5  ;;  %498 = vmatpush.bf16.msra.mxu1 %v477_v5 }
  0x17   :  { %499 = vmatpush.bf16.msra.mxu2 %v477_v5  ;;  %500 = vmatpush.bf16.msra.mxu3 %v477_v5 }
  0x1a   :  { %151 = vmatpush.bf16.msra.mxu0 %v476_v6  ;;  %501 = vmatpush.bf16.msra.mxu1 %v476_v6 }
  0x1b   :  { %502 = vmatpush.bf16.msra.mxu2 %v476_v6  ;;  %503 = vmatpush.bf16.msra.mxu3 %v476_v6 }
  0x1e   :  { %152 = vmatpush.bf16.msra.mxu0 %v475_v7  ;;  %504 = vmatpush.bf16.msra.mxu1 %v475_v7 }
  0x1f   :  { %505 = vmatpush.bf16.msra.mxu2 %v475_v7  ;;  %506 = vmatpush.bf16.msra.mxu3 %v475_v7  ;;  %v239_v7 = vadd.f32 %v509_v54, %v238_v4 }
  0x21   :  { %153 = vmatmul.bf16.vlgmr.msra.gmra.mxu0 %v467_v8  ;;  %163 = vmatmul.bf16.vlgmr.msra.gmra.mxu1 %v469_v9 }
  0x22   :  { %173 = vmatmul.bf16.vlgmr.msra.gmra.mxu2 %v471_v10  ;;  %183 = vmatmul.bf16.vlgmr.msra.gmra.mxu3 %v473_v11  ;;  %v650_v10 = vsel %vm240_vm1, %v509_v54, %v239_v7 }
  0x31   :  { %158 = vmatmul.bf16.gmra.mxu0 %v468_v12  ;;  %168 = vmatmul.bf16.gmra.mxu1 %v470_v13 }
  0x32   :  { %178 = vmatmul.bf16.gmra.mxu2 %v472_v14  ;;  %188 = vmatmul.bf16.gmra.mxu3 %v474_v15 }
  0x9e   :  { %v586_v16 = vpop.f32.mrf.mxu0  ;;  %v588_v17 = vpop.f32.mrf.mxu1 }
  0x9f   :  { %v197_v26 = vsel %vm196_vm0, %v586_v16, 0.0  ;;  %v204_v34 = vsel %vm196_vm0, %v588_v17, 0.0 }
  0xa5   :  { %v592_v19 = vpop.f32.mrf.mxu2  ;;  %v598_v22 = vpop.f32.mrf.mxu3 }
  0xa6   :  { %v590_v18 = vpop.f32.mrf.mxu0  ;;  %v594_v20 = vpop.f32.mrf.mxu1  ;;  %v212_v44 = vsel %vm196_vm0, %v592_v19, 0.0  ;;  %v220_v56 = vsel %vm196_vm0, %v598_v22, 0.0 }
  0xa7   :  { %v198_v24 = vsel %vm196_vm0, %v590_v18, 0.0  ;;  %v206_v37 = vsel %vm196_vm0, %v594_v20, 0.0 }
  0xa8   :  { %v199_v28 = vadd.f32 %v198_v24, %v197_v26 }
  0xad   :  { %v600_v23 = vpop.f32.mrf.mxu2  ;;  %v614_v33 = vpop.f32.mrf.mxu3 }
  0xae   :  { %v596_v21 = vpop.f32.mrf.mxu0  ;;  %v604_v25 = vpop.f32.mrf.mxu1  ;;  %v214_v48 = vsel %vm196_vm0, %v600_v23, 0.0  ;;  %v222_v58 = vsel %vm196_vm0, %v614_v33, 0.0 }
  0xaf   :  { %v200_v27 = vsel %vm196_vm0, %v596_v21, 0.0  ;;  %v208_v40 = vsel %vm196_vm0, %v604_v25, 0.0 }
  0xb0   :  { %v201_v29 = vadd.f32 %v200_v27, %v199_v28 }
  0xb5   :  { %v618_v36 = vpop.f32.mrf.mxu2  ;;  %v630_v46 = vpop.f32.mrf.mxu3 }
  0xb6   :  { %v610_v30 = vpop.f32.mrf.mxu0  ;;  %v622_v38 = vpop.f32.mrf.mxu1  ;;  %v216_v51 = vsel %vm196_vm0, %v618_v36, 0.0  ;;  %v224_v62 = vsel %vm196_vm0, %v630_v46, 0.0 }
  0xb7   :  { %v202_v31 = vsel %vm196_vm0, %v610_v30, 0.0  ;;  %v210_v42 = vsel %vm196_vm0, %v622_v38, 0.0 }
  0xb8   :  { %v203_v32 = vadd.f32 %v202_v31, %v201_v29 }
  0xba   :  { %v205_v35 = vadd.f32 %v204_v34, %v203_v32 }
  0xbc   :  { %v207_v39 = vadd.f32 %v206_v37, %v205_v35 }
  0xbd   :  { %v634_v50 = vpop.f32.mrf.mxu2  ;;  %v644_v61 = vpop.f32.mrf.mxu3 }
  0xbe   :  { %v209_v41 = vadd.f32 %v208_v40, %v207_v39  ;;  %v218_v53 = vsel %vm196_vm0, %v634_v50, 0.0  ;;  %v226_v0 = vsel %vm196_vm0, %v644_v61, 0.0 }
  0xc0   :  { %v211_v43 = vadd.f32 %v210_v42, %v209_v41 }
  0xc2   :  { %v213_v45 = vadd.f32 %v212_v44, %v211_v43 }
  0xc4   :  { %v215_v49 = vadd.f32 %v214_v48, %v213_v45 }
  0xc6   :  { %v217_v52 = vadd.f32 %v216_v51, %v215_v49 }
  0xc8   :  { %v219_v55 = vadd.f32 %v218_v53, %v217_v52 }
  0xca   :  { %v221_v57 = vadd.f32 %v220_v56, %v219_v55 }
  0xcc   :  { %v223_v60 = vadd.f32 %v222_v58, %v221_v57 }
  0xce   :  { %v225_v63 = vadd.f32 %v224_v62, %v223_v60 }
  0xd0   :  { %v227_v2 = vadd.f32 %v226_v0, %v225_v63 }
  0xd2   :  { %v228_v3 = vrot.slane %v227_v2, 4 }
  0xd4   :  { %v229_v5 = vadd.f32 %v228_v3, %v227_v2 }
  0xd6   :  { %v230_v6 = vrot.slane %v229_v5, 2 }
  0xd8   :  { %v231_v8 = vadd.f32 %v230_v6, %v229_v5 }
  0xda   :  { %v232_v9 = vrot.slane %v231_v8, 1 }
  0xdc   :  { %v233_v11 = vadd.f32 %v232_v9, %v231_v8 }
  0xde   :  { %v653_v12 = vmul.f32 %v650_v10, %v233_v11 }
  0xe0   :  { %v243_v13 = vsub.f32 %v586_v16, %v653_v12  ;;  %v244_v14 = vsub.f32 %v590_v18, %v653_v12  ;;  %v245_v15 = vsub.f32 %v596_v21, %v653_v12  ;;  %v246_v24 = vsub.f32 %v610_v30, %v653_v12 }
  0xe1   :  { %v247_v28 = vsub.f32 %v588_v17, %v653_v12  ;;  %v248_v31 = vsub.f32 %v594_v20, %v653_v12  ;;  %v249_v39 = vsub.f32 %v604_v25, %v653_v12  ;;  %v250_v43 = vsub.f32 %v622_v38, %v653_v12 }
  0xe2   :  { %v259_v26 = vmul.f32 %v243_v13, %v243_v13  ;;  %v260_v27 = vmul.f32 %v244_v14, %v244_v14  ;;  %v261_v29 = vmul.f32 %v245_v15, %v245_v15  ;;  %v262_v32 = vmul.f32 %v246_v24, %v246_v24 }
  0xe3   :  { %v263_v40 = vmul.f32 %v247_v28, %v247_v28  ;;  %v264_v44 = vmul.f32 %v248_v31, %v248_v31  ;;  %v251_v48 = vsub.f32 %v592_v19, %v653_v12  ;;  %v265_v49 = vmul.f32 %v249_v39, %v249_v39 }
  0xe4   :  { %v275_v34 = vsel %vm196_vm0, %v259_v26, 0.0  ;;  %v276_v35 = vsel %vm196_vm0, %v260_v27, 0.0  ;;  %v278_v41 = vsel %vm196_vm0, %v261_v29, 0.0  ;;  %v280_v45 = vsel %vm196_vm0, %v262_v32, 0.0 }
  0xe5   :  { %v277_v37 = vadd.f32 %v276_v35, %v275_v34  ;;  %v282_v51 = vsel %vm196_vm0, %v263_v40, 0.0  ;;  %v252_v53 = vsub.f32 %v600_v23, %v653_v12  ;;  %v266_v54 = vmul.f32 %v250_v43, %v250_v43 }
  0xe6   :  { %v284_v55 = vsel %vm196_vm0, %v264_v44, 0.0  ;;  %v253_v57 = vsub.f32 %v618_v36, %v653_v12  ;;  %v267_v58 = vmul.f32 %v251_v48, %v251_v48  ;;  %v286_v59 = vsel %vm196_vm0, %v265_v49, 0.0 }
  0xe7   :  { %v279_v42 = vadd.f32 %v278_v41, %v277_v37  ;;  %v254_v62 = vsub.f32 %v634_v50, %v653_v12  ;;  %v268_v63 = vmul.f32 %v252_v53, %v252_v53  ;;  %v288_v0 = vsel %vm196_vm0, %v266_v54, 0.0 }
  0xe8   :  { %v255_v2 = vsub.f32 %v598_v22, %v653_v12  ;;  %v269_v3 = vmul.f32 %v253_v57, %v253_v57  ;;  %v290_v4 = vsel %vm196_vm0, %v267_v58, 0.0  ;;  %v256_v6 = vsub.f32 %v614_v33, %v653_v12  ;;  %v194_v58 = vld [vmem:[%s793_s2] sm:$0x1] }
  0xe9   :  { %v281_v47 = vadd.f32 %v280_v45, %v279_v42  ;;  %v270_v7 = vmul.f32 %v254_v62, %v254_v62  ;;  %v292_v8 = vsel %vm196_vm0, %v268_v63, 0.0  ;;  %v257_v11 = vsub.f32 %v630_v46, %v653_v12 }
  0xea   :  { %v271_v13 = vmul.f32 %v255_v2, %v255_v2  ;;  %v294_v14 = vsel %vm196_vm0, %v269_v3, 0.0  ;;  %v258_v24 = vsub.f32 %v644_v61, %v653_v12  ;;  %v272_v26 = vmul.f32 %v256_v6, %v256_v6 }
  0xeb   :  { %v283_v52 = vadd.f32 %v282_v51, %v281_v47  ;;  %v296_v27 = vsel %vm196_vm0, %v270_v7, 0.0  ;;  %v273_v29 = vmul.f32 %v257_v11, %v257_v11 }
  0xec   :  { %v298_v31 = vsel %vm196_vm0, %v271_v13, 0.0  ;;  %v274_v34 = vmul.f32 %v258_v24, %v258_v24  ;;  %v300_v35 = vsel %vm196_vm0, %v272_v26, 0.0 }
  0xed   :  { %v285_v56 = vadd.f32 %v284_v55, %v283_v52  ;;  %v302_v39 = vsel %vm196_vm0, %v273_v29, 0.0 }
  0xee   :  { %v304_v41 = vsel %vm196_vm0, %v274_v34, 0.0 }
  0xef   :  { %v287_v60 = vadd.f32 %v286_v59, %v285_v56 }
  0xf1   :  { %v289_v1 = vadd.f32 %v288_v0, %v287_v60 }
  0xf3   :  { %v291_v5 = vadd.f32 %v290_v4, %v289_v1 }
  0xf5   :  { %v293_v9 = vadd.f32 %v292_v8, %v291_v5 }
  0xf7   :  { %v295_v15 = vadd.f32 %v294_v14, %v293_v9 }
  0xf9   :  { %v297_v28 = vadd.f32 %v296_v27, %v295_v15 }
  0xfb   :  { %v299_v32 = vadd.f32 %v298_v31, %v297_v28 }
  0xfd   :  { %v301_v37 = vadd.f32 %v300_v35, %v299_v32 }
  0xff   :  { %v303_v40 = vadd.f32 %v302_v39, %v301_v37 }
 0x101   :  { %v305_v42 = vadd.f32 %v304_v41, %v303_v40 }
 0x103   :  { %v306_v43 = vrot.slane %v305_v42, 4 }
 0x105   :  { %v307_v44 = vadd.f32 %v306_v43, %v305_v42 }
 0x107   :  { %v308_v45 = vrot.slane %v307_v44, 2 }
 0x109   :  { %v309_v47 = vadd.f32 %v308_v45, %v307_v44 }
 0x10b   :  { %v310_v48 = vrot.slane %v309_v47, 1 }
 0x10d   :  { %v311_v49 = vadd.f32 %v310_v48, %v309_v47 }
 0x10f   :  { %v313_v51 = vmul.f32 %v311_v49, %v650_v10  ;;  %v195_v10 = vld [vmem:[%s794_s3] sm:$0x1] }
 0x111   :  { %v314_v52 = vadd.f32 1e-05, %v313_v51 }
 0x113   :  { %510 = vrsqrt.f32 %v314_v52  ;;  %vm321_vm3 = vweird.f32 %v314_v52 }
 0x119   :  { %v511_v53 = vpop.eup %510 }
 0x11a   :  { %v316_v54 = vmul.f32 %v511_v53, %v314_v52  ;;  %vm322_vm2 = vweird.f32 %v511_v53 }
 0x11b   :  { %vm323_vm4 = vmor %vm321_vm3, %vm322_vm2 }
 0x11c   :  { %v317_v55 = vmul.f32 %v511_v53, %v316_v54 }
 0x11e   :  { %v318_v56 = vmul.f32 0.5, %v317_v55 }
 0x120   :  { %v319_v57 = vsub.f32 1.5, %v318_v56 }
 0x122   :  { %v320_v59 = vmul.f32 %v511_v53, %v319_v57 }
 0x124   :  { %v324_v60 = vsel %vm323_vm4, %v511_v53, %v320_v59 }
 0x125   :  { %v325_v62 = vmul.f32 %v324_v60, %v194_v58 }
 0x127   :  { %v326_v63 = vmul.f32 %v325_v62, %v653_v12  ;;  %v329_v1 = vperm.slane %v325_v62, 0 }
 0x129   :  { %v327_v0 = vsub.f32 %v195_v10, %v326_v63  ;;  %v331_v2 = vmul.f32 %v329_v1, %v586_v16  ;;  %v332_v3 = vmul.f32 %v329_v1, %v590_v18  ;;  %v333_v4 = vmul.f32 %v329_v1, %v596_v21 }
 0x12a   :  { %v334_v6 = vmul.f32 %v329_v1, %v610_v30  ;;  %v335_v7 = vmul.f32 %v329_v1, %v588_v17  ;;  %v336_v13 = vmul.f32 %v329_v1, %v594_v20  ;;  %v337_v12 = vmul.f32 %v329_v1, %v604_v25 }
 0x12b   :  { %v348_v5 = vperm.slane %v327_v0, 0  ;;  %v338_v16 = vmul.f32 %v329_v1, %v622_v38  ;;  %v339_v18 = vmul.f32 %v329_v1, %v592_v19  ;;  %v340_v17 = vmul.f32 %v329_v1, %v600_v23 }
 0x12c   :  { %v341_v20 = vmul.f32 %v329_v1, %v618_v36  ;;  %v342_v19 = vmul.f32 %v329_v1, %v634_v50  ;;  %v343_v23 = vmul.f32 %v329_v1, %v598_v22  ;;  %v344_v35 = vmul.f32 %v329_v1, %v614_v33 }
 0x12d   :  { %v350_v8 = vadd.f32 %v348_v5, %v331_v2  ;;  %v351_v9 = vadd.f32 %v348_v5, %v332_v3  ;;  %v352_v11 = vadd.f32 %v348_v5, %v333_v4  ;;  %v353_v14 = vadd.f32 %v348_v5, %v334_v6 }
 0x12e   :  { %v354_v15 = vadd.f32 %v348_v5, %v335_v7  ;;  %v355_v24 = vadd.f32 %v348_v5, %v336_v13  ;;  %v356_v21 = vadd.f32 %v348_v5, %v337_v12  ;;  %v357_v28 = vadd.f32 %v348_v5, %v338_v16 }
 0x12f   :  { %v366_v26 = vpack.c.bf16 %v350_v8, %v350_v8  ;;  %v367_v30 = vpack.c.bf16 %v351_v9, %v351_v9  ;;  %v368_v27 = vpack.c.bf16 %v352_v11, %v352_v11  ;;  %v369_v29 = vpack.c.bf16 %v353_v14, %v353_v14 }
 0x130   :  { %v358_v31 = vadd.f32 %v348_v5, %v339_v18  ;;  %v370_v32 = vpack.c.bf16 %v354_v15, %v354_v15  ;;  %v359_v25 = vadd.f32 %v348_v5, %v340_v17  ;;  %v371_v38 = vpack.c.bf16 %v355_v24, %v355_v24 }
 0x131   :  { %383 = vst.msk [vmem:[%s795_s4] sm:$0xf] %vm382_vm5, %v366_v26  ;;  %v360_v34 = vadd.f32 %v348_v5, %v341_v20  ;;  %v372_v36 = vpack.c.bf16 %v356_v21, %v356_v21  ;;  %v361_v37 = vadd.f32 %v348_v5, %v342_v19  ;;  %v373_v50 = vpack.c.bf16 %v357_v28, %v357_v28 }
 0x132   :  { %384 = vst.msk [vmem:[%s795_s4 + $0x4] sm:$0xf] %vm382_vm5, %v367_v30  ;;  %v345_v39 = vmul.f32 %v329_v1, %v630_v46  ;;  %v362_v40 = vadd.f32 %v348_v5, %v343_v23  ;;  %v374_v22 = vpack.c.bf16 %v358_v31, %v358_v31  ;;  %v346_v41 = vmul.f32 %v329_v1, %v644_v61 }
 0x133   :  { %385 = vst.msk [vmem:[%s795_s4 + $0x8] sm:$0xf] %vm382_vm5, %v368_v27  ;;  %v363_v42 = vadd.f32 %v348_v5, %v344_v35  ;;  %v375_v33 = vpack.c.bf16 %v359_v25, %v359_v25  ;;  %v376_v44 = vpack.c.bf16 %v360_v34, %v360_v34  ;;  %v377_v45 = vpack.c.bf16 %v361_v37, %v361_v37 }
 0x134   :  { %386 = vst.msk [vmem:[%s795_s4 + $0xc] sm:$0xf] %vm382_vm5, %v369_v29  ;;  %v364_v43 = vadd.f32 %v348_v5, %v345_v39  ;;  %v365_v46 = vadd.f32 %v348_v5, %v346_v41  ;;  %v378_v61 = vpack.c.bf16 %v362_v40, %v362_v40 }
 0x135   :  { %387 = vst.msk [vmem:[%s795_s4 + $0x10] sm:$0xf] %vm382_vm5, %v370_v32  ;;  %v379_v47 = vpack.c.bf16 %v363_v42, %v363_v42 }
 0x136   :  { %388 = vst.msk [vmem:[%s795_s4 + $0x14] sm:$0xf] %vm382_vm5, %v371_v38  ;;  %v380_v48 = vpack.c.bf16 %v364_v43, %v364_v43  ;;  %v381_v49 = vpack.c.bf16 %v365_v46, %v365_v46 }
 0x137   :  { %389 = vst.msk [vmem:[%s795_s4 + $0x18] sm:$0xf] %vm382_vm5, %v372_v36 }
 0x138   :  { %390 = vst.msk [vmem:[%s795_s4 + $0x1c] sm:$0xf] %vm382_vm5, %v373_v50 }
 0x139   :  { %391 = vst.msk [vmem:[%s795_s4 + $0x20] sm:$0xf] %vm382_vm5, %v374_v22 }
 0x13a   :  { %392 = vst.msk [vmem:[%s795_s4 + $0x24] sm:$0xf] %vm382_vm5, %v375_v33 }
 0x13b   :  { %393 = vst.msk [vmem:[%s795_s4 + $0x28] sm:$0xf] %vm382_vm5, %v376_v44 }
 0x13c   :  { %394 = vst.msk [vmem:[%s795_s4 + $0x2c] sm:$0xf] %vm382_vm5, %v377_v45 }
 0x13d   :  { %395 = vst.msk [vmem:[%s795_s4 + $0x30] sm:$0xf] %vm382_vm5, %v378_v61 }
 0x13e   :  { %396 = vst.msk [vmem:[%s795_s4 + $0x34] sm:$0xf] %vm382_vm5, %v379_v47 }
 0x13f   :  { %397 = vst.msk [vmem:[%s795_s4 + $0x38] sm:$0xf] %vm382_vm5, %v380_v48 }
 0x140   :  { %398 = vst.msk [vmem:[%s795_s4 + $0x3c] sm:$0xf] %vm382_vm5, %v381_v49 }

// kernel: _lambda_.9
= control target key start
LH: loop header
LB: loop body
LE: loop exit
PB: predicated region body
PF: predicated region fallthrough
CT: control target
= control target key end

     0   :  { %v417_v30 = vmov 32.0   ;;  %vm209_vm0 = vcmask 261120   ;;  %vm287_vm5 = vcmask 257024   ;;  %s556_s1 = inlined_call_operand.vmem [shape: bf16[256,32], index: 1, kind: input, shape index: {}]   ;;  %s557_s0 = inlined_call_operand.vmem [shape: bf16[32,256], index: 0, kind: input, shape index: {}]   ;;  %s558_s2 = inlined_call_operand.vmem [shape: f32[1,32], index: 2, kind: input, shape index: {}]   ;;  %s559_s3 = inlined_call_operand.vmem [shape: f32[1,32], index: 3, kind: input, shape index: {}]   ;;  %s560_s4 = inlined_call_operand.vmem [shape: bf16[32,32], index: 4, kind: output, shape index: {}]  }
   0x1   :  { %v387_v0 = vld [vmem:[%s556_s1 + $0x38] sm:$0xff]  ;;  %v386_v2 = vld [vmem:[%s556_s1 + $0x30] sm:$0xff]  ;;  %v385_v4 = vld [vmem:[%s556_s1 + $0x28] sm:$0xff]  ;;  %413 = vrcp.f32 %v417_v30 }
   0x2   :  { %v395_v1 = vld [vmem:[%s556_s1 + $0x78] sm:$0xff]  ;;  %169 = vmatpush.bf16.msra.mxu0 %v387_v0  ;;  %396 = vmatpush.bf16.msra.mxu2 %v387_v0  ;;  %v394_v3 = vld [vmem:[%s556_s1 + $0x70] sm:$0xff]  ;;  %v393_v5 = vld [vmem:[%s556_s1 + $0x68] sm:$0xff] }
   0x3   :  { %188 = vmatpush.bf16.msra.mxu1 %v395_v1  ;;  %404 = vmatpush.bf16.msra.mxu3 %v395_v1  ;;  %v384_v6 = vld [vmem:[%s556_s1 + $0x20] sm:$0xff]  ;;  %v383_v8 = vld [vmem:[%s556_s1 + $0x18] sm:$0xff]  ;;  %v382_v10 = vld [vmem:[%s556_s1 + $0x10] sm:$0xff] }
   0x4   :  { %v392_v7 = vld [vmem:[%s556_s1 + $0x60] sm:$0xff]  ;;  %v391_v9 = vld [vmem:[%s556_s1 + $0x58] sm:$0xff]  ;;  %v390_v11 = vld [vmem:[%s556_s1 + $0x50] sm:$0xff] }
   0x5   :  { %v381_v12 = vld [vmem:[%s556_s1 + $0x8] sm:$0xff]  ;;  %v380_v14 = vld [vmem:[%s556_s1] sm:$0xff]  ;;  %v306_v18 = vld [vmem:[%s557_s0 + $0x10] sm:$0xf] }
   0x6   :  { %170 = vmatpush.bf16.msra.mxu0 %v386_v2  ;;  %397 = vmatpush.bf16.msra.mxu2 %v386_v2  ;;  %v389_v13 = vld [vmem:[%s556_s1 + $0x48] sm:$0xff]  ;;  %v388_v15 = vld [vmem:[%s556_s1 + $0x40] sm:$0xff]  ;;  %v379_v19 = vld [vmem:[%s557_s0 + $0x14] sm:$0xf0] }
   0x7   :  { %189 = vmatpush.bf16.msra.mxu1 %v394_v3  ;;  %405 = vmatpush.bf16.msra.mxu3 %v394_v3  ;;  %v298_v16 = vld [vmem:[%s557_s0] sm:$0xf]  ;;  %v377_v17 = vld [vmem:[%s557_s0 + $0x4] sm:$0xf0]  ;;  %v376_v20 = vld [vmem:[%s557_s0 + $0x4] sm:$0xf]  ;;  %v307_v25 = vor.u32 %v379_v19, %v306_v18  ;;  %v414_v37 = vpop.eup %413 }
   0x8   :  { %v300_v21 = vld [vmem:[%s557_s0 + $0x8] sm:$0xf0]  ;;  %v378_v22 = vld [vmem:[%s557_s0 + $0x14] sm:$0xf]  ;;  %v308_v23 = vld [vmem:[%s557_s0 + $0x18] sm:$0xf0]  ;;  %v299_v24 = vor.u32 %v377_v17, %v298_v16  ;;  %vm229_vm1 = vweird.f32 %v414_v37 }
   0x9   :  { %v303_v26 = vor.u32 %v376_v20, %v300_v21  ;;  %v311_v27 = vor.u32 %v378_v22, %v308_v23  ;;  %v225_v43 = vmul.f32 32.0, %v414_v37 }
   0xa   :  { %171 = vmatpush.bf16.msra.mxu0 %v385_v4  ;;  %398 = vmatpush.bf16.msra.mxu2 %v385_v4 }
   0xb   :  { %190 = vmatpush.bf16.msra.mxu1 %v393_v5  ;;  %406 = vmatpush.bf16.msra.mxu3 %v393_v5  ;;  %v226_v49 = vsub.f32 1.0, %v225_v43 }
   0xd   :  { %v227_v52 = vmul.f32 %v414_v37, %v226_v49 }
   0xe   :  { %172 = vmatpush.bf16.msra.mxu0 %v384_v6  ;;  %399 = vmatpush.bf16.msra.mxu2 %v384_v6 }
   0xf   :  { %191 = vmatpush.bf16.msra.mxu1 %v392_v7  ;;  %407 = vmatpush.bf16.msra.mxu3 %v392_v7  ;;  %v228_v55 = vadd.f32 %v414_v37, %v227_v52 }
  0x11   :  { %v230_v58 = vsel %vm229_vm1, %v414_v37, %v228_v55 }
  0x12   :  { %173 = vmatpush.bf16.msra.mxu0 %v383_v8  ;;  %400 = vmatpush.bf16.msra.mxu2 %v383_v8 }
  0x13   :  { %192 = vmatpush.bf16.msra.mxu1 %v391_v9  ;;  %408 = vmatpush.bf16.msra.mxu3 %v391_v9 }
  0x16   :  { %174 = vmatpush.bf16.msra.mxu0 %v382_v10  ;;  %401 = vmatpush.bf16.msra.mxu2 %v382_v10 }
  0x17   :  { %193 = vmatpush.bf16.msra.mxu1 %v390_v11  ;;  %409 = vmatpush.bf16.msra.mxu3 %v390_v11 }
  0x1a   :  { %175 = vmatpush.bf16.msra.mxu0 %v381_v12  ;;  %402 = vmatpush.bf16.msra.mxu2 %v381_v12 }
  0x1b   :  { %194 = vmatpush.bf16.msra.mxu1 %v389_v13  ;;  %410 = vmatpush.bf16.msra.mxu3 %v389_v13 }
  0x1e   :  { %176 = vmatpush.bf16.msra.mxu0 %v380_v14  ;;  %403 = vmatpush.bf16.msra.mxu2 %v380_v14 }
  0x1f   :  { %195 = vmatpush.bf16.msra.mxu1 %v388_v15  ;;  %411 = vmatpush.bf16.msra.mxu3 %v388_v15 }
  0x21   :  { %177 = vmatmul.bf16.vlgmr.msra.gmra.mxu0 %v299_v24  ;;  %182 = vmatmul.bf16.vlgmr.msra.gmra.mxu2 %v307_v25  ;;  %v207_v25 = vld [vmem:[%s558_s2] sm:$0x1] }
  0x22   :  { %196 = vmatmul.bf16.vlgmr.msra.gmra.mxu1 %v303_v26  ;;  %201 = vmatmul.bf16.vlgmr.msra.gmra.mxu3 %v311_v27 }
  0x9e   :  { %v178_v28 = vpop.f32.mrf.mxu0 }
  0x9f   :  { %v197_v29 = vpop.f32.mrf.mxu1 }
  0xa0   :  { %v515_v33 = vadd.f32 %v197_v29, %v178_v28  ;;  %v208_v29 = vld [vmem:[%s559_s3] sm:$0x1] }
  0xa2   :  { %v210_v38 = vsel %vm209_vm0, %v515_v33, 0.0 }
  0xa4   :  { %v183_v31 = vpop.f32.mrf.mxu2 }
  0xa5   :  { %v202_v32 = vpop.f32.mrf.mxu3 }
  0xa6   :  { %v180_v34 = vpop.f32.mrf.mxu0  ;;  %v521_v39 = vadd.f32 %v202_v32, %v183_v31 }
  0xa7   :  { %v199_v35 = vpop.f32.mrf.mxu1 }
  0xa8   :  { %v517_v36 = vadd.f32 %v199_v35, %v180_v34  ;;  %v213_v45 = vsel %vm209_vm0, %v521_v39, 0.0 }
  0xaa   :  { %v211_v40 = vsel %vm209_vm0, %v517_v36, 0.0 }
  0xab   :  { %v212_v41 = vadd.f32 %v211_v40, %v210_v38 }
  0xac   :  { %v185_v42 = vpop.f32.mrf.mxu2 }
  0xad   :  { %v204_v44 = vpop.f32.mrf.mxu3  ;;  %v214_v47 = vadd.f32 %v213_v45, %v212_v41 }
  0xae   :  { %v205_v46 = vadd.f32 %v204_v44, %v185_v42 }
  0xb0   :  { %v215_v48 = vsel %vm209_vm0, %v205_v46, 0.0 }
  0xb1   :  { %v216_v50 = vadd.f32 %v215_v48, %v214_v47 }
  0xb3   :  { %v217_v51 = vrot.slane %v216_v50, 4 }
  0xb5   :  { %v218_v53 = vadd.f32 %v217_v51, %v216_v50 }
  0xb7   :  { %v219_v54 = vrot.slane %v218_v53, 2 }
  0xb9   :  { %v220_v56 = vadd.f32 %v219_v54, %v218_v53 }
  0xbb   :  { %v221_v57 = vrot.slane %v220_v56, 1 }
  0xbd   :  { %v222_v59 = vadd.f32 %v221_v57, %v220_v56 }
  0xbf   :  { %v231_v60 = vmul.f32 %v230_v58, %v222_v59 }
  0xc1   :  { %v232_v61 = vsub.f32 %v515_v33, %v231_v60  ;;  %v233_v62 = vsub.f32 %v517_v36, %v231_v60  ;;  %v234_v63 = vsub.f32 %v521_v39, %v231_v60  ;;  %v235_v0 = vsub.f32 %v205_v46, %v231_v60 }
  0xc3   :  { %v236_v1 = vmul.f32 %v232_v61, %v232_v61  ;;  %v237_v2 = vmul.f32 %v233_v62, %v233_v62  ;;  %v238_v3 = vmul.f32 %v234_v63, %v234_v63  ;;  %v239_v4 = vmul.f32 %v235_v0, %v235_v0 }
  0xc5   :  { %v240_v5 = vsel %vm209_vm0, %v236_v1, 0.0  ;;  %v241_v6 = vsel %vm209_vm0, %v237_v2, 0.0  ;;  %v243_v8 = vsel %vm209_vm0, %v238_v3, 0.0  ;;  %v245_v10 = vsel %vm209_vm0, %v239_v4, 0.0 }
  0xc6   :  { %v242_v7 = vadd.f32 %v241_v6, %v240_v5 }
  0xc8   :  { %v244_v9 = vadd.f32 %v243_v8, %v242_v7 }
  0xca   :  { %v246_v11 = vadd.f32 %v245_v10, %v244_v9 }
  0xcc   :  { %v247_v12 = vrot.slane %v246_v11, 4 }
  0xce   :  { %v248_v13 = vadd.f32 %v247_v12, %v246_v11 }
  0xd0   :  { %v249_v14 = vrot.slane %v248_v13, 2 }
  0xd2   :  { %v250_v15 = vadd.f32 %v249_v14, %v248_v13 }
  0xd4   :  { %v251_v16 = vrot.slane %v250_v15, 1 }
  0xd6   :  { %v252_v17 = vadd.f32 %v251_v16, %v250_v15 }
  0xd8   :  { %v254_v18 = vmul.f32 %v252_v17, %v230_v58 }
  0xda   :  { %v255_v19 = vadd.f32 1e-05, %v254_v18 }
  0xdc   :  { %415 = vrsqrt.f32 %v255_v19  ;;  %vm262_vm3 = vweird.f32 %v255_v19 }
  0xe2   :  { %v416_v20 = vpop.eup %415 }
  0xe3   :  { %v257_v21 = vmul.f32 %v416_v20, %v255_v19  ;;  %vm263_vm2 = vweird.f32 %v416_v20 }
  0xe4   :  { %vm264_vm4 = vmor %vm262_vm3, %vm263_vm2 }
  0xe5   :  { %v258_v22 = vmul.f32 %v416_v20, %v257_v21 }
  0xe7   :  { %v259_v23 = vmul.f32 0.5, %v258_v22 }
  0xe9   :  { %v260_v24 = vsub.f32 1.5, %v259_v23 }
  0xeb   :  { %v261_v26 = vmul.f32 %v416_v20, %v260_v24 }
  0xed   :  { %v265_v27 = vsel %vm264_vm4, %v416_v20, %v261_v26 }
  0xee   :  { %v266_v28 = vmul.f32 %v265_v27, %v207_v25 }
  0xf0   :  { %v267_v30 = vmul.f32 %v266_v28, %v231_v60  ;;  %v270_v31 = vperm.slane %v266_v28, 0 }
  0xf2   :  { %v268_v32 = vsub.f32 %v208_v29, %v267_v30  ;;  %v272_v34 = vmul.f32 %v270_v31, %v515_v33  ;;  %v273_v35 = vmul.f32 %v270_v31, %v517_v36  ;;  %v274_v37 = vmul.f32 %v270_v31, %v521_v39 }
  0xf3   :  { %v275_v38 = vmul.f32 %v270_v31, %v205_v46 }
  0xf4   :  { %v277_v40 = vperm.slane %v268_v32, 0 }
  0xf6   :  { %v279_v41 = vadd.f32 %v277_v40, %v272_v34  ;;  %v280_v42 = vadd.f32 %v277_v40, %v273_v35  ;;  %v281_v43 = vadd.f32 %v277_v40, %v274_v37  ;;  %v282_v44 = vadd.f32 %v277_v40, %v275_v38 }
  0xf8   :  { %v283_v45 = vpack.c.bf16 %v279_v41, %v279_v41  ;;  %v284_v47 = vpack.c.bf16 %v280_v42, %v280_v42  ;;  %v285_v48 = vpack.c.bf16 %v281_v43, %v281_v43  ;;  %v286_v49 = vpack.c.bf16 %v282_v44, %v282_v44 }
  0xfa   :  { %288 = vst.msk [vmem:[%s560_s4] sm:$0xf] %vm287_vm5, %v283_v45 }
  0xfb   :  { %289 = vst.msk [vmem:[%s560_s4 + $0x4] sm:$0xf] %vm287_vm5, %v284_v47 }
  0xfc   :  { %290 = vst.msk [vmem:[%s560_s4 + $0x8] sm:$0xf] %vm287_vm5, %v285_v48 }
  0xfd   :  { %291 = vst.msk [vmem:[%s560_s4 + $0xc] sm:$0xf] %vm287_vm5, %v286_v49 }

// kernel: _lambda_.10
= control target key start
LH: loop header
LB: loop body
LE: loop exit
PB: predicated region body
PF: predicated region fallthrough
CT: control target
= control target key end

     0   :  { %v2066_v23 = vmov 0   ;;  %vm76_vm3 = vcmask 1040384   ;;  %vm80_vm4 = vcmask 1042434   ;;  %vm84_vm5 = vcmask 1041408   ;;  %s2068_s21 = smov 96   ;;  %s2069_s22 = smov 64   ;;  %s2873_s1 = inlined_call_operand.vmem [shape: bf16[512,128], index: 1, kind: input, shape index: {}]   ;;  %s2874_s0 = inlined_call_operand.vmem [shape: bf16[2,512], index: 0, kind: input, shape index: {}]   ;;  %s2875_s2 = inlined_call_operand.vmem [shape: f32[1,32], index: 2, kind: input, shape index: {}, may-alias: {2,7,11}]   ;;  %s2876_s3 = inlined_call_operand.vmem [shape: f32[1,32], index: 3, kind: input, shape index: {}, may-alias: {3,8,12}]   ;;  %s2877_s5 = inlined_call_operand.vmem [shape: f32[1,32], index: 5, kind: input, shape index: {}]   ;;  %s2878_s4 = inlined_call_operand.vmem [shape: bf16[128,32], index: 4, kind: input, shape index: {}]   ;;  %s2879_s6 = inlined_call_operand.vmem [shape: bf16[32,128], index: 6, kind: input, shape index: {}]   ;;  %s2880_s10 = inlined_call_operand.vmem [shape: bf16[128,512], index: 10, kind: input, shape index: {}]   ;;  %s2881_s7 = inlined_call_operand.vmem [shape: f32[1,32], index: 7, kind: input, shape index: {}, may-alias: {2,7,11}]   ;;  %s2882_s8 = inlined_call_operand.vmem [shape: f32[1,32], index: 8, kind: input, shape index: {}, may-alias: {3,8,12}]   ;;  %s2883_s9 = inlined_call_operand.vmem [shape: bf16[128,512], index: 9, kind: input, shape index: {}]   ;;  %s2884_s11 = inlined_call_operand.vmem [shape: f32[1,32], index: 11, kind: input, shape index: {}, may-alias: {2,7,11}]   ;;  %s2885_s12 = inlined_call_operand.vmem [shape: f32[1,32], index: 12, kind: input, shape index: {}, may-alias: {3,8,12}]   ;;  %s2886_s13 = inlined_call_operand.vmem [shape: bf16[2,512], index: 13, kind: output, shape index: {}]  }
   0x1   :  { %v1950_v0 = vld [vmem:[%s2873_s1 + $0x38] sm:$0xff]  ;;  %v1949_v4 = vld [vmem:[%s2873_s1 + $0x30] sm:$0xff]  ;;  %v1948_v8 = vld [vmem:[%s2873_s1 + $0x28] sm:$0xff]  ;;  %v66_v31 = vunpack.c.l.b16 %v2066_v23  ;;  %v67_v32 = vunpack.c.h.b16 %v2066_v23  ;;  %vm447_vm8 = vcmask 261120   ;;  %vm449_vm9 = vcmask 523264  }
   0x2   :  { %v1958_v1 = vld [vmem:[%s2873_s1 + $0x78] sm:$0xff]  ;;  %354 = vmatpush.bf16.msra.mxu0 %v1950_v0  ;;  %v1957_v5 = vld [vmem:[%s2873_s1 + $0x70] sm:$0xff]  ;;  %v1956_v9 = vld [vmem:[%s2873_s1 + $0x68] sm:$0xff]  ;;  %vm451_vm10 = vcmask 785408  }
   0x3   :  { %v1966_v2 = vld [vmem:[%s2873_s1 + $0xb8] sm:$0xff]  ;;  %367 = vmatpush.bf16.msra.mxu1 %v1958_v1  ;;  %v1965_v6 = vld [vmem:[%s2873_s1 + $0xb0] sm:$0xff]  ;;  %v1964_v10 = vld [vmem:[%s2873_s1 + $0xa8] sm:$0xff] }
   0x4   :  { %v1974_v3 = vld [vmem:[%s2873_s1 + $0xf8] sm:$0xff]  ;;  %380 = vmatpush.bf16.msra.mxu2 %v1966_v2  ;;  %v1973_v7 = vld [vmem:[%s2873_s1 + $0xf0] sm:$0xff]  ;;  %v1972_v11 = vld [vmem:[%s2873_s1 + $0xe8] sm:$0xff] }
   0x5   :  { %393 = vmatpush.bf16.msra.mxu3 %v1974_v3  ;;  %v1947_v12 = vld [vmem:[%s2873_s1 + $0x20] sm:$0xff]  ;;  %v1946_v19 = vld [vmem:[%s2873_s1 + $0x18] sm:$0xff]  ;;  %v1945_v25 = vld [vmem:[%s2873_s1 + $0x10] sm:$0xff] }
   0x6   :  { %355 = vmatpush.bf16.msra.mxu0 %v1949_v4  ;;  %v1955_v13 = vld [vmem:[%s2873_s1 + $0x60] sm:$0xff]  ;;  %v1954_v20 = vld [vmem:[%s2873_s1 + $0x58] sm:$0xff]  ;;  %v1953_v26 = vld [vmem:[%s2873_s1 + $0x50] sm:$0xff] }
   0x7   :  { %368 = vmatpush.bf16.msra.mxu1 %v1957_v5  ;;  %v2187_v14 = vld [vmem:[%s2874_s0] sm:$0xf]  ;;  %v1962_v21 = vld [vmem:[%s2873_s1 + $0x98] sm:$0xff]  ;;  %v1961_v27 = vld [vmem:[%s2873_s1 + $0x90] sm:$0xff] }
   0x8   :  { %381 = vmatpush.bf16.msra.mxu2 %v1965_v6  ;;  %v1963_v15 = vld [vmem:[%s2873_s1 + $0xa0] sm:$0xff]  ;;  %v47_v17 = vunpack.c.l.bf16 %v2187_v14  ;;  %v1970_v22 = vld [vmem:[%s2873_s1 + $0xd8] sm:$0xff]  ;;  %v1969_v28 = vld [vmem:[%s2873_s1 + $0xd0] sm:$0xff] }
   0x9   :  { %394 = vmatpush.bf16.msra.mxu3 %v1973_v7  ;;  %v1971_v16 = vld [vmem:[%s2873_s1 + $0xe0] sm:$0xff]  ;;  %v1944_v29 = vld [vmem:[%s2873_s1 + $0x8] sm:$0xff] }
   0xa   :  { %356 = vmatpush.bf16.msra.mxu0 %v1948_v8  ;;  %v49_v18 = vmul.f32 0.20019531, %v47_v17  ;;  %vm48_vm0 = vcmp.ge.f32.partialorder %v47_v17, 0.0  ;;  %v1952_v33 = vld [vmem:[%s2873_s1 + $0x48] sm:$0xff]  ;;  %v1943_v45 = vld [vmem:[%s2873_s1] sm:$0xff] }
   0xb   :  { %369 = vmatpush.bf16.msra.mxu1 %v1956_v9  ;;  %v62_v24 = vsel %vm48_vm0, 1, %v2066_v23  ;;  %v1960_v34 = vld [vmem:[%s2873_s1 + $0x88] sm:$0xff]  ;;  %v1951_v46 = vld [vmem:[%s2873_s1 + $0x40] sm:$0xff] }
   0xc   :  { %382 = vmatpush.bf16.msra.mxu2 %v1964_v10  ;;  %51 = vst [vmem:[#allocation1] ss:$4 sm:$0xff] %v49_v18  ;;  %v1516_v30 = vunpack.i.l.s16 %v62_v24  ;;  %v1968_v35 = vld [vmem:[%s2873_s1 + $0xc8] sm:$0xff]  ;;  %v1959_v49 = vld [vmem:[%s2873_s1 + $0x80] sm:$0xff] }
   0xd   :  { %395 = vmatpush.bf16.msra.mxu3 %v1972_v11  ;;  %v1967_v50 = vld [vmem:[%s2873_s1 + $0xc0] sm:$0xff]  ;;  %s2067_s1 = smov 32  }
   0xe   :  { %357 = vmatpush.bf16.msra.mxu0 %v1947_v12  ;;  %vm2232_vm1 = vcmp.ne.s32.totalorder %v1516_v30, %v66_v31  ;;  %vm2236_vm2 = vcmp.ne.s32.totalorder %v1516_v30, %v67_v32 }
   0xf   :  { %370 = vmatpush.bf16.msra.mxu1 %v1955_v13  ;;  %vm70_vm6 = vmpackc.low %vm2236_vm2, %vm2232_vm1  ;;  %v2070_v13 = vmov 8.0  }
  0x10   :  { %383 = vmatpush.bf16.msra.mxu2 %v1963_v15  ;;  %2056 = vrcp.f32 %v2070_v13 }
  0x11   :  { %396 = vmatpush.bf16.msra.mxu3 %v1971_v16 }
  0x12   :  { %358 = vmatpush.bf16.msra.mxu0 %v1946_v19 }
  0x13   :  { %371 = vmatpush.bf16.msra.mxu1 %v1954_v20  ;;  %v52_v36 = vld.sshfl [vmem:[#allocation1] sm:$0xff pattern:$0x73625140]  ;;  %v53_v37 = vld.sshfl [vmem:[#allocation1 + $0x8] sm:$0xff pattern:$0x73625140] }
  0x14   :  { %384 = vmatpush.bf16.msra.mxu2 %v1962_v21  ;;  %v54_v38 = vld.sshfl [vmem:[#allocation1 + $0x10] sm:$0xff pattern:$0x73625140]  ;;  %v55_v39 = vld.sshfl [vmem:[#allocation1 + $0x18] sm:$0xff pattern:$0x73625140]  ;;  %v60_v40 = vpack.c.bf16 %v53_v37, %v52_v36 }
  0x15   :  { %397 = vmatpush.bf16.msra.mxu3 %v1970_v22  ;;  %v61_v41 = vpack.c.bf16 %v55_v39, %v54_v38 }
  0x16   :  { %359 = vmatpush.bf16.msra.mxu0 %v1945_v25  ;;  %v73_v44 = vrot.slane %v60_v40, 3 }
  0x17   :  { %372 = vmatpush.bf16.msra.mxu1 %v1953_v26  ;;  %v74_v47 = vrot.slane %v61_v41, 6  ;;  %v75_v48 = vrot.slane %v61_v41, 1 }
  0x18   :  { %385 = vmatpush.bf16.msra.mxu2 %v1961_v27  ;;  %v79_v51 = vsel %vm76_vm3, %v60_v40, %v73_v44 }
  0x19   :  { %398 = vmatpush.bf16.msra.mxu3 %v1969_v28  ;;  %v83_v52 = vsel %vm80_vm4, %v74_v47, %v75_v48 }
  0x1a   :  { %360 = vmatpush.bf16.msra.mxu0 %v1944_v29  ;;  %v85_v53 = vsel %vm84_vm5, %v79_v51, %v83_v52 }
  0x1b   :  { %373 = vmatpush.bf16.msra.mxu1 %v1952_v33  ;;  %v87_v54 = vsel %vm70_vm6, %v2187_v14, %v85_v53  ;;  %v2057_v14 = vpop.eup %2056 }
  0x1c   :  { %386 = vmatpush.bf16.msra.mxu2 %v1960_v34  ;;  %153 = vst [vmem:[#allocation1] ss:$9 sm:$0xff] %v87_v54  ;;  %v430_v15 = vmul.f32 8.0, %v2057_v14  ;;  %vm434_vm7 = vweird.f32 %v2057_v14 }
  0x1d   :  { %399 = vmatpush.bf16.msra.mxu3 %v1968_v35 }
  0x1e   :  { %361 = vmatpush.bf16.msra.mxu0 %v1943_v45  ;;  %v431_v16 = vsub.f32 1.0, %v430_v15 }
  0x1f   :  { %374 = vmatpush.bf16.msra.mxu1 %v1951_v46 }
  0x20   :  { %387 = vmatpush.bf16.msra.mxu2 %v1959_v49  ;;  %v432_v18 = vmul.f32 %v2057_v14, %v431_v16 }
  0x21   :  { %400 = vmatpush.bf16.msra.mxu3 %v1967_v50 }
  0x22   :  { %v433_v19 = vadd.f32 %v2057_v14, %v432_v18 }
  0x23   :  { %v154_v55 = vld [vmem:[#allocation1] sm:$0xff]  ;;  %v155_v56 = vld [vmem:[#allocation1 + $0x9] sm:$0xff]  ;;  %v156_v57 = vld [vmem:[#allocation1 + $0x12] sm:$0xff] }
  0x24   :  { %362 = vmatmul.bf16.vlgmr.msra.gmra.mxu0 %v154_v55  ;;  %375 = vmatmul.bf16.vlgmr.msra.gmra.mxu1 %v155_v56  ;;  %v157_v58 = vld [vmem:[#allocation1 + $0x1b] sm:$0xff]  ;;  %v2267_v24 = vsel %vm434_vm7, %v2057_v14, %v433_v19 }
  0x25   :  { %388 = vmatmul.bf16.vlgmr.msra.gmra.mxu2 %v156_v57  ;;  %401 = vmatmul.bf16.vlgmr.msra.gmra.mxu3 %v157_v58  ;;  %v406_v56 = vld [vmem:[%s2875_s2] sm:$0x1] }
  0xa1   :  { %v363_v59 = vpop.f32.mrf.mxu0  ;;  %v376_v60 = vpop.f32.mrf.mxu1 }
  0xa2   :  { %v377_v61 = vadd.f32 %v376_v60, %v363_v59 }
  0xa8   :  { %v389_v62 = vpop.f32.mrf.mxu2  ;;  %v402_v63 = vpop.f32.mrf.mxu3 }
  0xa9   :  { %v390_v0 = vadd.f32 %v389_v62, %v377_v61  ;;  %v365_v1 = vpop.f32.mrf.mxu0  ;;  %v378_v2 = vpop.f32.mrf.mxu1  ;;  %v407_v62 = vld [vmem:[%s2876_s3] sm:$0x1] }
  0xaa   :  { %v1982_v1 = vld [vmem:[%s2878_s4 + $0x38] sm:$0xff]  ;;  %v1981_v2 = vld [vmem:[%s2878_s4 + $0x30] sm:$0xff] }
  0xab   :  { %v2260_v3 = vadd.f32 %v402_v63, %v390_v0  ;;  %596 = vmatpush.bf16.msrb.mxu0 %v1982_v1 }
  0xad   :  { %v408_v4 = vsel %vm84_vm5, %v2260_v3, 0.0 }
  0xae   :  { %v409_v5 = vrot.slane %v408_v4, 4 }
  0xaf   :  { %597 = vmatpush.bf16.msrb.mxu0 %v1981_v2 }
  0xb0   :  { %v410_v6 = vadd.f32 %v409_v5, %v408_v4  ;;  %v391_v7 = vpop.f32.mrf.mxu2  ;;  %v404_v8 = vpop.f32.mrf.mxu3  ;;  %v1980_v4 = vld [vmem:[%s2878_s4 + $0x28] sm:$0xff]  ;;  %v1979_v5 = vld [vmem:[%s2878_s4 + $0x20] sm:$0xff] }
  0xb1   :  { %v1977_v7 = vld [vmem:[%s2878_s4 + $0x10] sm:$0xff]  ;;  %v1976_v8 = vld [vmem:[%s2878_s4 + $0x8] sm:$0xff] }
  0xb2   :  { %v411_v9 = vrot.slane %v410_v6, 2 }
  0xb3   :  { %598 = vmatpush.bf16.msrb.mxu0 %v1980_v4 }
  0xb4   :  { %v412_v10 = vadd.f32 %v411_v9, %v410_v6  ;;  %v1978_v6 = vld [vmem:[%s2878_s4 + $0x18] sm:$0xff]  ;;  %v1975_v9 = vld [vmem:[%s2878_s4] sm:$0xff] }
  0xb6   :  { %v413_v11 = vrot.slane %v412_v10, 1 }
  0xb7   :  { %599 = vmatpush.bf16.msrb.mxu0 %v1979_v5 }
  0xb8   :  { %v414_v12 = vadd.f32 %v413_v11, %v412_v10  ;;  %v1984_v10 = vld [vmem:[%s2879_s6 + $0x8] sm:$0xff]  ;;  %v1983_v11 = vld [vmem:[%s2879_s6] sm:$0xff] }
  0xb9   :  { %636 = vmatpush.bf16.msrb.mxu1 %v1984_v10 }
  0xba   :  { %425 = vrot.lane.b32.xlu1 %v414_v12, %s2067_s1  ;;  %417 = vrot.lane.b32.xlu0 %v414_v12, %s2068_s21 }
  0xbb   :  { %600 = vmatpush.bf16.msrb.mxu0 %v1978_v6 }
  0xbd   :  { %637 = vmatpush.bf16.msrb.mxu1 %v1983_v11 }
  0xbf   :  { %601 = vmatpush.bf16.msrb.mxu0 %v1977_v7 }
  0xc2   :  { %421 = vrot.lane.b32.xlu0 %v414_v12, %s2069_s22 }
  0xc3   :  { %602 = vmatpush.bf16.msrb.mxu0 %v1976_v8 }
  0xc7   :  { %603 = vmatpush.bf16.msrb.mxu0 %v1975_v9 }
 0x12c   :  { %v418_v17 = vpop.permute.xlu0 %417  ;;  %v426_v23 = vpop.permute.xlu1 %425 }
 0x12d   :  { %v420_v20 = vadd.f32 %v418_v17, %v414_v12 }
 0x134   :  { %v422_v21 = vpop.permute.xlu0 %421 }
 0x135   :  { %v424_v22 = vadd.f32 %v422_v21, %v420_v20 }
 0x137   :  { %v428_v25 = vadd.f32 %v426_v23, %v424_v22 }
 0x139   :  { %v436_v26 = vmul.f32 %v2267_v24, %v428_v25 }
 0x13b   :  { %441 = vrot.lane.b32.xlu2 %v436_v26, %s2069_s22  ;;  %438 = vrot.lane.b32.xlu1 %v436_v26, %s2067_s1 }
 0x143   :  { %444 = vrot.lane.b32.xlu2 %v436_v26, %s2068_s21 }
 0x195   :  { %v442_v27 = vpop.permute.xlu2 %441 }
 0x19d   :  { %v445_v30 = vpop.permute.xlu2 %444 }
 0x1ad   :  { %v439_v28 = vpop.permute.xlu1 %438 }
 0x1ae   :  { %v448_v29 = vsel %vm447_vm8, %v436_v26, %v439_v28 }
 0x1af   :  { %v450_v31 = vsel %vm449_vm9, %v448_v29, %v442_v27 }
 0x1b0   :  { %v452_v32 = vsel %vm451_vm10, %v450_v31, %v445_v30 }
 0x1b1   :  { %v453_v33 = vperm.slane %v452_v32, 0  ;;  %v2055_v32 = vld [vmem:[%s2877_s5] ss:$0 sm:$0xff] }
 0x1b3   :  { %v454_v34 = vsub.f32 %v2260_v3, %v453_v33 }
 0x1b5   :  { %v455_v35 = vmul.f32 %v454_v34, %v454_v34 }
 0x1b7   :  { %v456_v36 = vsel %vm84_vm5, %v455_v35, 0.0 }
 0x1b8   :  { %v457_v37 = vrot.slane %v456_v36, 4 }
 0x1ba   :  { %v458_v38 = vadd.f32 %v457_v37, %v456_v36 }
 0x1bc   :  { %v459_v39 = vrot.slane %v458_v38, 2 }
 0x1be   :  { %v460_v40 = vadd.f32 %v459_v39, %v458_v38 }
 0x1c0   :  { %v461_v41 = vrot.slane %v460_v40, 1 }
 0x1c2   :  { %v462_v42 = vadd.f32 %v461_v41, %v460_v40 }
 0x1c4   :  { %473 = vrot.lane.b32.xlu2 %v462_v42, %s2067_s1  ;;  %469 = vrot.lane.b32.xlu1 %v462_v42, %s2069_s22 }
 0x1c5   :  { %465 = vrot.lane.b32.xlu0 %v462_v42, %s2068_s21 }
 0x21e   :  { %v474_v47 = vpop.permute.xlu2 %473 }
 0x236   :  { %v470_v45 = vpop.permute.xlu1 %469 }
 0x237   :  { %v466_v43 = vpop.permute.xlu0 %465 }
 0x238   :  { %v468_v44 = vadd.f32 %v466_v43, %v462_v42 }
 0x23a   :  { %v472_v46 = vadd.f32 %v470_v45, %v468_v44 }
 0x23c   :  { %v476_v48 = vadd.f32 %v474_v47, %v472_v46 }
 0x23e   :  { %v477_v49 = vmul.f32 %v476_v48, %v2267_v24 }
 0x240   :  { %v478_v50 = vadd.f32 1e-05, %v477_v49 }
 0x242   :  { %2058 = vrsqrt.f32 %v478_v50  ;;  %vm485_vm12 = vweird.f32 %v478_v50 }
 0x248   :  { %v2059_v51 = vpop.eup %2058 }
 0x249   :  { %v480_v52 = vmul.f32 %v2059_v51, %v478_v50  ;;  %vm486_vm11 = vweird.f32 %v2059_v51 }
 0x24a   :  { %vm487_vm13 = vmor %vm485_vm12, %vm486_vm11 }
 0x24b   :  { %v481_v53 = vmul.f32 %v2059_v51, %v480_v52 }
 0x24d   :  { %v482_v54 = vmul.f32 0.5, %v481_v53 }
 0x24f   :  { %v483_v55 = vsub.f32 1.5, %v482_v54 }
 0x251   :  { %v484_v57 = vmul.f32 %v2059_v51, %v483_v55 }
 0x253   :  { %v488_v58 = vsel %vm487_vm13, %v2059_v51, %v484_v57 }
 0x254   :  { %v489_v59 = vmul.f32 %v488_v58, %v406_v56 }
 0x256   :  { %v493_v60 = vperm.slane %v489_v59, 0  ;;  %v490_v61 = vmul.f32 %v489_v59, %v436_v26 }
 0x258   :  { %500 = vrot.lane.b32.xlu2 %v493_v60, %s2068_s21  ;;  %497 = vrot.lane.b32.xlu1 %v493_v60, %s2069_s22  ;;  %v491_v63 = vsub.f32 %v407_v62, %v490_v61 }
 0x259   :  { %494 = vrot.lane.b32.xlu0 %v493_v60, %s2067_s1 }
 0x25a   :  { %v507_v0 = vperm.slane %v491_v63, 0 }
 0x260   :  { %514 = vrot.lane.b32.xlu2 %v507_v0, %s2068_s21  ;;  %511 = vrot.lane.b32.xlu1 %v507_v0, %s2069_s22 }
 0x261   :  { %508 = vrot.lane.b32.xlu0 %v507_v0, %s2067_s1 }
 0x2b2   :  { %v501_v13 = vpop.permute.xlu2 %500 }
 0x2ba   :  { %v515_v22 = vpop.permute.xlu2 %514 }
 0x2ca   :  { %v498_v12 = vpop.permute.xlu1 %497 }
 0x2cb   :  { %v495_v14 = vpop.permute.xlu0 %494 }
 0x2cc   :  { %v503_v15 = vsel %vm447_vm8, %v489_v59, %v495_v14  ;;  %v1801_v14 = vld [vmem:[%s2880_s10 + $0xe0] sm:$0xf] }
 0x2cd   :  { %v504_v16 = vsel %vm449_vm9, %v503_v15, %v498_v12  ;;  %v2047_v15 = vld [vmem:[%s2880_s10 + $0xec] sm:$0xf0] }
 0x2ce   :  { %v505_v17 = vsel %vm451_vm10, %v504_v16, %v501_v13  ;;  %v2045_v16 = vld [vmem:[%s2880_s10 + $0xe4] sm:$0xf] }
 0x2cf   :  { %v520_v19 = vperm.slane %v505_v17, 0  ;;  %v1802_v17 = vor.u32 %v2047_v15, %v1801_v14  ;;  %v2031_v15 = vld [vmem:[%s2880_s10 + $0x6c] sm:$0xf0] }
 0x2d1   :  { %v521_v26 = vmul.f32 %v520_v19, %v2260_v3  ;;  %v2048_v19 = vld [vmem:[%s2880_s10 + $0xf4] sm:$0xf0]  ;;  %979 = vmatpush.bf16.msrb.mxu2 %v1802_v17  ;;  %v1739_v17 = vld [vmem:[%s2880_s10 + $0x70] sm:$0xf0] }
 0x2d2   :  { %v512_v18 = vpop.permute.xlu1 %511 }
 0x2d3   :  { %v509_v20 = vpop.permute.xlu0 %508 }
 0x2d4   :  { %v517_v21 = vsel %vm447_vm8, %v491_v63, %v509_v20 }
 0x2d5   :  { %v518_v23 = vsel %vm449_vm9, %v517_v21, %v512_v18  ;;  %v1803_v18 = vld [vmem:[%s2880_s10 + $0xf0] sm:$0xf0] }
 0x2d6   :  { %v519_v25 = vsel %vm451_vm10, %v518_v23, %v515_v22  ;;  %v1806_v20 = vor.u32 %v2045_v16, %v1803_v18  ;;  %v2046_v22 = vld [vmem:[%s2880_s10 + $0xec] sm:$0xf]  ;;  %v1811_v23 = vld [vmem:[%s2880_s10 + $0xf8] sm:$0xf0]  ;;  %v2029_v16 = vld [vmem:[%s2880_s10 + $0x64] sm:$0xf] }
 0x2d7   :  { %v522_v27 = vperm.slane %v519_v25, 0  ;;  %v1814_v25 = vor.u32 %v2046_v22, %v1811_v23  ;;  %v1747_v23 = vld [vmem:[%s2880_s10 + $0x78] sm:$0xf0] }
 0x2d8   :  { %992 = vmatpush.bf16.msrb.mxu3 %v1806_v20  ;;  %v2032_v20 = vld [vmem:[%s2880_s10 + $0x74] sm:$0xf0] }
 0x2d9   :  { %v2331_v28 = vadd.f32 %v522_v27, %v521_v26  ;;  %1018 = vmatpush.bf16.msra.mxu0 %v1814_v25  ;;  %v1721_v25 = vld [vmem:[%s2880_s10 + $0x40] sm:$0xf] }
 0x2db   :  { %vm524_vm14 = vcmp.ge.f32.partialorder %v2331_v28, 0.0  ;;  %v525_v29 = vmul.f32 0.2, %v2331_v28 }
 0x2dd   :  { %v526_v30 = vsel %vm524_vm14, %v2331_v28, %v525_v29 }
 0x2de   :  { %v527_v31 = vpack.c.bf16 %v526_v30, %v526_v30 }
 0x2e0   :  { %604 = vmatmul.bf16.vlgmr.msrb.gmra.mxu0 %v527_v31 }
 0x35d   :  { %v605_v33 = vpop.f32.mrf.mxu0 }
 0x35e   :  { %v606_v34 = vadd.f32 %v2055_v32, %v605_v33  ;;  %v643_v32 = vld [vmem:[%s2881_s7] sm:$0x1] }
 0x360   :  { %v609_v35 = vmax.f32 %v606_v34, 0.0 }
 0x362   :  { %v610_v36 = vpack.c.bf16 %v609_v35, %v609_v35 }
 0x364   :  { %1686 = vmatmul.msk.bf16.vlgmr.msrb.gmra.mxu1 %vm447_vm8, %v610_v36 }
 0x365   :  { %v607_v3 = vpop.f32.mrf.mxu0 }
 0x3e1   :  { %v2340_v37 = vpop.f32.mrf.mxu1 }
 0x3e2   :  { %v645_v38 = vsel %vm84_vm5, %v2340_v37, 0.0 }
 0x3e3   :  { %v646_v39 = vrot.slane %v645_v38, 4 }
 0x3e5   :  { %v647_v40 = vadd.f32 %v646_v39, %v645_v38  ;;  %v644_v38 = vld [vmem:[%s2882_s8] sm:$0x1] }
 0x3e7   :  { %v648_v41 = vrot.slane %v647_v40, 2 }
 0x3e9   :  { %v649_v42 = vadd.f32 %v648_v41, %v647_v40  ;;  %v641_v43 = vpop.f32.mrf.mxu1  ;;  %v1785_v41 = vld [vmem:[%s2880_s10 + $0xc0] sm:$0xf] }
 0x3ea   :  { %v2041_v43 = vld [vmem:[%s2880_s10 + $0xc4] sm:$0xf] }
 0x3eb   :  { %v650_v44 = vrot.slane %v649_v42, 1 }
 0x3ed   :  { %v651_v45 = vadd.f32 %v650_v44, %v649_v42  ;;  %v2043_v42 = vld [vmem:[%s2880_s10 + $0xcc] sm:$0xf0] }
 0x3ee   :  { %v1786_v44 = vor.u32 %v2043_v42, %v1785_v41  ;;  %v2023_v41 = vld [vmem:[%s2880_s10 + $0x2c] sm:$0xf0]  ;;  %v2021_v42 = vld [vmem:[%s2880_s10 + $0x24] sm:$0xf] }
 0x3ef   :  { %662 = vrot.lane.b32.xlu2 %v651_v45, %s2067_s1  ;;  %658 = vrot.lane.b32.xlu1 %v651_v45, %s2069_s22 }
 0x3f0   :  { %654 = vrot.lane.b32.xlu0 %v651_v45, %s2068_s21  ;;  %980 = vmatpush.bf16.msrb.mxu2 %v1786_v44  ;;  %v1707_v44 = vld [vmem:[%s2880_s10 + $0x30] sm:$0xf0] }
 0x449   :  { %v663_v50 = vpop.permute.xlu2 %662 }
 0x461   :  { %v659_v48 = vpop.permute.xlu1 %658 }
 0x462   :  { %v655_v46 = vpop.permute.xlu0 %654 }
 0x463   :  { %v657_v47 = vadd.f32 %v655_v46, %v651_v45  ;;  %v1787_v45 = vld [vmem:[%s2880_s10 + $0xd0] sm:$0xf0]  ;;  %v1793_v46 = vld [vmem:[%s2880_s10 + $0xc8] sm:$0xf] }
 0x465   :  { %v661_v49 = vadd.f32 %v659_v48, %v657_v47  ;;  %v2044_v47 = vld [vmem:[%s2880_s10 + $0xd4] sm:$0xf0]  ;;  %v1790_v48 = vor.u32 %v2041_v43, %v1787_v45  ;;  %v1713_v45 = vld [vmem:[%s2880_s10 + $0x28] sm:$0xf] }
 0x467   :  { %v665_v51 = vadd.f32 %v663_v50, %v661_v49  ;;  %v1794_v49 = vor.u32 %v2044_v47, %v1793_v46  ;;  %v2042_v50 = vld [vmem:[%s2880_s10 + $0xcc] sm:$0xf]  ;;  %993 = vmatpush.bf16.msrb.mxu3 %v1790_v48  ;;  %v2024_v46 = vld [vmem:[%s2880_s10 + $0x34] sm:$0xf0]  ;;  %v1715_v48 = vld [vmem:[%s2880_s10 + $0x38] sm:$0xf0] }
 0x468   :  { %v2022_v47 = vld [vmem:[%s2880_s10 + $0x2c] sm:$0xf] }
 0x469   :  { %v2348_v52 = vmul.f32 %v665_v51, %v2267_v24  ;;  %v1795_v51 = vld [vmem:[%s2880_s10 + $0xd8] sm:$0xf0] }
 0x46b   :  { %674 = vrot.lane.b32.xlu2 %v2348_v52, %s2068_s21  ;;  %671 = vrot.lane.b32.xlu1 %v2348_v52, %s2069_s22 }
 0x46c   :  { %668 = vrot.lane.b32.xlu0 %v2348_v52, %s2067_s1 }
 0x4c5   :  { %v675_v56 = vpop.permute.xlu2 %674 }
 0x4dd   :  { %v672_v53 = vpop.permute.xlu1 %671 }
 0x4de   :  { %v669_v54 = vpop.permute.xlu0 %668 }
 0x4df   :  { %v677_v55 = vsel %vm447_vm8, %v2348_v52, %v669_v54  ;;  %v2039_v54 = vld [vmem:[%s2880_s10 + $0xac] sm:$0xf0] }
 0x4e0   :  { %v678_v57 = vsel %vm449_vm9, %v677_v55, %v672_v53  ;;  %v1798_v53 = vor.u32 %v2042_v50, %v1795_v51  ;;  %v2037_v55 = vld [vmem:[%s2880_s10 + $0xa4] sm:$0xf]  ;;  %v1710_v50 = vor.u32 %v2021_v42, %v1707_v44  ;;  %v1714_v51 = vor.u32 %v2024_v46, %v1713_v45  ;;  %v2003_v42 = vld [vmem:[%s2883_s9 + $0x8c] sm:$0xf0]  ;;  %v1883_v44 = vld [vmem:[%s2883_s9 + $0x90] sm:$0xf0] }
 0x4e1   :  { %v679_v58 = vsel %vm451_vm10, %v678_v57, %v675_v56  ;;  %v1771_v56 = vld [vmem:[%s2880_s10 + $0xb0] sm:$0xf0]  ;;  %v1889_v45 = vld [vmem:[%s2883_s9 + $0x88] sm:$0xf]  ;;  %v2004_v46 = vld [vmem:[%s2883_s9 + $0x94] sm:$0xf0] }
 0x4e2   :  { %v680_v59 = vperm.slane %v679_v58, 0  ;;  %v1774_v58 = vor.u32 %v2037_v55, %v1771_v56  ;;  %1019 = vmatpush.bf16.msra.mxu0 %v1798_v53  ;;  %v1689_v53 = vld [vmem:[%s2880_s10] sm:$0xf]  ;;  %v2017_v55 = vld [vmem:[%s2880_s10 + $0x4] sm:$0xf] }
 0x4e4   :  { %v681_v60 = vsub.f32 %v2340_v37, %v680_v59  ;;  %v1777_v59 = vld [vmem:[%s2880_s10 + $0xa8] sm:$0xf]  ;;  %994 = vmatpush.bf16.msrb.mxu3 %v1774_v58 }
 0x4e5   :  { %v1697_v58 = vld [vmem:[%s2880_s10 + $0x8] sm:$0xf] }
 0x4e6   :  { %v682_v61 = vmul.f32 %v681_v60, %v681_v60  ;;  %v2040_v60 = vld [vmem:[%s2880_s10 + $0xb4] sm:$0xf0] }
 0x4e8   :  { %v683_v62 = vsel %vm84_vm5, %v682_v61, 0.0  ;;  %v2038_v61 = vld [vmem:[%s2880_s10 + $0xac] sm:$0xf] }
 0x4e9   :  { %v684_v63 = vrot.slane %v683_v62, 4 }
 0x4eb   :  { %v685_v0 = vadd.f32 %v684_v63, %v683_v62  ;;  %v1778_v62 = vor.u32 %v2040_v60, %v1777_v59  ;;  %v1779_v63 = vld [vmem:[%s2880_s10 + $0xb8] sm:$0xf0]  ;;  %v2020_v59 = vld [vmem:[%s2880_s10 + $0x14] sm:$0xf0] }
 0x4ed   :  { %v686_v1 = vrot.slane %v685_v0, 2 }
 0x4ef   :  { %v687_v2 = vadd.f32 %v686_v1, %v685_v0  ;;  %v1782_v0 = vor.u32 %v2038_v61, %v1779_v63  ;;  %v1753_v1 = vld [vmem:[%s2880_s10 + $0x80] sm:$0xf]  ;;  %v1698_v61 = vor.u32 %v2020_v59, %v1697_v58  ;;  %v1699_v63 = vld [vmem:[%s2880_s10 + $0x18] sm:$0xf0]  ;;  %v1873_v58 = vld [vmem:[%s2883_s9 + $0x68] sm:$0xf] }
 0x4f0   :  { %v2000_v59 = vld [vmem:[%s2883_s9 + $0x74] sm:$0xf0] }
 0x4f1   :  { %v688_v4 = vrot.slane %v687_v2, 1  ;;  %1020 = vmatpush.bf16.msra.mxu0 %v1782_v0  ;;  %v1929_v0 = vld [vmem:[%s2883_s9 + $0xe0] sm:$0xf] }
 0x4f3   :  { %v689_v5 = vadd.f32 %v688_v4, %v687_v2  ;;  %v2035_v2 = vld [vmem:[%s2880_s10 + $0x8c] sm:$0xf0]  ;;  %v2033_v4 = vld [vmem:[%s2880_s10 + $0x84] sm:$0xf] }
 0x4f5   :  { %700 = vrot.lane.b32.xlu2 %v689_v5, %s2067_s1  ;;  %696 = vrot.lane.b32.xlu1 %v689_v5, %s2069_s22 }
 0x4f6   :  { %692 = vrot.lane.b32.xlu0 %v689_v5, %s2068_s21 }
 0x54f   :  { %v701_v10 = vpop.permute.xlu2 %700 }
 0x567   :  { %v697_v8 = vpop.permute.xlu1 %696 }
 0x568   :  { %v693_v6 = vpop.permute.xlu0 %692 }
 0x569   :  { %v695_v7 = vadd.f32 %v693_v6, %v689_v5  ;;  %v1754_v5 = vor.u32 %v2035_v2, %v1753_v1  ;;  %v1755_v6 = vld [vmem:[%s2880_s10 + $0x90] sm:$0xf0]  ;;  %v2015_v2 = vld [vmem:[%s2883_s9 + $0xec] sm:$0xf0] }
 0x56b   :  { %v699_v9 = vadd.f32 %v697_v8, %v695_v7  ;;  %v1761_v7 = vld [vmem:[%s2880_s10 + $0x88] sm:$0xf]  ;;  %v2036_v8 = vld [vmem:[%s2880_s10 + $0x94] sm:$0xf0] }
 0x56d   :  { %v703_v11 = vadd.f32 %v701_v10, %v699_v9  ;;  %v1758_v9 = vor.u32 %v2033_v4, %v1755_v6  ;;  %v1762_v10 = vor.u32 %v2036_v8, %v1761_v7  ;;  %v2013_v4 = vld [vmem:[%s2883_s9 + $0xe4] sm:$0xf]  ;;  %v1930_v6 = vor.u32 %v2015_v2, %v1929_v0  ;;  %v1937_v8 = vld [vmem:[%s2883_s9 + $0xe8] sm:$0xf]  ;;  %v1849_v0 = vld [vmem:[%s2883_s9 + $0x40] sm:$0xf] }
 0x56e   :  { %v1995_v2 = vld [vmem:[%s2883_s9 + $0x4c] sm:$0xf0] }
 0x56f   :  { %v704_v12 = vmul.f32 %v703_v11, %v2267_v24  ;;  %v1809_v24 = vld [vmem:[%s2880_s10 + $0xe8] sm:$0xf]  ;;  %v2034_v11 = vld [vmem:[%s2880_s10 + $0x8c] sm:$0xf]  ;;  %995 = vmatpush.bf16.msrb.mxu3 %v1758_v9  ;;  %v2016_v9 = vld [vmem:[%s2883_s9 + $0xf4] sm:$0xf0] }
 0x570   :  { %v1810_v21 = vor.u32 %v2048_v19, %v1809_v24  ;;  %v1742_v24 = vor.u32 %v2029_v16, %v1739_v17  ;;  %v1745_v19 = vld [vmem:[%s2880_s10 + $0x68] sm:$0xf]  ;;  %v2009_v17 = vld [vmem:[%s2883_s9 + $0xc4] sm:$0xf] }
 0x571   :  { %v705_v13 = vadd.f32 1e-05, %v704_v12  ;;  %v1763_v12 = vld [vmem:[%s2880_s10 + $0x98] sm:$0xf0]  ;;  %v1746_v22 = vor.u32 %v2032_v20, %v1745_v19  ;;  %v2012_v20 = vld [vmem:[%s2883_s9 + $0xd4] sm:$0xf0] }
 0x572   :  { %1005 = vmatpush.bf16.msra.mxu1 %v1810_v21  ;;  %v1766_v14 = vor.u32 %v2034_v11, %v1763_v12  ;;  %v2030_v21 = vld [vmem:[%s2880_s10 + $0x6c] sm:$0xf]  ;;  %v1938_v11 = vor.u32 %v2016_v9, %v1937_v8  ;;  %v1939_v12 = vld [vmem:[%s2883_s9 + $0xf8] sm:$0xf0]  ;;  %v1857_v8 = vld [vmem:[%s2883_s9 + $0x48] sm:$0xf] }
 0x573   :  { %2060 = vrsqrt.f32 %v705_v13  ;;  %vm712_vm0 = vweird.f32 %v705_v13  ;;  %996 = vmatpush.bf16.msrb.mxu3 %v1742_v24  ;;  %v1921_v24 = vld [vmem:[%s2883_s9 + $0xc8] sm:$0xf]  ;;  %v1996_v9 = vld [vmem:[%s2883_s9 + $0x54] sm:$0xf0] }
 0x574   :  { %1021 = vmatpush.bf16.msra.mxu0 %v1766_v14  ;;  %v2011_v14 = vld [vmem:[%s2883_s9 + $0xcc] sm:$0xf0] }
 0x576   :  { %1006 = vmatpush.bf16.msra.mxu1 %v1794_v49 }
 0x579   :  { %v2061_v26 = vpop.eup %2060 }
 0x57a   :  { %v707_v27 = vmul.f32 %v2061_v26, %v705_v13  ;;  %vm713_vm15 = vweird.f32 %v2061_v26  ;;  %1007 = vmatpush.bf16.msra.mxu1 %v1778_v62  ;;  %v1737_v13 = vld [vmem:[%s2880_s10 + $0x60] sm:$0xf]  ;;  %v2018_v62 = vld [vmem:[%s2880_s10 + $0xc] sm:$0xf] }
 0x57b   :  { %vm714_vm1 = vmor %vm712_vm0, %vm713_vm15  ;;  %v1738_v18 = vor.u32 %v2031_v15, %v1737_v13  ;;  %v1702_v1 = vor.u32 %v2018_v62, %v1699_v63  ;;  %v1913_v13 = vld [vmem:[%s2883_s9 + $0xc0] sm:$0xf]  ;;  %v1998_v62 = vld [vmem:[%s2883_s9 + $0x6c] sm:$0xf] }
 0x57c   :  { %v708_v29 = vmul.f32 %v2061_v26, %v707_v27  ;;  %v1750_v27 = vor.u32 %v2030_v21, %v1747_v23  ;;  %v1914_v16 = vor.u32 %v2011_v14, %v1913_v13  ;;  %v2010_v21 = vld [vmem:[%s2883_s9 + $0xcc] sm:$0xf]  ;;  %v1922_v23 = vor.u32 %v2012_v20, %v1921_v24  ;;  %v1875_v63 = vld [vmem:[%s2883_s9 + $0x78] sm:$0xf0]  ;;  %v1833_v13 = vld [vmem:[%s2883_s9 + $0x20] sm:$0xf] }
 0x57d   :  { %v1991_v14 = vld [vmem:[%s2883_s9 + $0x2c] sm:$0xf0]  ;;  %v1992_v24 = vld [vmem:[%s2883_s9 + $0x34] sm:$0xf0]  ;;  %v1843_v20 = vld [vmem:[%s2883_s9 + $0x38] sm:$0xf0] }
 0x57e   :  { %v709_v30 = vmul.f32 0.5, %v708_v29  ;;  %1008 = vmatpush.bf16.msra.mxu1 %v1762_v10  ;;  %v2025_v29 = vld [vmem:[%s2880_s10 + $0x44] sm:$0xf]  ;;  %1022 = vmatpush.bf16.msra.mxu0 %v1750_v27  ;;  %v2014_v10 = vld [vmem:[%s2883_s9 + $0xec] sm:$0xf] }
 0x57f   :  { %v1942_v15 = vor.u32 %v2014_v10, %v1939_v12  ;;  %v2007_v27 = vld [vmem:[%s2883_s9 + $0xac] sm:$0xf0]  ;;  %v1994_v10 = vld [vmem:[%s2883_s9 + $0x4c] sm:$0xf]  ;;  %v1859_v12 = vld [vmem:[%s2883_s9 + $0x58] sm:$0xf0] }
 0x580   :  { %v710_v31 = vsub.f32 1.5, %v709_v30  ;;  %v1723_v30 = vld [vmem:[%s2880_s10 + $0x50] sm:$0xf0] }
 0x582   :  { %v711_v33 = vmul.f32 %v2061_v26, %v710_v31  ;;  %v1729_v31 = vld [vmem:[%s2880_s10 + $0x48] sm:$0xf]  ;;  %1009 = vmatpush.bf16.msra.mxu1 %v1746_v22  ;;  %v1923_v22 = vld [vmem:[%s2883_s9 + $0xd8] sm:$0xf0] }
 0x584   :  { %v715_v34 = vsel %vm714_vm1, %v2061_v26, %v711_v33  ;;  %v2027_v26 = vld [vmem:[%s2880_s10 + $0x4c] sm:$0xf0]  ;;  %v2028_v33 = vld [vmem:[%s2880_s10 + $0x54] sm:$0xf0] }
 0x585   :  { %v2393_v35 = vmul.f32 %v715_v34, %v643_v32  ;;  %v1722_v32 = vor.u32 %v2027_v26, %v1721_v25  ;;  %v2026_v34 = vld [vmem:[%s2880_s10 + $0x4c] sm:$0xf]  ;;  %v1926_v25 = vor.u32 %v2010_v21, %v1923_v22  ;;  %v1897_v26 = vld [vmem:[%s2883_s9 + $0xa0] sm:$0xf]  ;;  %v1834_v21 = vor.u32 %v1991_v14, %v1833_v13 }
 0x587   :  { %v720_v36 = vperm.slane %v2393_v35, 0  ;;  %v717_v3 = vmul.f32 %v2393_v35, %v2348_v52  ;;  %v1769_v52 = vld [vmem:[%s2880_s10 + $0xa0] sm:$0xf] }
 0x588   :  { %v1770_v57 = vor.u32 %v2039_v54, %v1769_v52  ;;  %v1718_v52 = vor.u32 %v2022_v47, %v1715_v48  ;;  %v2019_v54 = vld [vmem:[%s2880_s10 + $0xc] sm:$0xf0]  ;;  %v2002_v47 = vld [vmem:[%s2883_s9 + $0x8c] sm:$0xf] }
 0x589   :  { %727 = vrot.lane.b32.xlu2 %v720_v36, %s2068_s21  ;;  %724 = vrot.lane.b32.xlu1 %v720_v36, %s2069_s22  ;;  %v2404_v39 = vsub.f32 %v644_v38, %v717_v3  ;;  %v1726_v3 = vor.u32 %v2025_v29, %v1723_v30  ;;  %v1730_v38 = vor.u32 %v2028_v33, %v1729_v31  ;;  %v2005_v29 = vld [vmem:[%s2883_s9 + $0xa4] sm:$0xf]  ;;  %v1899_v31 = vld [vmem:[%s2883_s9 + $0xb0] sm:$0xf0] }
 0x58a   :  { %721 = vrot.lane.b32.xlu0 %v720_v36, %s2067_s1  ;;  %981 = vmatpush.bf16.msrb.mxu2 %v1770_v57  ;;  %v1731_v36 = vld [vmem:[%s2880_s10 + $0x58] sm:$0xf0]  ;;  %v1690_v56 = vor.u32 %v2019_v54, %v1689_v53  ;;  %v1691_v57 = vld [vmem:[%s2880_s10 + $0x10] sm:$0xf0]  ;;  %v1898_v30 = vor.u32 %v2007_v27, %v1897_v26  ;;  %v2008_v33 = vld [vmem:[%s2883_s9 + $0xb4] sm:$0xf0] }
 0x58b   :  { %v734_v40 = vperm.slane %v2404_v39, 0  ;;  %v1734_v43 = vor.u32 %v2026_v34, %v1731_v36  ;;  %997 = vmatpush.bf16.msrb.mxu3 %v1726_v3  ;;  %1010 = vmatpush.bf16.msra.mxu1 %v1730_v38  ;;  %v1694_v60 = vor.u32 %v2017_v55, %v1691_v57  ;;  %v1902_v34 = vor.u32 %v2005_v29, %v1899_v31  ;;  %v2006_v3 = vld [vmem:[%s2883_s9 + $0xac] sm:$0xf]  ;;  %v1907_v38 = vld [vmem:[%s2883_s9 + $0xb8] sm:$0xf0] }
 0x58c   :  { %v1865_v53 = vld [vmem:[%s2883_s9 + $0x60] sm:$0xf]  ;;  %v1999_v54 = vld [vmem:[%s2883_s9 + $0x6c] sm:$0xf0]  ;;  %v1997_v55 = vld [vmem:[%s2883_s9 + $0x64] sm:$0xf] }
 0x58d   :  { %1023 = vmatpush.bf16.msra.mxu0 %v1734_v43  ;;  %v2001_v43 = vld [vmem:[%s2883_s9 + $0x84] sm:$0xf]  ;;  %v1867_v57 = vld [vmem:[%s2883_s9 + $0x70] sm:$0xf0]  ;;  %v1987_v26 = vld [vmem:[%s2883_s9 + $0xc] sm:$0xf0] }
 0x58e   :  { %982 = vmatpush.bf16.msrb.mxu2 %v1754_v5  ;;  %v1931_v5 = vld [vmem:[%s2883_s9 + $0xf0] sm:$0xf0]  ;;  %v1985_v27 = vld [vmem:[%s2883_s9 + $0x4] sm:$0xf]  ;;  %v1825_v31 = vld [vmem:[%s2883_s9 + $0x8] sm:$0xf] }
 0x58f   :  { %998 = vmatpush.bf16.msrb.mxu3 %v1710_v50  ;;  %1011 = vmatpush.bf16.msra.mxu1 %v1714_v51  ;;  %v1934_v7 = vor.u32 %v2013_v4, %v1931_v5  ;;  %v1891_v50 = vld [vmem:[%s2883_s9 + $0x98] sm:$0xf0]  ;;  %v1890_v51 = vor.u32 %v2004_v46, %v1889_v45  ;;  %v1993_v4 = vld [vmem:[%s2883_s9 + $0x44] sm:$0xf]  ;;  %v1851_v5 = vld [vmem:[%s2883_s9 + $0x50] sm:$0xf0] }
 0x590   :  { %v1819_v29 = vld [vmem:[%s2883_s9 + $0x10] sm:$0xf0] }
 0x591   :  { %741 = vrot.lane.b32.xlu2 %v734_v40, %s2068_s21  ;;  %738 = vrot.lane.b32.xlu1 %v734_v40, %s2069_s22 }
 0x592   :  { %735 = vrot.lane.b32.xlu0 %v734_v40, %s2067_s1  ;;  %983 = vmatpush.bf16.msrb.mxu2 %v1738_v18  ;;  %v1705_v40 = vld [vmem:[%s2880_s10 + $0x20] sm:$0xf]  ;;  %v1915_v18 = vld [vmem:[%s2883_s9 + $0xd0] sm:$0xf0] }
 0x593   :  { %v1706_v49 = vor.u32 %v2023_v41, %v1705_v40  ;;  %1024 = vmatpush.bf16.msra.mxu0 %v1718_v52  ;;  %999 = vmatpush.bf16.msrb.mxu3 %v1694_v60  ;;  %v1918_v19 = vor.u32 %v2009_v17, %v1915_v18  ;;  %v1881_v40 = vld [vmem:[%s2883_s9 + $0x80] sm:$0xf]  ;;  %v1910_v41 = vor.u32 %v2006_v3, %v1907_v38  ;;  %v1835_v17 = vld [vmem:[%s2883_s9 + $0x30] sm:$0xf0]  ;;  %v1841_v18 = vld [vmem:[%s2883_s9 + $0x28] sm:$0xf] }
 0x594   :  { %1012 = vmatpush.bf16.msra.mxu1 %v1698_v61  ;;  %v1882_v48 = vor.u32 %v2003_v42, %v1881_v40  ;;  %v1894_v52 = vor.u32 %v2002_v47, %v1891_v50  ;;  %v1870_v60 = vor.u32 %v1997_v55, %v1867_v57  ;;  %v1874_v61 = vor.u32 %v2000_v59, %v1873_v58 }
 0x595   :  { %v1822_v38 = vor.u32 %v1985_v27, %v1819_v29  ;;  %v751_v58 = vmax.f32 %v2331_v28, 0.0 }
 0x596   :  { %984 = vmatpush.bf16.msrb.mxu2 %v1722_v32  ;;  %v1905_v32 = vld [vmem:[%s2883_s9 + $0xa8] sm:$0xf] }
 0x597   :  { %1025 = vmatpush.bf16.msra.mxu0 %v1702_v1  ;;  %1204 = vmatpush.bf16.msra.mxu3 %v1934_v7  ;;  %v1906_v36 = vor.u32 %v2008_v33, %v1905_v32  ;;  %v1878_v1 = vor.u32 %v1998_v62, %v1875_v63  ;;  %v1854_v7 = vor.u32 %v1993_v4, %v1851_v5  ;;  %v1988_v32 = vld [vmem:[%s2883_s9 + $0x14] sm:$0xf0]  ;;  %v1986_v33 = vld [vmem:[%s2883_s9 + $0xc] sm:$0xf] }
 0x598   :  { %1217 = vmatpush.bf16.msrb.mxu1 %v1938_v11  ;;  %v1858_v11 = vor.u32 %v1996_v9, %v1857_v8  ;;  %v1826_v42 = vor.u32 %v1988_v32, %v1825_v31  ;;  %v752_v59 = vpack.c.bf16 %v751_v58, %v751_v58 }
 0x59a   :  { %985 = vmatpush.bf16.msrb.mxu2 %v1706_v49  ;;  %v1886_v49 = vor.u32 %v2001_v43, %v1883_v44 }
 0x59b   :  { %1230 = vmatpush.bf16.msrb.mxu0 %v1942_v15  ;;  %1205 = vmatpush.bf16.msra.mxu3 %v1918_v19  ;;  %v1862_v15 = vor.u32 %v1994_v10, %v1859_v12  ;;  %v1990_v19 = vld [vmem:[%s2883_s9 + $0x2c] sm:$0xf] }
 0x59c   :  { %1218 = vmatpush.bf16.msrb.mxu1 %v1922_v23  ;;  %v1817_v23 = vld [vmem:[%s2883_s9] sm:$0xf] }
 0x59d   :  { %v1818_v3 = vor.u32 %v1987_v26, %v1817_v23 }
 0x59e   :  { %986 = vmatpush.bf16.msrb.mxu2 %v1690_v56  ;;  %v1866_v56 = vor.u32 %v1999_v54, %v1865_v53 }
 0x59f   :  { %1231 = vmatpush.bf16.msrb.mxu0 %v1926_v25  ;;  %1206 = vmatpush.bf16.msra.mxu3 %v1902_v34  ;;  %v1842_v25 = vor.u32 %v1992_v24, %v1841_v18  ;;  %v1827_v34 = vld [vmem:[%s2883_s9 + $0x18] sm:$0xf0] }
 0x5a0   :  { %1219 = vmatpush.bf16.msrb.mxu1 %v1906_v36  ;;  %v1830_v44 = vor.u32 %v1986_v33, %v1827_v34 }
 0x5a2   :  { %1191 = vmatpush.bf16.msra.mxu2 %v1930_v6  ;;  %v1850_v6 = vor.u32 %v1995_v2, %v1849_v0 }
 0x5a3   :  { %1232 = vmatpush.bf16.msrb.mxu0 %v1910_v41  ;;  %1207 = vmatpush.bf16.msra.mxu3 %v1886_v49 }
 0x5a4   :  { %1220 = vmatpush.bf16.msrb.mxu1 %v1890_v51 }
 0x5a6   :  { %1192 = vmatpush.bf16.msra.mxu2 %v1914_v16  ;;  %v1989_v16 = vld [vmem:[%s2883_s9 + $0x24] sm:$0xf] }
 0x5a7   :  { %1233 = vmatpush.bf16.msrb.mxu0 %v1894_v52  ;;  %1208 = vmatpush.bf16.msra.mxu3 %v1870_v60  ;;  %v1838_v22 = vor.u32 %v1989_v16, %v1835_v17 }
 0x5a8   :  { %1221 = vmatpush.bf16.msrb.mxu1 %v1874_v61 }
 0x5aa   :  { %1193 = vmatpush.bf16.msra.mxu2 %v1898_v30  ;;  %v1846_v30 = vor.u32 %v1990_v19, %v1843_v20 }
 0x5ab   :  { %1234 = vmatpush.bf16.msrb.mxu0 %v1878_v1  ;;  %1209 = vmatpush.bf16.msra.mxu3 %v1854_v7 }
 0x5ac   :  { %1222 = vmatpush.bf16.msrb.mxu1 %v1858_v11 }
 0x5ae   :  { %1194 = vmatpush.bf16.msra.mxu2 %v1882_v48 }
 0x5af   :  { %1235 = vmatpush.bf16.msrb.mxu0 %v1862_v15  ;;  %1210 = vmatpush.bf16.msra.mxu3 %v1838_v22 }
 0x5b0   :  { %1223 = vmatpush.bf16.msrb.mxu1 %v1842_v25 }
 0x5b2   :  { %1195 = vmatpush.bf16.msra.mxu2 %v1866_v56 }
 0x5b3   :  { %1236 = vmatpush.bf16.msrb.mxu0 %v1846_v30  ;;  %1211 = vmatpush.bf16.msra.mxu3 %v1822_v38 }
 0x5b4   :  { %1224 = vmatpush.bf16.msrb.mxu1 %v1826_v42 }
 0x5b6   :  { %1196 = vmatpush.bf16.msra.mxu2 %v1850_v6 }
 0x5b7   :  { %1237 = vmatpush.bf16.msrb.mxu0 %v1830_v44 }
 0x5ba   :  { %1197 = vmatpush.bf16.msra.mxu2 %v1834_v21 }
 0x5be   :  { %1198 = vmatpush.bf16.msra.mxu2 %v1818_v3 }
 0x5e3   :  { %v728_v40 = vpop.permute.xlu2 %727 }
 0x5eb   :  { %v742_v51 = vpop.permute.xlu2 %741 }
 0x5fb   :  { %v725_v36 = vpop.permute.xlu1 %724 }
 0x5fc   :  { %v722_v41 = vpop.permute.xlu0 %721 }
 0x5fd   :  { %v730_v43 = vsel %vm447_vm8, %v2393_v35, %v722_v41 }
 0x5fe   :  { %v731_v45 = vsel %vm449_vm9, %v730_v43, %v725_v36 }
 0x5ff   :  { %v732_v46 = vsel %vm451_vm10, %v731_v45, %v728_v40 }
 0x600   :  { %v747_v48 = vperm.slane %v732_v46, 0 }
 0x602   :  { %v748_v53 = vmul.f32 %v747_v48, %v2340_v37 }
 0x603   :  { %v739_v47 = vpop.permute.xlu1 %738 }
 0x604   :  { %v736_v49 = vpop.permute.xlu0 %735 }
 0x605   :  { %v744_v50 = vsel %vm447_vm8, %v2404_v39, %v736_v49 }
 0x606   :  { %v745_v52 = vsel %vm449_vm9, %v744_v50, %v739_v47  ;;  %v2071_v50 = vmov 32.0  }
 0x607   :  { %v746_v35 = vsel %vm451_vm10, %v745_v52, %v742_v51  ;;  %2062 = vrcp.f32 %v2071_v50 }
 0x608   :  { %v749_v54 = vperm.slane %v746_v35, 0 }
 0x60a   :  { %v750_v55 = vadd.f32 %v749_v54, %v748_v53 }
 0x60c   :  { %v785_v56 = vmax.f32 %v750_v55, 0.0 }
 0x60d   :  { %v2063_v55 = vpop.eup %2062 }
 0x60e   :  { %v786_v57 = vpack.c.bf16 %v785_v56, %v785_v56  ;;  %v1330_v58 = vmul.f32 32.0, %v2063_v55  ;;  %vm1334_vm2 = vweird.f32 %v2063_v55 }
 0x610   :  { %987 = vmatmul.bf16.vlgmr.msrb.gmra.mxu2 %v786_v57  ;;  %1000 = vmatmul.bf16.vlgmr.msrb.gmra.mxu3 %v786_v57 }
 0x611   :  { %1013 = vmatmul.bf16.vlgmr.msra.gmra.mxu1 %v786_v57  ;;  %1026 = vmatmul.bf16.vlgmr.msra.gmra.mxu0 %v786_v57 }
 0x620   :  { %1199 = vmatmul.bf16.vlgmr.msra.gmra.mxu2 %v752_v59  ;;  %1212 = vmatmul.bf16.vlgmr.msra.gmra.mxu3 %v752_v59 }
 0x621   :  { %1225 = vmatmul.bf16.vlgmr.msrb.gmra.mxu1 %v752_v59  ;;  %1238 = vmatmul.bf16.vlgmr.msrb.gmra.mxu0 %v752_v59 }
 0x68e   :  { %v1014_v39 = vpop.f32.mrf.mxu1  ;;  %v1027_v60 = vpop.f32.mrf.mxu0 }
 0x693   :  { %v988_v61 = vpop.f32.mrf.mxu2  ;;  %v1001_v62 = vpop.f32.mrf.mxu3 }
 0x696   :  { %v1016_v37 = vpop.f32.mrf.mxu1  ;;  %v1029_v63 = vpop.f32.mrf.mxu0 }
 0x69b   :  { %v990_v0 = vpop.f32.mrf.mxu2  ;;  %v1003_v1 = vpop.f32.mrf.mxu3 }
 0x69e   :  { %v1226_v2 = vpop.f32.mrf.mxu1  ;;  %v1239_v4 = vpop.f32.mrf.mxu0 }
 0x69f   :  { %v2784_v8 = vadd.f32 %v1226_v2, %v1014_v39  ;;  %v2792_v23 = vadd.f32 %v1239_v4, %v1027_v60 }
 0x6a1   :  { %v1259_v17 = vsel %vm84_vm5, %v2784_v8, 0.0  ;;  %v1266_v30 = vsel %vm84_vm5, %v2792_v23, 0.0 }
 0x6a2   :  { %v1260_v20 = vrot.slane %v1259_v17, 4  ;;  %v1267_v32 = vrot.slane %v1266_v30, 4 }
 0x6a3   :  { %v1200_v5 = vpop.f32.mrf.mxu2  ;;  %v1213_v6 = vpop.f32.mrf.mxu3 }
 0x6a4   :  { %v2780_v7 = vadd.f32 %v1200_v5, %v988_v61  ;;  %v2782_v28 = vadd.f32 %v1213_v6, %v1001_v62  ;;  %v1261_v26 = vadd.f32 %v1260_v20, %v1259_v17  ;;  %v1268_v36 = vadd.f32 %v1267_v32, %v1266_v30 }
 0x6a5   :  { %v1331_v62 = vsub.f32 1.0, %v1330_v58 }
 0x6a6   :  { %v1245_v9 = vsel %vm84_vm5, %v2780_v7, 0.0  ;;  %v1252_v10 = vsel %vm84_vm5, %v2782_v28, 0.0  ;;  %v1228_v11 = vpop.f32.mrf.mxu1  ;;  %v1241_v12 = vpop.f32.mrf.mxu0  ;;  %v1262_v31 = vrot.slane %v1261_v26, 2  ;;  %v1269_v38 = vrot.slane %v1268_v36, 2 }
 0x6a7   :  { %v1246_v13 = vrot.slane %v1245_v9, 4  ;;  %v1253_v14 = vrot.slane %v1252_v10, 4  ;;  %v1332_v1 = vmul.f32 %v2063_v55, %v1331_v62 }
 0x6a8   :  { %v1263_v34 = vadd.f32 %v1262_v31, %v1261_v26  ;;  %v1270_v41 = vadd.f32 %v1269_v38, %v1268_v36 }
 0x6a9   :  { %v1247_v15 = vadd.f32 %v1246_v13, %v1245_v9  ;;  %v1254_v16 = vadd.f32 %v1253_v14, %v1252_v10  ;;  %v1333_v5 = vadd.f32 %v2063_v55, %v1332_v1 }
 0x6aa   :  { %v1264_v40 = vrot.slane %v1263_v34, 1  ;;  %v1271_v43 = vrot.slane %v1270_v41, 1 }
 0x6ab   :  { %v1248_v18 = vrot.slane %v1247_v15, 2  ;;  %v1202_v24 = vpop.f32.mrf.mxu2  ;;  %v1215_v19 = vpop.f32.mrf.mxu3  ;;  %v1255_v22 = vrot.slane %v1254_v16, 2  ;;  %v2808_v13 = vsel %vm1334_vm2, %v2063_v55, %v1333_v5 }
 0x6ac   :  { %v1265_v42 = vadd.f32 %v1264_v40, %v1263_v34  ;;  %v1272_v44 = vadd.f32 %v1271_v43, %v1270_v41 }
 0x6ad   :  { %v1249_v21 = vadd.f32 %v1248_v18, %v1247_v15  ;;  %v1256_v27 = vadd.f32 %v1255_v22, %v1254_v16 }
 0x6af   :  { %v1250_v25 = vrot.slane %v1249_v21, 1  ;;  %v1257_v33 = vrot.slane %v1256_v27, 1 }
 0x6b1   :  { %v1251_v29 = vadd.f32 %v1250_v25, %v1249_v21  ;;  %v1258_v3 = vadd.f32 %v1257_v33, %v1256_v27 }
 0x6b3   :  { %1283 = vrot.lane.b32.xlu2 %v1251_v29, %s2067_s1  ;;  %1279 = vrot.lane.b32.xlu1 %v1251_v29, %s2069_s22 }
 0x6b4   :  { %1275 = vrot.lane.b32.xlu0 %v1251_v29, %s2068_s21 }
 0x6bb   :  { %1297 = vrot.lane.b32.xlu2 %v1258_v3, %s2067_s1  ;;  %1293 = vrot.lane.b32.xlu1 %v1258_v3, %s2069_s22 }
 0x6bc   :  { %1289 = vrot.lane.b32.xlu0 %v1258_v3, %s2068_s21 }
 0x6c3   :  { %1311 = vrot.lane.b32.xlu2 %v1265_v42, %s2067_s1  ;;  %1307 = vrot.lane.b32.xlu1 %v1265_v42, %s2069_s22 }
 0x6c4   :  { %1303 = vrot.lane.b32.xlu0 %v1265_v42, %s2068_s21 }
 0x6cb   :  { %1325 = vrot.lane.b32.xlu2 %v1272_v44, %s2067_s1  ;;  %1321 = vrot.lane.b32.xlu1 %v1272_v44, %s2069_s22 }
 0x6cc   :  { %1317 = vrot.lane.b32.xlu0 %v1272_v44, %s2068_s21 }
 0x70d   :  { %v1284_v45 = vpop.permute.xlu2 %1283 }
 0x715   :  { %v1298_v53 = vpop.permute.xlu2 %1297 }
 0x71d   :  { %v1312_v63 = vpop.permute.xlu2 %1311 }
 0x725   :  { %v1280_v46 = vpop.permute.xlu1 %1279  ;;  %v1326_v12 = vpop.permute.xlu2 %1325 }
 0x726   :  { %v1276_v47 = vpop.permute.xlu0 %1275 }
 0x727   :  { %v1278_v48 = vadd.f32 %v1276_v47, %v1251_v29 }
 0x729   :  { %v1282_v49 = vadd.f32 %v1280_v46, %v1278_v48 }
 0x72b   :  { %v1286_v51 = vadd.f32 %v1284_v45, %v1282_v49 }
 0x72d   :  { %v1294_v52 = vpop.permute.xlu1 %1293  ;;  %v1287_v35 = vadd.f32 %v1286_v51, %v1258_v3 }
 0x72e   :  { %v1290_v54 = vpop.permute.xlu0 %1289 }
 0x72f   :  { %v1292_v56 = vadd.f32 %v1290_v54, %v1287_v35 }
 0x731   :  { %v1296_v57 = vadd.f32 %v1294_v52, %v1292_v56 }
 0x733   :  { %v1300_v59 = vadd.f32 %v1298_v53, %v1296_v57 }
 0x735   :  { %v1301_v39 = vadd.f32 %v1300_v59, %v1265_v42  ;;  %v1308_v60 = vpop.permute.xlu1 %1307 }
 0x736   :  { %v1304_v61 = vpop.permute.xlu0 %1303 }
 0x737   :  { %v1306_v37 = vadd.f32 %v1304_v61, %v1301_v39 }
 0x739   :  { %v1310_v0 = vadd.f32 %v1308_v60, %v1306_v37 }
 0x73b   :  { %v1314_v2 = vadd.f32 %v1312_v63, %v1310_v0 }
 0x73d   :  { %v1315_v4 = vadd.f32 %v1314_v2, %v1272_v44  ;;  %v1322_v10 = vpop.permute.xlu1 %1321 }
 0x73e   :  { %v1318_v6 = vpop.permute.xlu0 %1317 }
 0x73f   :  { %v1320_v9 = vadd.f32 %v1318_v6, %v1315_v4 }
 0x741   :  { %v1324_v11 = vadd.f32 %v1322_v10, %v1320_v9 }
 0x743   :  { %v1328_v14 = vadd.f32 %v1326_v12, %v1324_v11 }
 0x745   :  { %v2811_v15 = vmul.f32 %v2808_v13, %v1328_v14 }
 0x747   :  { %1344 = vrot.lane.b32.xlu2 %v2811_v15, %s2068_s21  ;;  %1341 = vrot.lane.b32.xlu1 %v2811_v15, %s2069_s22 }
 0x748   :  { %1338 = vrot.lane.b32.xlu0 %v2811_v15, %s2067_s1 }
 0x7a1   :  { %v1345_v24 = vpop.permute.xlu2 %1344 }
 0x7b9   :  { %v1342_v16 = vpop.permute.xlu1 %1341 }
 0x7ba   :  { %v1339_v17 = vpop.permute.xlu0 %1338 }
 0x7bb   :  { %v1347_v18 = vsel %vm447_vm8, %v2811_v15, %v1339_v17 }
 0x7bc   :  { %v1348_v19 = vsel %vm449_vm9, %v1347_v18, %v1342_v16 }
 0x7bd   :  { %v1349_v20 = vsel %vm451_vm10, %v1348_v19, %v1345_v24 }
 0x7be   :  { %v1350_v21 = vperm.slane %v1349_v20, 0 }
 0x7c0   :  { %v1351_v22 = vsub.f32 %v2780_v7, %v1350_v21  ;;  %v1352_v25 = vsub.f32 %v2782_v28, %v1350_v21  ;;  %v1353_v26 = vsub.f32 %v2784_v8, %v1350_v21  ;;  %v1354_v38 = vsub.f32 %v2792_v23, %v1350_v21 }
 0x7c2   :  { %v1355_v27 = vmul.f32 %v1351_v22, %v1351_v22  ;;  %v1356_v29 = vmul.f32 %v1352_v25, %v1352_v25  ;;  %v1357_v32 = vmul.f32 %v1353_v26, %v1353_v26  ;;  %v1358_v45 = vmul.f32 %v1354_v38, %v1354_v38  ;;  %v1243_v38 = vld [vmem:[%s2884_s11] sm:$0x1] }
 0x7c4   :  { %v1359_v30 = vsel %vm84_vm5, %v1355_v27, 0.0  ;;  %v1366_v31 = vsel %vm84_vm5, %v1356_v29, 0.0  ;;  %v1373_v40 = vsel %vm84_vm5, %v1357_v32, 0.0  ;;  %v1380_v50 = vsel %vm84_vm5, %v1358_v45, 0.0 }
 0x7c5   :  { %v1360_v33 = vrot.slane %v1359_v30, 4  ;;  %v1367_v34 = vrot.slane %v1366_v31, 4  ;;  %v1374_v44 = vrot.slane %v1373_v40, 4  ;;  %v1381_v35 = vrot.slane %v1380_v50, 4 }
 0x7c7   :  { %v1361_v36 = vadd.f32 %v1360_v33, %v1359_v30  ;;  %v1368_v3 = vadd.f32 %v1367_v34, %v1366_v31  ;;  %v1375_v49 = vadd.f32 %v1374_v44, %v1373_v40  ;;  %v1382_v55 = vadd.f32 %v1381_v35, %v1380_v50  ;;  %v1244_v44 = vld [vmem:[%s2885_s12] sm:$0x1] }
 0x7c9   :  { %v1362_v41 = vrot.slane %v1361_v36, 2  ;;  %v1369_v43 = vrot.slane %v1368_v3, 2  ;;  %v1376_v52 = vrot.slane %v1375_v49, 2  ;;  %v1383_v57 = vrot.slane %v1382_v55, 2 }
 0x7cb   :  { %v1363_v42 = vadd.f32 %v1362_v41, %v1361_v36  ;;  %v1370_v48 = vadd.f32 %v1369_v43, %v1368_v3  ;;  %v1377_v54 = vadd.f32 %v1376_v52, %v1375_v49  ;;  %v1384_v59 = vadd.f32 %v1383_v57, %v1382_v55 }
 0x7cd   :  { %v1364_v46 = vrot.slane %v1363_v42, 1  ;;  %v1371_v51 = vrot.slane %v1370_v48, 1  ;;  %v1378_v56 = vrot.slane %v1377_v54, 1  ;;  %v1385_v39 = vrot.slane %v1384_v59, 1 }
 0x7cf   :  { %v1365_v47 = vadd.f32 %v1364_v46, %v1363_v42  ;;  %v1372_v53 = vadd.f32 %v1371_v51, %v1370_v48  ;;  %v1379_v58 = vadd.f32 %v1378_v56, %v1377_v54  ;;  %v1386_v60 = vadd.f32 %v1385_v39, %v1384_v59 }
 0x7d1   :  { %1397 = vrot.lane.b32.xlu2 %v1365_v47, %s2067_s1  ;;  %1393 = vrot.lane.b32.xlu1 %v1365_v47, %s2069_s22 }
 0x7d2   :  { %1389 = vrot.lane.b32.xlu0 %v1365_v47, %s2068_s21 }
 0x7d9   :  { %1411 = vrot.lane.b32.xlu2 %v1372_v53, %s2067_s1  ;;  %1407 = vrot.lane.b32.xlu1 %v1372_v53, %s2069_s22 }
 0x7da   :  { %1403 = vrot.lane.b32.xlu0 %v1372_v53, %s2068_s21 }
 0x7e1   :  { %1425 = vrot.lane.b32.xlu2 %v1379_v58, %s2067_s1  ;;  %1421 = vrot.lane.b32.xlu1 %v1379_v58, %s2069_s22 }
 0x7e2   :  { %1417 = vrot.lane.b32.xlu0 %v1379_v58, %s2068_s21 }
 0x7e9   :  { %1439 = vrot.lane.b32.xlu2 %v1386_v60, %s2067_s1  ;;  %1435 = vrot.lane.b32.xlu1 %v1386_v60, %s2069_s22 }
 0x7ea   :  { %1431 = vrot.lane.b32.xlu0 %v1386_v60, %s2068_s21 }
 0x82b   :  { %v1398_v61 = vpop.permute.xlu2 %1397 }
 0x833   :  { %v1412_v5 = vpop.permute.xlu2 %1411 }
 0x83b   :  { %v1426_v18 = vpop.permute.xlu2 %1425 }
 0x843   :  { %v1394_v62 = vpop.permute.xlu1 %1393  ;;  %v1440_v27 = vpop.permute.xlu2 %1439 }
 0x844   :  { %v1390_v37 = vpop.permute.xlu0 %1389 }
 0x845   :  { %v1392_v63 = vadd.f32 %v1390_v37, %v1365_v47 }
 0x847   :  { %v1396_v0 = vadd.f32 %v1394_v62, %v1392_v63 }
 0x849   :  { %v1400_v1 = vadd.f32 %v1398_v61, %v1396_v0 }
 0x84b   :  { %v1408_v2 = vpop.permute.xlu1 %1407  ;;  %v1401_v4 = vadd.f32 %v1400_v1, %v1372_v53 }
 0x84c   :  { %v1404_v6 = vpop.permute.xlu0 %1403 }
 0x84d   :  { %v1406_v9 = vadd.f32 %v1404_v6, %v1401_v4 }
 0x84f   :  { %v1410_v10 = vadd.f32 %v1408_v2, %v1406_v9 }
 0x851   :  { %v1414_v11 = vadd.f32 %v1412_v5, %v1410_v10 }
 0x853   :  { %v1415_v12 = vadd.f32 %v1414_v11, %v1379_v58  ;;  %v1422_v14 = vpop.permute.xlu1 %1421 }
 0x854   :  { %v1418_v16 = vpop.permute.xlu0 %1417 }
 0x855   :  { %v1420_v17 = vadd.f32 %v1418_v16, %v1415_v12 }
 0x857   :  { %v1424_v24 = vadd.f32 %v1422_v14, %v1420_v17 }
 0x859   :  { %v1428_v19 = vadd.f32 %v1426_v18, %v1424_v24 }
 0x85b   :  { %v1429_v20 = vadd.f32 %v1428_v19, %v1386_v60  ;;  %v1436_v25 = vpop.permute.xlu1 %1435 }
 0x85c   :  { %v1432_v21 = vpop.permute.xlu0 %1431 }
 0x85d   :  { %v1434_v22 = vadd.f32 %v1432_v21, %v1429_v20 }
 0x85f   :  { %v1438_v26 = vadd.f32 %v1436_v25, %v1434_v22 }
 0x861   :  { %v1442_v29 = vadd.f32 %v1440_v27, %v1438_v26 }
 0x863   :  { %v1443_v30 = vmul.f32 %v1442_v29, %v2808_v13 }
 0x865   :  { %v1444_v31 = vadd.f32 1e-05, %v1443_v30 }
 0x867   :  { %2064 = vrsqrt.f32 %v1444_v31  ;;  %vm1451_vm7 = vweird.f32 %v1444_v31 }
 0x86d   :  { %v2065_v32 = vpop.eup %2064 }
 0x86e   :  { %v1446_v33 = vmul.f32 %v2065_v32, %v1444_v31  ;;  %vm1452_vm6 = vweird.f32 %v2065_v32 }
 0x86f   :  { %vm1453_vm11 = vmor %vm1451_vm7, %vm1452_vm6 }
 0x870   :  { %v1447_v34 = vmul.f32 %v2065_v32, %v1446_v33 }
 0x872   :  { %v1448_v36 = vmul.f32 0.5, %v1447_v34 }
 0x874   :  { %v1449_v3 = vsub.f32 1.5, %v1448_v36 }
 0x876   :  { %v1450_v40 = vmul.f32 %v2065_v32, %v1449_v3 }
 0x878   :  { %v1454_v41 = vsel %vm1453_vm11, %v2065_v32, %v1450_v40 }
 0x879   :  { %v1455_v42 = vmul.f32 %v1454_v41, %v1243_v38 }
 0x87b   :  { %v1459_v43 = vperm.slane %v1455_v42, 0  ;;  %v1456_v13 = vmul.f32 %v1455_v42, %v2811_v15 }
 0x87d   :  { %1466 = vrot.lane.b32.xlu2 %v1459_v43, %s2068_s21  ;;  %1463 = vrot.lane.b32.xlu1 %v1459_v43, %s2069_s22  ;;  %v1457_v45 = vsub.f32 %v1244_v44, %v1456_v13 }
 0x87e   :  { %1460 = vrot.lane.b32.xlu0 %v1459_v43, %s2067_s1 }
 0x87f   :  { %v1473_v46 = vperm.slane %v1457_v45, 0 }
 0x885   :  { %1480 = vrot.lane.b32.xlu2 %v1473_v46, %s2068_s21  ;;  %1477 = vrot.lane.b32.xlu1 %v1473_v46, %s2069_s22 }
 0x886   :  { %1474 = vrot.lane.b32.xlu0 %v1473_v46, %s2067_s1 }
 0x8d7   :  { %v1467_v15 = vpop.permute.xlu2 %1466 }
 0x8df   :  { %v1481_v55 = vpop.permute.xlu2 %1480 }
 0x8ef   :  { %v1464_v47 = vpop.permute.xlu1 %1463 }
 0x8f0   :  { %v1461_v48 = vpop.permute.xlu0 %1460 }
 0x8f1   :  { %v1469_v49 = vsel %vm447_vm8, %v1455_v42, %v1461_v48 }
 0x8f2   :  { %v1470_v50 = vsel %vm449_vm9, %v1469_v49, %v1464_v47 }
 0x8f3   :  { %v1471_v51 = vsel %vm451_vm10, %v1470_v50, %v1467_v15 }
 0x8f4   :  { %v1486_v52 = vperm.slane %v1471_v51, 0 }
 0x8f6   :  { %v1487_v57 = vmul.f32 %v1486_v52, %v2780_v7  ;;  %v1488_v59 = vmul.f32 %v1486_v52, %v2782_v28  ;;  %v1489_v39 = vmul.f32 %v1486_v52, %v2784_v8  ;;  %v1490_v60 = vmul.f32 %v1486_v52, %v2792_v23 }
 0x8f7   :  { %v1478_v35 = vpop.permute.xlu1 %1477 }
 0x8f8   :  { %v1475_v53 = vpop.permute.xlu0 %1474 }
 0x8f9   :  { %v1483_v54 = vsel %vm447_vm8, %v1457_v45, %v1475_v53 }
 0x8fa   :  { %v1484_v56 = vsel %vm449_vm9, %v1483_v54, %v1478_v35 }
 0x8fb   :  { %v1485_v58 = vsel %vm451_vm10, %v1484_v56, %v1481_v55 }
 0x8fc   :  { %v1491_v61 = vperm.slane %v1485_v58, 0 }
 0x8fe   :  { %v1492_v62 = vadd.f32 %v1491_v61, %v1487_v57  ;;  %v1493_v37 = vadd.f32 %v1491_v61, %v1488_v59  ;;  %v1494_v63 = vadd.f32 %v1491_v61, %v1489_v39  ;;  %v1495_v0 = vadd.f32 %v1491_v61, %v1490_v60 }
 0x900   :  { %v1496_v1 = vpack.c.bf16 %v1493_v37, %v1492_v62  ;;  %v1497_v2 = vpack.c.bf16 %v1495_v0, %v1494_v63 }
 0x902   :  { %v1500_v4 = vrot.slane %v1496_v1, 3  ;;  %v1501_v5 = vrot.slane %v1497_v2, 6  ;;  %v1502_v6 = vrot.slane %v1497_v2, 1 }
 0x904   :  { %v1505_v7 = vsel %vm76_vm3, %v1496_v1, %v1500_v4  ;;  %v1508_v9 = vsel %vm80_vm4, %v1501_v5, %v1502_v6 }
 0x905   :  { %v1509_v28 = vsel %vm84_vm5, %v1505_v7, %v1508_v9 }
 0x906   :  { %1511 = vst [vmem:[%s2886_s13] sm:$0xf] %v1509_v28 }

// kernel: _lambda_.11
= control target key start
LH: loop header
LB: loop body
LE: loop exit
PB: predicated region body
PF: predicated region fallthrough
CT: control target
= control target key end

     0   :  { %vm368_vm0 = vcmask 523264   ;;  %s873_s22 = smov 112   ;;  %s874_s23 = smov 96   ;;  %vm517_vm2 = vcmask 130048   ;;  %vm519_vm3 = vcmask 261120   ;;  %vm521_vm4 = vcmask 392192   ;;  %s1151_s1 = inlined_call_operand.vmem [shape: bf16[576,64], index: 1, kind: input, shape index: {}]   ;;  %s1152_s0 = inlined_call_operand.vmem [shape: bf16[32,576], index: 0, kind: input, shape index: {}]   ;;  %s1153_s2 = inlined_call_operand.vmem [shape: f32[1,16], index: 2, kind: input, shape index: {}]   ;;  %s1154_s3 = inlined_call_operand.vmem [shape: f32[1,16], index: 3, kind: input, shape index: {}]   ;;  %s1155_s4 = inlined_call_operand.vmem [shape: bf16[32,64], index: 4, kind: output, shape index: {}]  }
   0x1   :  { %v828_v0 = vld [vmem:[%s1151_s1 + $0x38] sm:$0xff]  ;;  %v827_v4 = vld [vmem:[%s1151_s1 + $0x30] sm:$0xff]  ;;  %v826_v8 = vld [vmem:[%s1151_s1 + $0x28] sm:$0xff]  ;;  %s876_s24 = smov 32   ;;  %s877_s25 = smov 16   ;;  %vm616_vm8 = vcmask 519168  }
   0x2   :  { %v836_v1 = vld [vmem:[%s1151_s1 + $0x78] sm:$0xff]  ;;  %375 = vmatpush.bf16.msra.mxu0 %v828_v0  ;;  %v835_v5 = vld [vmem:[%s1151_s1 + $0x70] sm:$0xff]  ;;  %v834_v9 = vld [vmem:[%s1151_s1 + $0x68] sm:$0xff]  ;;  %s878_s26 = smov 48  }
   0x3   :  { %v844_v2 = vld [vmem:[%s1151_s1 + $0xb8] sm:$0xff]  ;;  %394 = vmatpush.bf16.msra.mxu1 %v836_v1  ;;  %v843_v6 = vld [vmem:[%s1151_s1 + $0xb0] sm:$0xff]  ;;  %v842_v10 = vld [vmem:[%s1151_s1 + $0xa8] sm:$0xff] }
   0x4   :  { %v852_v3 = vld [vmem:[%s1151_s1 + $0xf8] sm:$0xff]  ;;  %413 = vmatpush.bf16.msra.mxu2 %v844_v2  ;;  %v851_v7 = vld [vmem:[%s1151_s1 + $0xf0] sm:$0xff]  ;;  %v850_v11 = vld [vmem:[%s1151_s1 + $0xe8] sm:$0xff] }
   0x5   :  { %432 = vmatpush.bf16.msra.mxu3 %v852_v3  ;;  %v825_v12 = vld [vmem:[%s1151_s1 + $0x20] sm:$0xff]  ;;  %v824_v16 = vld [vmem:[%s1151_s1 + $0x18] sm:$0xff]  ;;  %v823_v20 = vld [vmem:[%s1151_s1 + $0x10] sm:$0xff] }
   0x6   :  { %376 = vmatpush.bf16.msra.mxu0 %v827_v4  ;;  %v833_v13 = vld [vmem:[%s1151_s1 + $0x60] sm:$0xff]  ;;  %v832_v17 = vld [vmem:[%s1151_s1 + $0x58] sm:$0xff]  ;;  %v831_v21 = vld [vmem:[%s1151_s1 + $0x50] sm:$0xff] }
   0x7   :  { %395 = vmatpush.bf16.msra.mxu1 %v835_v5  ;;  %v841_v14 = vld [vmem:[%s1151_s1 + $0xa0] sm:$0xff]  ;;  %v840_v18 = vld [vmem:[%s1151_s1 + $0x98] sm:$0xff]  ;;  %v839_v22 = vld [vmem:[%s1151_s1 + $0x90] sm:$0xff] }
   0x8   :  { %414 = vmatpush.bf16.msra.mxu2 %v843_v6  ;;  %v849_v15 = vld [vmem:[%s1151_s1 + $0xe0] sm:$0xff]  ;;  %v848_v19 = vld [vmem:[%s1151_s1 + $0xd8] sm:$0xff]  ;;  %v847_v23 = vld [vmem:[%s1151_s1 + $0xd0] sm:$0xff] }
   0x9   :  { %433 = vmatpush.bf16.msra.mxu3 %v851_v7  ;;  %v822_v24 = vld [vmem:[%s1151_s1 + $0x8] sm:$0xff]  ;;  %v821_v28 = vld [vmem:[%s1151_s1] sm:$0xff]  ;;  %v813_v33 = vld [vmem:[%s1152_s0 + $0x10] sm:$0xf0] }
   0xa   :  { %377 = vmatpush.bf16.msra.mxu0 %v826_v8  ;;  %v830_v25 = vld [vmem:[%s1151_s1 + $0x48] sm:$0xff]  ;;  %v829_v29 = vld [vmem:[%s1151_s1 + $0x40] sm:$0xff]  ;;  %v629_v35 = vld [vmem:[%s1152_s0 + $0x14] sm:$0xf0] }
   0xb   :  { %396 = vmatpush.bf16.msra.mxu1 %v834_v9  ;;  %v838_v26 = vld [vmem:[%s1151_s1 + $0x88] sm:$0xff]  ;;  %v837_v30 = vld [vmem:[%s1151_s1 + $0x80] sm:$0xff]  ;;  %v814_v37 = vld [vmem:[%s1152_s0 + $0x18] sm:$0xf0] }
   0xc   :  { %415 = vmatpush.bf16.msra.mxu2 %v842_v10  ;;  %v846_v27 = vld [vmem:[%s1151_s1 + $0xc8] sm:$0xff]  ;;  %v845_v31 = vld [vmem:[%s1151_s1 + $0xc0] sm:$0xff]  ;;  %v856_v40 = vld [vmem:[%s1151_s1 + $0x118] sm:$0xff] }
   0xd   :  { %434 = vmatpush.bf16.msra.mxu3 %v850_v11  ;;  %v627_v32 = vld [vmem:[%s1152_s0] sm:$0xf]  ;;  %v811_v34 = vld [vmem:[%s1152_s0 + $0x4] sm:$0xf]  ;;  %v635_v36 = vld [vmem:[%s1152_s0 + $0x8] sm:$0xf] }
   0xe   :  { %378 = vmatpush.bf16.msra.mxu0 %v825_v12  ;;  %v812_v38 = vld [vmem:[%s1152_s0 + $0xc] sm:$0xf]  ;;  %v637_v39 = vld [vmem:[%s1152_s0 + $0x1c] sm:$0xf0]  ;;  %v628_v41 = vor.u32 %v813_v33, %v627_v32  ;;  %v632_v42 = vor.u32 %v811_v34, %v629_v35  ;;  %v636_v43 = vor.u32 %v814_v37, %v635_v36  ;;  %v855_v45 = vld [vmem:[%s1151_s1 + $0x110] sm:$0xff] }
   0xf   :  { %397 = vmatpush.bf16.msra.mxu1 %v833_v13  ;;  %v640_v44 = vor.u32 %v812_v38, %v637_v39  ;;  %v854_v46 = vld [vmem:[%s1151_s1 + $0x108] sm:$0xff]  ;;  %v853_v47 = vld [vmem:[%s1151_s1 + $0x100] sm:$0xff]  ;;  %v818_v49 = vld [vmem:[%s1152_s0 + $0x38] sm:$0xf0] }
  0x10   :  { %416 = vmatpush.bf16.msra.mxu2 %v841_v14  ;;  %v647_v48 = vld [vmem:[%s1152_s0 + $0x28] sm:$0xf]  ;;  %v816_v50 = vld [vmem:[%s1152_s0 + $0x2c] sm:$0xf]  ;;  %v649_v51 = vld [vmem:[%s1152_s0 + $0x3c] sm:$0xf0] }
  0x11   :  { %435 = vmatpush.bf16.msra.mxu3 %v849_v15  ;;  %v655_v52 = vld [vmem:[%s1152_s0 + $0x30] sm:$0xf]  ;;  %v819_v53 = vld [vmem:[%s1152_s0 + $0x40] sm:$0xf0]  ;;  %v817_v54 = vld [vmem:[%s1152_s0 + $0x34] sm:$0xf]  ;;  %v648_v56 = vor.u32 %v818_v49, %v647_v48  ;;  %v652_v57 = vor.u32 %v816_v50, %v649_v51 }
  0x12   :  { %379 = vmatpush.bf16.msra.mxu0 %v824_v16  ;;  %v657_v55 = vld [vmem:[%s1152_s0 + $0x44] sm:$0xf0]  ;;  %v656_v58 = vor.u32 %v819_v53, %v655_v52  ;;  %v643_v60 = vld [vmem:[%s1152_s0 + $0x10] sm:$0xf]  ;;  %v815_v61 = vld [vmem:[%s1152_s0 + $0x20] sm:$0xf0] }
  0x13   :  { %398 = vmatpush.bf16.msra.mxu1 %v832_v17  ;;  %v660_v59 = vor.u32 %v817_v54, %v657_v55  ;;  %v663_v62 = vld [vmem:[%s1152_s0 + $0x38] sm:$0xf]  ;;  %v820_v63 = vld [vmem:[%s1152_s0 + $0x48] sm:$0xf0]  ;;  %v644_v0 = vor.u32 %v815_v61, %v643_v60  ;;  %s872_s0 = smov 80   ;;  %v875_v51 = vmov 128.0  }
  0x14   :  { %417 = vmatpush.bf16.msra.mxu2 %v840_v18  ;;  %v664_v1 = vor.u32 %v820_v63, %v663_v62  ;;  %868 = vrcp.f32 %v875_v51 }
  0x15   :  { %436 = vmatpush.bf16.msra.mxu3 %v848_v19 }
  0x16   :  { %380 = vmatpush.bf16.msra.mxu0 %v823_v20 }
  0x17   :  { %399 = vmatpush.bf16.msra.mxu1 %v831_v21 }
  0x18   :  { %418 = vmatpush.bf16.msra.mxu2 %v839_v22 }
  0x19   :  { %437 = vmatpush.bf16.msra.mxu3 %v847_v23 }
  0x1a   :  { %381 = vmatpush.bf16.msra.mxu0 %v822_v24  ;;  %v869_v52 = vpop.eup %868 }
  0x1b   :  { %400 = vmatpush.bf16.msra.mxu1 %v830_v25  ;;  %v500_v53 = vmul.f32 128.0, %v869_v52  ;;  %vm504_vm1 = vweird.f32 %v869_v52 }
  0x1c   :  { %419 = vmatpush.bf16.msra.mxu2 %v838_v26 }
  0x1d   :  { %438 = vmatpush.bf16.msra.mxu3 %v846_v27  ;;  %v501_v54 = vsub.f32 1.0, %v500_v53 }
  0x1e   :  { %382 = vmatpush.bf16.msra.mxu0 %v821_v28 }
  0x1f   :  { %401 = vmatpush.bf16.msra.mxu1 %v829_v29 }
  0x20   :  { %420 = vmatpush.bf16.msra.mxu2 %v837_v30 }
  0x21   :  { %439 = vmatpush.bf16.msra.mxu3 %v845_v31  ;;  %383 = vmatmul.bf16.vlgmr.msra.gmra.mxu0 %v628_v41 }
  0x22   :  { %455 = vmatpush.bf16.msrb.mxu0 %v856_v40  ;;  %402 = vmatmul.bf16.vlgmr.msra.gmra.mxu1 %v632_v42 }
  0x23   :  { %857 = vmatpush.bf16.msrb.mxu1 %v856_v40  ;;  %421 = vmatmul.bf16.vlgmr.msra.gmra.mxu2 %v636_v43 }
  0x24   :  { %440 = vmatmul.bf16.vlgmr.msra.gmra.mxu3 %v640_v44 }
  0x26   :  { %456 = vmatpush.bf16.msrb.mxu0 %v855_v45 }
  0x27   :  { %858 = vmatpush.bf16.msrb.mxu1 %v855_v45 }
  0x2a   :  { %457 = vmatpush.bf16.msrb.mxu0 %v854_v46 }
  0x2b   :  { %859 = vmatpush.bf16.msrb.mxu1 %v854_v46 }
  0x2e   :  { %458 = vmatpush.bf16.msrb.mxu0 %v853_v47 }
  0x2f   :  { %860 = vmatpush.bf16.msrb.mxu1 %v853_v47 }
  0x31   :  { %388 = vmatmul.bf16.gmra.mxu0 %v648_v56  ;;  %v502_v56 = vmul.f32 %v869_v52, %v501_v54 }
  0x32   :  { %407 = vmatmul.bf16.gmra.mxu1 %v652_v57 }
  0x33   :  { %426 = vmatmul.bf16.gmra.mxu2 %v656_v58  ;;  %v503_v57 = vadd.f32 %v869_v52, %v502_v56 }
  0x34   :  { %445 = vmatmul.bf16.gmra.mxu3 %v660_v59 }
  0x35   :  { %v505_v62 = vsel %vm504_vm1, %v869_v52, %v503_v57  ;;  %v471_v52 = vld [vmem:[%s1154_s3] sm:$0x1] }
  0x41   :  { %809 = vmatmul.msk.bf16.vlgmr.msrb.gmra.mxu0 %vm368_vm0, %v644_v0 }
  0x42   :  { %810 = vmatmul.msk.bf16.vlgmr.msrb.gmra.mxu1 %vm368_vm0, %v664_v1 }
  0x9e   :  { %v384_v2 = vpop.f32.mrf.mxu0 }
  0x9f   :  { %v403_v3 = vpop.f32.mrf.mxu1 }
  0xa0   :  { %v404_v16 = vadd.f32 %v403_v3, %v384_v2 }
  0xa6   :  { %v422_v4 = vpop.f32.mrf.mxu2  ;;  %v386_v6 = vpop.f32.mrf.mxu0 }
  0xa7   :  { %v441_v5 = vpop.f32.mrf.mxu3  ;;  %v405_v7 = vpop.f32.mrf.mxu1  ;;  %v423_v19 = vadd.f32 %v422_v4, %v404_v16 }
  0xa8   :  { %v406_v20 = vadd.f32 %v405_v7, %v386_v6 }
  0xa9   :  { %v442_v26 = vadd.f32 %v441_v5, %v423_v19 }
  0xae   :  { %v424_v8 = vpop.f32.mrf.mxu2  ;;  %v389_v9 = vpop.f32.mrf.mxu0 }
  0xaf   :  { %v408_v10 = vpop.f32.mrf.mxu1  ;;  %v443_v11 = vpop.f32.mrf.mxu3  ;;  %v425_v23 = vadd.f32 %v424_v8, %v406_v20 }
  0xb0   :  { %v409_v21 = vadd.f32 %v408_v10, %v389_v9 }
  0xb1   :  { %v444_v29 = vadd.f32 %v443_v11, %v425_v23 }
  0xb6   :  { %v427_v12 = vpop.f32.mrf.mxu2  ;;  %v391_v13 = vpop.f32.mrf.mxu0 }
  0xb7   :  { %v410_v14 = vpop.f32.mrf.mxu1  ;;  %v446_v15 = vpop.f32.mrf.mxu3  ;;  %v428_v24 = vadd.f32 %v427_v12, %v409_v21 }
  0xb8   :  { %v411_v25 = vadd.f32 %v410_v14, %v391_v13 }
  0xb9   :  { %v447_v30 = vadd.f32 %v446_v15, %v428_v24 }
  0xbe   :  { %v460_v17 = vpop.f32.mrf.mxu0  ;;  %v429_v22 = vpop.f32.mrf.mxu2 }
  0xbf   :  { %v465_v18 = vpop.f32.mrf.mxu1  ;;  %v430_v27 = vadd.f32 %v429_v22, %v411_v25  ;;  %v448_v28 = vpop.f32.mrf.mxu3  ;;  %v1074_v31 = vadd.f32 %v460_v17, %v442_v26 }
  0xc0   :  { %v1076_v35 = vadd.f32 %v465_v18, %v447_v30 }
  0xc1   :  { %v449_v34 = vadd.f32 %v448_v28, %v430_v27  ;;  %v472_v37 = vsel %vm368_vm0, %v1074_v31, 0.0 }
  0xc2   :  { %v475_v41 = vsel %vm368_vm0, %v1076_v35, 0.0 }
  0xc6   :  { %v462_v32 = vpop.f32.mrf.mxu0 }
  0xc7   :  { %v467_v33 = vpop.f32.mrf.mxu1  ;;  %v1078_v36 = vadd.f32 %v462_v32, %v444_v29 }
  0xc8   :  { %v1084_v39 = vadd.f32 %v467_v33, %v449_v34 }
  0xc9   :  { %v473_v38 = vsel %vm368_vm0, %v1078_v36, 0.0 }
  0xca   :  { %v474_v40 = vadd.f32 %v473_v38, %v472_v37  ;;  %v477_v43 = vsel %vm368_vm0, %v1084_v39, 0.0 }
  0xcc   :  { %v476_v42 = vadd.f32 %v475_v41, %v474_v40 }
  0xce   :  { %v478_v44 = vadd.f32 %v477_v43, %v476_v42 }
  0xd0   :  { %v479_v45 = vrot.slane %v478_v44, 4 }
  0xd2   :  { %v480_v46 = vadd.f32 %v479_v45, %v478_v44 }
  0xd4   :  { %v481_v47 = vrot.slane %v480_v46, 2 }
  0xd6   :  { %v482_v48 = vadd.f32 %v481_v47, %v480_v46  ;;  %v470_v46 = vld [vmem:[%s1153_s2] sm:$0x1] }
  0xd8   :  { %v483_v49 = vrot.slane %v482_v48, 1 }
  0xda   :  { %v484_v50 = vadd.f32 %v483_v49, %v482_v48 }
  0xdc   :  { %495 = vrot.lane.b32.xlu1 %v484_v50, %s872_s0  ;;  %487 = vrot.lane.b32.xlu0 %v484_v50, %s873_s22 }
  0xe4   :  { %491 = vrot.lane.b32.xlu0 %v484_v50, %s874_s23 }
 0x14e   :  { %v488_v55 = vpop.permute.xlu0 %487  ;;  %v496_v61 = vpop.permute.xlu1 %495 }
 0x14f   :  { %v490_v58 = vadd.f32 %v488_v55, %v484_v50 }
 0x156   :  { %v492_v59 = vpop.permute.xlu0 %491 }
 0x157   :  { %v494_v60 = vadd.f32 %v492_v59, %v490_v58 }
 0x159   :  { %v498_v63 = vadd.f32 %v496_v61, %v494_v60 }
 0x15b   :  { %v1093_v0 = vmul.f32 %v505_v62, %v498_v63 }
 0x15d   :  { %511 = vrot.lane.b32.xlu2 %v1093_v0, %s876_s24  ;;  %508 = vrot.lane.b32.xlu1 %v1093_v0, %s877_s25 }
 0x165   :  { %514 = vrot.lane.b32.xlu2 %v1093_v0, %s878_s26 }
 0x1b7   :  { %v512_v1 = vpop.permute.xlu2 %511 }
 0x1bf   :  { %v515_v4 = vpop.permute.xlu2 %514 }
 0x1cf   :  { %v509_v2 = vpop.permute.xlu1 %508 }
 0x1d0   :  { %v518_v3 = vsel %vm517_vm2, %v1093_v0, %v509_v2 }
 0x1d1   :  { %v520_v5 = vsel %vm519_vm3, %v518_v3, %v512_v1 }
 0x1d2   :  { %v522_v6 = vsel %vm521_vm4, %v520_v5, %v515_v4 }
 0x1d3   :  { %v523_v7 = vperm.slane %v522_v6, 0 }
 0x1d5   :  { %v524_v8 = vsub.f32 %v1074_v31, %v523_v7  ;;  %v525_v9 = vsub.f32 %v1078_v36, %v523_v7  ;;  %v526_v10 = vsub.f32 %v1076_v35, %v523_v7  ;;  %v527_v11 = vsub.f32 %v1084_v39, %v523_v7 }
 0x1d7   :  { %v528_v12 = vmul.f32 %v524_v8, %v524_v8  ;;  %v529_v13 = vmul.f32 %v525_v9, %v525_v9  ;;  %v530_v14 = vmul.f32 %v526_v10, %v526_v10  ;;  %v531_v15 = vmul.f32 %v527_v11, %v527_v11 }
 0x1d9   :  { %v532_v16 = vsel %vm368_vm0, %v528_v12, 0.0  ;;  %v533_v17 = vsel %vm368_vm0, %v529_v13, 0.0  ;;  %v535_v19 = vsel %vm368_vm0, %v530_v14, 0.0  ;;  %v537_v21 = vsel %vm368_vm0, %v531_v15, 0.0 }
 0x1da   :  { %v534_v18 = vadd.f32 %v533_v17, %v532_v16 }
 0x1dc   :  { %v536_v20 = vadd.f32 %v535_v19, %v534_v18 }
 0x1de   :  { %v538_v22 = vadd.f32 %v537_v21, %v536_v20 }
 0x1e0   :  { %v539_v23 = vrot.slane %v538_v22, 4 }
 0x1e2   :  { %v540_v24 = vadd.f32 %v539_v23, %v538_v22 }
 0x1e4   :  { %v541_v25 = vrot.slane %v540_v24, 2 }
 0x1e6   :  { %v542_v26 = vadd.f32 %v541_v25, %v540_v24 }
 0x1e8   :  { %v543_v27 = vrot.slane %v542_v26, 1 }
 0x1ea   :  { %v544_v28 = vadd.f32 %v543_v27, %v542_v26 }
 0x1ec   :  { %555 = vrot.lane.b32.xlu2 %v544_v28, %s872_s0  ;;  %551 = vrot.lane.b32.xlu1 %v544_v28, %s874_s23 }
 0x1ed   :  { %547 = vrot.lane.b32.xlu0 %v544_v28, %s873_s22 }
 0x246   :  { %v556_v34 = vpop.permute.xlu2 %555 }
 0x25e   :  { %v552_v32 = vpop.permute.xlu1 %551 }
 0x25f   :  { %v548_v29 = vpop.permute.xlu0 %547 }
 0x260   :  { %v550_v30 = vadd.f32 %v548_v29, %v544_v28 }
 0x262   :  { %v554_v33 = vadd.f32 %v552_v32, %v550_v30 }
 0x264   :  { %v558_v37 = vadd.f32 %v556_v34, %v554_v33 }
 0x266   :  { %v559_v38 = vmul.f32 %v558_v37, %v505_v62 }
 0x268   :  { %v560_v40 = vadd.f32 1e-05, %v559_v38 }
 0x26a   :  { %870 = vrsqrt.f32 %v560_v40  ;;  %vm567_vm6 = vweird.f32 %v560_v40 }
 0x270   :  { %v871_v41 = vpop.eup %870 }
 0x271   :  { %v562_v42 = vmul.f32 %v871_v41, %v560_v40  ;;  %vm568_vm5 = vweird.f32 %v871_v41 }
 0x272   :  { %vm569_vm7 = vmor %vm567_vm6, %vm568_vm5 }
 0x273   :  { %v563_v43 = vmul.f32 %v871_v41, %v562_v42 }
 0x275   :  { %v564_v44 = vmul.f32 0.5, %v563_v43 }
 0x277   :  { %v565_v45 = vsub.f32 1.5, %v564_v44 }
 0x279   :  { %v566_v47 = vmul.f32 %v871_v41, %v565_v45 }
 0x27b   :  { %v570_v48 = vsel %vm569_vm7, %v871_v41, %v566_v47 }
 0x27c   :  { %v571_v49 = vmul.f32 %v570_v48, %v470_v46 }
 0x27e   :  { %v575_v50 = vperm.slane %v571_v49, 0  ;;  %v572_v51 = vmul.f32 %v571_v49, %v1093_v0 }
 0x280   :  { %582 = vrot.lane.b32.xlu2 %v575_v50, %s878_s26  ;;  %579 = vrot.lane.b32.xlu1 %v575_v50, %s876_s24  ;;  %v573_v53 = vsub.f32 %v471_v52, %v572_v51 }
 0x281   :  { %576 = vrot.lane.b32.xlu0 %v575_v50, %s877_s25 }
 0x282   :  { %v589_v54 = vperm.slane %v573_v53, 0 }
 0x288   :  { %596 = vrot.lane.b32.xlu2 %v589_v54, %s878_s26  ;;  %593 = vrot.lane.b32.xlu1 %v589_v54, %s876_s24 }
 0x289   :  { %590 = vrot.lane.b32.xlu0 %v589_v54, %s877_s25 }
 0x2da   :  { %v583_v56 = vpop.permute.xlu2 %582 }
 0x2e2   :  { %v597_v1 = vpop.permute.xlu2 %596 }
 0x2f2   :  { %v580_v55 = vpop.permute.xlu1 %579 }
 0x2f3   :  { %v577_v57 = vpop.permute.xlu0 %576 }
 0x2f4   :  { %v585_v58 = vsel %vm517_vm2, %v571_v49, %v577_v57 }
 0x2f5   :  { %v586_v59 = vsel %vm519_vm3, %v585_v58, %v580_v55 }
 0x2f6   :  { %v587_v60 = vsel %vm521_vm4, %v586_v59, %v583_v56 }
 0x2f7   :  { %v602_v61 = vperm.slane %v587_v60, 0 }
 0x2f9   :  { %v603_v3 = vmul.f32 %v602_v61, %v1074_v31  ;;  %v604_v5 = vmul.f32 %v602_v61, %v1078_v36  ;;  %v605_v6 = vmul.f32 %v602_v61, %v1076_v35  ;;  %v606_v7 = vmul.f32 %v602_v61, %v1084_v39 }
 0x2fa   :  { %v594_v62 = vpop.permute.xlu1 %593 }
 0x2fb   :  { %v591_v63 = vpop.permute.xlu0 %590 }
 0x2fc   :  { %v599_v0 = vsel %vm517_vm2, %v573_v53, %v591_v63 }
 0x2fd   :  { %v600_v2 = vsel %vm519_vm3, %v599_v0, %v594_v62 }
 0x2fe   :  { %v601_v4 = vsel %vm521_vm4, %v600_v2, %v597_v1 }
 0x2ff   :  { %v607_v8 = vperm.slane %v601_v4, 0 }
 0x301   :  { %v608_v9 = vadd.f32 %v607_v8, %v603_v3  ;;  %v609_v10 = vadd.f32 %v607_v8, %v604_v5  ;;  %v610_v11 = vadd.f32 %v607_v8, %v605_v6  ;;  %v611_v12 = vadd.f32 %v607_v8, %v606_v7 }
 0x303   :  { %v612_v13 = vpack.c.bf16 %v608_v9, %v608_v9  ;;  %v613_v14 = vpack.c.bf16 %v609_v10, %v609_v10  ;;  %v614_v15 = vpack.c.bf16 %v610_v11, %v610_v11  ;;  %v615_v16 = vpack.c.bf16 %v611_v12, %v611_v12 }
 0x305   :  { %617 = vst.msk [vmem:[%s1155_s4] sm:$0xf] %vm616_vm8, %v612_v13 }
 0x306   :  { %618 = vst.msk [vmem:[%s1155_s4 + $0x4] sm:$0xf] %vm616_vm8, %v613_v14 }
 0x307   :  { %619 = vst.msk [vmem:[%s1155_s4 + $0x8] sm:$0xf] %vm616_vm8, %v614_v15 }
 0x308   :  { %620 = vst.msk [vmem:[%s1155_s4 + $0xc] sm:$0xf] %vm616_vm8, %v615_v16 }

// kernel: _lambda_.12
= control target key start
LH: loop header
LB: loop body
LE: loop exit
PB: predicated region body
PF: predicated region fallthrough
CT: control target
= control target key end

     0   :  { %vm314_vm0 = vcmask 261120   ;;  %s1007_s14 = smov 120   ;;  %s1010_s15 = smov 16   ;;  %vm557_vm2 = vcmask 64512   ;;  %vm559_vm3 = vcmask 130048   ;;  %vm561_vm4 = vcmask 195584   ;;  %s1473_s1 = inlined_call_operand.vmem [shape: bf16[288,32], index: 1, kind: input, shape index: {}]   ;;  %s1474_s0 = inlined_call_operand.vmem [shape: bf16[128,288], index: 0, kind: input, shape index: {}]   ;;  %s1475_s2 = inlined_call_operand.vmem [shape: f32[1,8], index: 2, kind: input, shape index: {}]   ;;  %s1476_s3 = inlined_call_operand.vmem [shape: f32[1,8], index: 3, kind: input, shape index: {}]   ;;  %s1477_s4 = inlined_call_operand.vmem [shape: bf16[128,32], index: 4, kind: output, shape index: {}]  }
   0x1   :  { %v968_v0 = vld [vmem:[%s1473_s1 + $0x38] sm:$0xff]  ;;  %v978_v2 = vld [vmem:[%s1473_s1 + $0x88] sm:$0xff]  ;;  %v967_v3 = vld [vmem:[%s1473_s1 + $0x30] sm:$0xff]  ;;  %s1011_s16 = smov 8   ;;  %s1012_s17 = smov 24   ;;  %vm740_vm8 = vcmask 257024  }
   0x2   :  { %v976_v1 = vld [vmem:[%s1473_s1 + $0x78] sm:$0xff]  ;;  %339 = vmatpush.bf16.msra.mxu0 %v968_v0  ;;  %979 = vmatpush.bf16.msra.mxu3 %v968_v0  ;;  %v975_v4 = vld [vmem:[%s1473_s1 + $0x70] sm:$0xff]  ;;  %v977_v5 = vld [vmem:[%s1473_s1 + $0x80] sm:$0xff] }
   0x3   :  { %388 = vmatpush.bf16.msra.mxu1 %v976_v1  ;;  %443 = vmatpush.bf16.msra.mxu2 %v978_v2  ;;  %v771_v6 = vld [vmem:[%s1474_s0 + $0x8] sm:$0xf]  ;;  %v939_v7 = vld [vmem:[%s1474_s0 + $0x10] sm:$0xf0]  ;;  %v965_v11 = vld [vmem:[%s1473_s1 + $0x20] sm:$0xff] }
   0x4   :  { %v772_v8 = vor.u32 %v939_v7, %v771_v6  ;;  %v966_v9 = vld [vmem:[%s1473_s1 + $0x28] sm:$0xff]  ;;  %v973_v12 = vld [vmem:[%s1473_s1 + $0x60] sm:$0xff]  ;;  %v964_v13 = vld [vmem:[%s1473_s1 + $0x18] sm:$0xff] }
   0x5   :  { %v974_v10 = vld [vmem:[%s1473_s1 + $0x68] sm:$0xff]  ;;  %v972_v14 = vld [vmem:[%s1473_s1 + $0x58] sm:$0xff]  ;;  %v963_v15 = vld [vmem:[%s1473_s1 + $0x10] sm:$0xff] }
   0x6   :  { %340 = vmatpush.bf16.msra.mxu0 %v967_v3  ;;  %980 = vmatpush.bf16.msra.mxu3 %v967_v3  ;;  %v971_v16 = vld [vmem:[%s1473_s1 + $0x50] sm:$0xff]  ;;  %v783_v17 = vld [vmem:[%s1474_s0 + $0x20] sm:$0xf]  ;;  %v942_v18 = vld [vmem:[%s1474_s0 + $0x28] sm:$0xf0] }
   0x7   :  { %389 = vmatpush.bf16.msra.mxu1 %v975_v4  ;;  %444 = vmatpush.bf16.msra.mxu2 %v977_v5  ;;  %v784_v19 = vor.u32 %v942_v18, %v783_v17  ;;  %v962_v20 = vld [vmem:[%s1473_s1 + $0x8] sm:$0xff]  ;;  %v961_v22 = vld [vmem:[%s1473_s1] sm:$0xff]  ;;  %v835_v26 = vld [vmem:[%s1474_s0 + $0x90] sm:$0xf] }
   0x8   :  { %v970_v21 = vld [vmem:[%s1473_s1 + $0x48] sm:$0xff]  ;;  %v969_v23 = vld [vmem:[%s1473_s1 + $0x40] sm:$0xff]  ;;  %v956_v27 = vld [vmem:[%s1474_s0 + $0x98] sm:$0xf0]  ;;  %s1008_s1 = smov 112  }
   0x9   :  { %v763_v24 = vld [vmem:[%s1474_s0] sm:$0xf]  ;;  %v938_v25 = vld [vmem:[%s1474_s0 + $0x8] sm:$0xf0]  ;;  %v937_v28 = vld [vmem:[%s1474_s0 + $0x4] sm:$0xf]  ;;  %v836_v31 = vor.u32 %v956_v27, %v835_v26 }
   0xa   :  { %929 = vmatmul.msk.bf16.vlgmr.msra.gmra.mxu2 %vm314_vm0, %v772_v8  ;;  %341 = vmatpush.bf16.msra.mxu0 %v966_v9  ;;  %v765_v29 = vld [vmem:[%s1474_s0 + $0xc] sm:$0xf0]  ;;  %v764_v30 = vor.u32 %v938_v25, %v763_v24  ;;  %v795_v33 = vld [vmem:[%s1474_s0 + $0x38] sm:$0xf]  ;;  %v945_v34 = vld [vmem:[%s1474_s0 + $0x40] sm:$0xf0] }
   0xb   :  { %981 = vmatpush.bf16.msra.mxu3 %v966_v9  ;;  %390 = vmatpush.bf16.msra.mxu1 %v974_v10  ;;  %v768_v32 = vor.u32 %v937_v28, %v765_v29  ;;  %v796_v35 = vor.u32 %v945_v34, %v795_v33  ;;  %v775_v36 = vld [vmem:[%s1474_s0 + $0x18] sm:$0xf]  ;;  %v941_v37 = vld [vmem:[%s1474_s0 + $0x20] sm:$0xf0]  ;;  %v847_v38 = vld [vmem:[%s1474_s0 + $0xa8] sm:$0xf] }
   0xc   :  { %v959_v39 = vld [vmem:[%s1474_s0 + $0xb0] sm:$0xf0]  ;;  %v940_v40 = vld [vmem:[%s1474_s0 + $0x1c] sm:$0xf]  ;;  %v777_v41 = vld [vmem:[%s1474_s0 + $0x24] sm:$0xf0]  ;;  %v776_v42 = vor.u32 %v941_v37, %v775_v36 }
   0xd   :  { %v848_v43 = vor.u32 %v959_v39, %v847_v38  ;;  %v780_v44 = vor.u32 %v940_v40, %v777_v41  ;;  %v807_v45 = vld [vmem:[%s1474_s0 + $0x50] sm:$0xf]  ;;  %v948_v46 = vld [vmem:[%s1474_s0 + $0x58] sm:$0xf0]  ;;  %v943_v50 = vld [vmem:[%s1474_s0 + $0x34] sm:$0xf] }
   0xe   :  { %342 = vmatpush.bf16.msra.mxu0 %v965_v11  ;;  %v808_v47 = vor.u32 %v948_v46, %v807_v45  ;;  %v787_v48 = vld [vmem:[%s1474_s0 + $0x30] sm:$0xf]  ;;  %v944_v49 = vld [vmem:[%s1474_s0 + $0x38] sm:$0xf0]  ;;  %v789_v51 = vld [vmem:[%s1474_s0 + $0x3c] sm:$0xf0] }
   0xf   :  { %982 = vmatpush.bf16.msra.mxu3 %v965_v11  ;;  %391 = vmatpush.bf16.msra.mxu1 %v973_v12  ;;  %v955_v52 = vld [vmem:[%s1474_s0 + $0x94] sm:$0xf]  ;;  %v837_v53 = vld [vmem:[%s1474_s0 + $0x9c] sm:$0xf0]  ;;  %v788_v54 = vor.u32 %v944_v49, %v787_v48  ;;  %v792_v55 = vor.u32 %v943_v50, %v789_v51  ;;  %v819_v57 = vld [vmem:[%s1474_s0 + $0x68] sm:$0xf] }
  0x10   :  { %v840_v56 = vor.u32 %v955_v52, %v837_v53  ;;  %v951_v58 = vld [vmem:[%s1474_s0 + $0x70] sm:$0xf0]  ;;  %v799_v60 = vld [vmem:[%s1474_s0 + $0x48] sm:$0xf]  ;;  %v946_v62 = vld [vmem:[%s1474_s0 + $0x4c] sm:$0xf] }
  0x11   :  { %v820_v59 = vor.u32 %v951_v58, %v819_v57  ;;  %v947_v61 = vld [vmem:[%s1474_s0 + $0x50] sm:$0xf0]  ;;  %v801_v63 = vld [vmem:[%s1474_s0 + $0x54] sm:$0xf0]  ;;  %v958_v0 = vld [vmem:[%s1474_s0 + $0xac] sm:$0xf] }
  0x12   :  { %343 = vmatpush.bf16.msra.mxu0 %v964_v13  ;;  %v800_v2 = vor.u32 %v947_v61, %v799_v60  ;;  %v804_v3 = vor.u32 %v946_v62, %v801_v63  ;;  %v831_v5 = vld [vmem:[%s1474_s0 + $0x80] sm:$0xf]  ;;  %v954_v6 = vld [vmem:[%s1474_s0 + $0x88] sm:$0xf0]  ;;  %v813_v11 = vld [vmem:[%s1474_s0 + $0x6c] sm:$0xf0] }
  0x13   :  { %983 = vmatpush.bf16.msra.mxu3 %v964_v13  ;;  %392 = vmatpush.bf16.msra.mxu1 %v972_v14  ;;  %v832_v7 = vor.u32 %v954_v6, %v831_v5  ;;  %v811_v8 = vld [vmem:[%s1474_s0 + $0x60] sm:$0xf]  ;;  %v950_v9 = vld [vmem:[%s1474_s0 + $0x68] sm:$0xf0]  ;;  %v823_v17 = vld [vmem:[%s1474_s0 + $0x78] sm:$0xf] }
  0x14   :  { %v953_v18 = vld [vmem:[%s1474_s0 + $0x80] sm:$0xf0]  ;;  %v960_v24 = vld [vmem:[%s1474_s0 + $0xb8] sm:$0xf0] }
  0x16   :  { %344 = vmatpush.bf16.msra.mxu0 %v963_v15 }
  0x17   :  { %984 = vmatpush.bf16.msra.mxu3 %v963_v15  ;;  %393 = vmatpush.bf16.msra.mxu1 %v971_v16  ;;  %v957_v15 = vld [vmem:[%s1474_s0 + $0xa0] sm:$0xf0] }
  0x1a   :  { %930 = vmatmul.msk.bf16.gmra.mxu2 %vm314_vm0, %v784_v19  ;;  %345 = vmatpush.bf16.msra.mxu0 %v962_v20  ;;  %v952_v19 = vld [vmem:[%s1474_s0 + $0x7c] sm:$0xf] }
  0x1b   :  { %985 = vmatpush.bf16.msra.mxu3 %v962_v20  ;;  %394 = vmatpush.bf16.msra.mxu1 %v970_v21  ;;  %v825_v20 = vld [vmem:[%s1474_s0 + $0x84] sm:$0xf0] }
  0x1e   :  { %346 = vmatpush.bf16.msra.mxu0 %v961_v22 }
  0x1f   :  { %986 = vmatpush.bf16.msra.mxu3 %v961_v22  ;;  %395 = vmatpush.bf16.msra.mxu1 %v969_v23  ;;  %v828_v22 = vor.u32 %v952_v19, %v825_v20 }
  0x21   :  { %347 = vmatmul.bf16.vlgmr.msra.gmra.mxu0 %v764_v30 }
  0x22   :  { %377 = vmatmul.bf16.vlgmr.msra.gmra.mxu3 %v836_v31  ;;  %396 = vmatmul.bf16.vlgmr.msra.gmra.mxu1 %v768_v32 }
  0x23   :  { %987 = vmatpush.bf16.msrb.mxu3 %v976_v1  ;;  %v849_v1 = vld [vmem:[%s1474_s0 + $0xb4] sm:$0xf0] }
  0x27   :  { %988 = vmatpush.bf16.msrb.mxu3 %v975_v4  ;;  %v852_v4 = vor.u32 %v958_v0, %v849_v1 }
  0x2a   :  { %931 = vmatmul.msk.bf16.gmra.mxu2 %vm314_vm0, %v796_v35 }
  0x2b   :  { %989 = vmatpush.bf16.msrb.mxu3 %v974_v10  ;;  %v949_v10 = vld [vmem:[%s1474_s0 + $0x64] sm:$0xf] }
  0x2c   :  { %v816_v13 = vor.u32 %v949_v10, %v813_v11 }
  0x2f   :  { %990 = vmatpush.bf16.msrb.mxu3 %v973_v12  ;;  %v812_v12 = vor.u32 %v950_v9, %v811_v8 }
  0x31   :  { %352 = vmatmul.bf16.gmra.mxu0 %v776_v42 }
  0x32   :  { %382 = vmatmul.bf16.gmra.mxu3 %v848_v43  ;;  %401 = vmatmul.bf16.gmra.mxu1 %v780_v44 }
  0x33   :  { %991 = vmatpush.bf16.msrb.mxu3 %v972_v14  ;;  %v843_v14 = vld [vmem:[%s1474_s0 + $0x98] sm:$0xf] }
  0x37   :  { %992 = vmatpush.bf16.msrb.mxu3 %v971_v16  ;;  %v844_v16 = vor.u32 %v957_v15, %v843_v14 }
  0x3a   :  { %932 = vmatmul.msk.bf16.gmra.mxu2 %vm314_vm0, %v808_v47 }
  0x3b   :  { %993 = vmatpush.bf16.msrb.mxu3 %v970_v21  ;;  %v824_v21 = vor.u32 %v953_v18, %v823_v17 }
  0x3f   :  { %994 = vmatpush.bf16.msrb.mxu3 %v969_v23  ;;  %v855_v23 = vld [vmem:[%s1474_s0 + $0xb0] sm:$0xf]  ;;  %s1006_s0 = smov 104  }
  0x40   :  { %v856_v25 = vor.u32 %v960_v24, %v855_v23 }
  0x41   :  { %357 = vmatmul.bf16.gmra.mxu0 %v788_v54 }
  0x42   :  { %406 = vmatmul.bf16.gmra.mxu1 %v792_v55  ;;  %426 = vmatmul.bf16.vlgmr.msrb.gmra.mxu3 %v840_v56 }
  0x4a   :  { %933 = vmatmul.msk.bf16.gmra.mxu2 %vm314_vm0, %v820_v59 }
  0x51   :  { %362 = vmatmul.bf16.gmra.mxu0 %v800_v2 }
  0x52   :  { %411 = vmatmul.bf16.gmra.mxu1 %v804_v3  ;;  %431 = vmatmul.bf16.gmra.mxu3 %v852_v4 }
  0x5a   :  { %934 = vmatmul.msk.bf16.gmra.mxu2 %vm314_vm0, %v832_v7 }
  0x61   :  { %367 = vmatmul.bf16.gmra.mxu0 %v812_v12 }
  0x62   :  { %416 = vmatmul.bf16.gmra.mxu1 %v816_v13 }
  0x6a   :  { %935 = vmatmul.msk.bf16.gmra.mxu2 %vm314_vm0, %v844_v16 }
  0x71   :  { %372 = vmatmul.bf16.gmra.mxu0 %v824_v21 }
  0x72   :  { %421 = vmatmul.bf16.gmra.mxu1 %v828_v22 }
  0x7a   :  { %936 = vmatmul.msk.bf16.gmra.mxu2 %vm314_vm0, %v856_v25 }
  0x8d   :  { %v446_v26 = vpop.f32.mrf.mxu2 }
  0x95   :  { %v448_v27 = vpop.f32.mrf.mxu2 }
  0x9d   :  { %v451_v28 = vpop.f32.mrf.mxu2 }
  0x9e   :  { %v348_v29 = vpop.f32.mrf.mxu0 }
  0x9f   :  { %v397_v30 = vpop.f32.mrf.mxu1 }
  0xa0   :  { %v398_v31 = vadd.f32 %v397_v30, %v348_v29 }
  0xa2   :  { %v1244_v32 = vadd.f32 %v446_v26, %v398_v31 }
  0xa4   :  { %v488_v10 = vsel %vm314_vm0, %v1244_v32, 0.0 }
  0xa5   :  { %v453_v33 = vpop.f32.mrf.mxu2  ;;  %v1246_v42 = vpop.f32.mrf.mxu3 }
  0xa6   :  { %v350_v34 = vpop.f32.mrf.mxu0 }
  0xa7   :  { %v399_v35 = vpop.f32.mrf.mxu1 }
  0xa8   :  { %v400_v59 = vadd.f32 %v399_v35, %v350_v34 }
  0xaa   :  { %v1254_v63 = vadd.f32 %v448_v27, %v400_v59 }
  0xac   :  { %v489_v5 = vsel %vm314_vm0, %v1254_v63, 0.0 }
  0xad   :  { %v456_v36 = vpop.f32.mrf.mxu2  ;;  %v1248_v46 = vpop.f32.mrf.mxu3  ;;  %v490_v14 = vadd.f32 %v489_v5, %v488_v10 }
  0xae   :  { %v353_v37 = vpop.f32.mrf.mxu0 }
  0xaf   :  { %v402_v38 = vpop.f32.mrf.mxu1 }
  0xb0   :  { %v403_v62 = vadd.f32 %v402_v38, %v353_v37 }
  0xb2   :  { %v1256_v2 = vadd.f32 %v451_v28, %v403_v62 }
  0xb4   :  { %v491_v11 = vsel %vm314_vm0, %v1256_v2, 0.0 }
  0xb5   :  { %v458_v39 = vpop.f32.mrf.mxu2  ;;  %v1250_v52 = vpop.f32.mrf.mxu3  ;;  %v492_v18 = vadd.f32 %v491_v11, %v490_v14 }
  0xb6   :  { %v355_v40 = vpop.f32.mrf.mxu0 }
  0xb7   :  { %v404_v41 = vpop.f32.mrf.mxu1 }
  0xb8   :  { %v405_v0 = vadd.f32 %v404_v41, %v355_v40 }
  0xba   :  { %v1260_v6 = vadd.f32 %v453_v33, %v405_v0 }
  0xbc   :  { %v493_v15 = vsel %vm314_vm0, %v1260_v6, 0.0 }
  0xbd   :  { %v461_v43 = vpop.f32.mrf.mxu2  ;;  %v1252_v57 = vpop.f32.mrf.mxu3  ;;  %v494_v22 = vadd.f32 %v493_v15, %v492_v18 }
  0xbe   :  { %v358_v44 = vpop.f32.mrf.mxu0 }
  0xbf   :  { %v407_v45 = vpop.f32.mrf.mxu1 }
  0xc0   :  { %v408_v3 = vadd.f32 %v407_v45, %v358_v44 }
  0xc2   :  { %v1266_v12 = vadd.f32 %v456_v36, %v408_v3 }
  0xc4   :  { %v495_v19 = vsel %vm314_vm0, %v1266_v12, 0.0 }
  0xc5   :  { %v463_v47 = vpop.f32.mrf.mxu2  ;;  %v427_v1 = vpop.f32.mrf.mxu3  ;;  %v496_v29 = vadd.f32 %v495_v19, %v494_v22 }
  0xc6   :  { %v360_v48 = vpop.f32.mrf.mxu0 }
  0xc7   :  { %v409_v49 = vpop.f32.mrf.mxu1 }
  0xc8   :  { %v410_v7 = vadd.f32 %v409_v49, %v360_v48 }
  0xca   :  { %v1270_v16 = vadd.f32 %v458_v39, %v410_v7 }
  0xcc   :  { %v497_v25 = vsel %vm314_vm0, %v1270_v16, 0.0 }
  0xcd   :  { %v466_v50 = vpop.f32.mrf.mxu2  ;;  %v429_v23 = vpop.f32.mrf.mxu3  ;;  %v498_v35 = vadd.f32 %v497_v25, %v496_v29 }
  0xce   :  { %v363_v51 = vpop.f32.mrf.mxu0  ;;  %v430_v59 = vadd.f32 %v429_v23, %v1248_v46 }
  0xcf   :  { %v412_v53 = vpop.f32.mrf.mxu1 }
  0xd0   :  { %v413_v13 = vadd.f32 %v412_v53, %v363_v51 }
  0xd2   :  { %v1274_v20 = vadd.f32 %v461_v43, %v413_v13 }
  0xd4   :  { %v499_v31 = vsel %vm314_vm0, %v1274_v20, 0.0 }
  0xd5   :  { %v468_v54 = vpop.f32.mrf.mxu2  ;;  %v500_v38 = vadd.f32 %v499_v31, %v498_v35 }
  0xd6   :  { %v365_v55 = vpop.f32.mrf.mxu0 }
  0xd7   :  { %v414_v56 = vpop.f32.mrf.mxu1 }
  0xd8   :  { %v415_v17 = vadd.f32 %v414_v56, %v365_v55 }
  0xda   :  { %v1278_v26 = vadd.f32 %v463_v47, %v415_v17  ;;  %v432_v47 = vpop.f32.mrf.mxu3 }
  0xdb   :  { %v433_v3 = vadd.f32 %v432_v47, %v1250_v52 }
  0xdc   :  { %v501_v36 = vsel %vm314_vm0, %v1278_v26, 0.0 }
  0xdd   :  { %v471_v58 = vpop.f32.mrf.mxu2  ;;  %v502_v41 = vadd.f32 %v501_v36, %v500_v38 }
  0xde   :  { %v368_v60 = vpop.f32.mrf.mxu0 }
  0xdf   :  { %v417_v61 = vpop.f32.mrf.mxu1 }
  0xe0   :  { %v418_v21 = vadd.f32 %v417_v61, %v368_v60 }
  0xe2   :  { %v1282_v33 = vadd.f32 %v466_v50, %v418_v21  ;;  %v428_v50 = vadd.f32 %v427_v1, %v1246_v42  ;;  %v434_v5 = vpop.f32.mrf.mxu3 }
  0xe4   :  { %v503_v39 = vsel %vm314_vm0, %v1282_v33, 0.0 }
  0xe5   :  { %v473_v4 = vpop.f32.mrf.mxu2  ;;  %v504_v48 = vadd.f32 %v503_v39, %v502_v41 }
  0xe6   :  { %v370_v8 = vpop.f32.mrf.mxu0 }
  0xe7   :  { %v419_v9 = vpop.f32.mrf.mxu1 }
  0xe8   :  { %v420_v27 = vadd.f32 %v419_v9, %v370_v8  ;;  %v435_v8 = vadd.f32 %v434_v5, %v1252_v57  ;;  %v1009_v57 = vmov 512.0  }
  0xe9   :  { %1002 = vrcp.f32 %v1009_v57 }
  0xea   :  { %v1286_v37 = vadd.f32 %v468_v54, %v420_v27 }
  0xec   :  { %v505_v44 = vsel %vm314_vm0, %v1286_v37, 0.0 }
  0xed   :  { %v476_v24 = vpop.f32.mrf.mxu2  ;;  %v506_v54 = vadd.f32 %v505_v44, %v504_v48 }
  0xee   :  { %v373_v28 = vpop.f32.mrf.mxu0  ;;  %v1297_v55 = vadd.f32 %v476_v24, %v428_v50 }
  0xef   :  { %v422_v30 = vpop.f32.mrf.mxu1  ;;  %v1003_v23 = vpop.eup %1002 }
  0xf0   :  { %v423_v34 = vadd.f32 %v422_v30, %v373_v28  ;;  %v511_v42 = vsel %vm314_vm0, %v1297_v55, 0.0  ;;  %v540_v24 = vmul.f32 512.0, %v1003_v23  ;;  %vm544_vm1 = vweird.f32 %v1003_v23 }
  0xf2   :  { %v1290_v40 = vadd.f32 %v471_v58, %v423_v34  ;;  %v541_v25 = vsub.f32 1.0, %v540_v24 }
  0xf4   :  { %v507_v51 = vsel %vm314_vm0, %v1290_v40, 0.0  ;;  %v542_v28 = vmul.f32 %v1003_v23, %v541_v25 }
  0xf5   :  { %v478_v43 = vpop.f32.mrf.mxu2  ;;  %v508_v58 = vadd.f32 %v507_v51, %v506_v54 }
  0xf6   :  { %v375_v45 = vpop.f32.mrf.mxu0  ;;  %v1306_v0 = vadd.f32 %v478_v43, %v430_v59  ;;  %v543_v29 = vadd.f32 %v1003_v23, %v542_v28 }
  0xf7   :  { %v424_v49 = vpop.f32.mrf.mxu1 }
  0xf8   :  { %v425_v53 = vadd.f32 %v424_v49, %v375_v45  ;;  %v1323_v36 = vsel %vm544_vm1, %v1003_v23, %v543_v29 }
  0xfa   :  { %v1299_v56 = vadd.f32 %v473_v4, %v425_v53  ;;  %v513_v4 = vsel %vm314_vm0, %v1306_v0, 0.0 }
  0xfc   :  { %v509_v60 = vsel %vm314_vm0, %v1299_v56, 0.0 }
  0xfd   :  { %v510_v61 = vadd.f32 %v509_v60, %v508_v58  ;;  %v481_v62 = vpop.f32.mrf.mxu2 }
  0xfe   :  { %v1311_v7 = vadd.f32 %v481_v62, %v433_v3 }
  0xff   :  { %v512_v1 = vadd.f32 %v511_v42, %v510_v61 }
 0x100   :  { %v515_v10 = vsel %vm314_vm0, %v1311_v7, 0.0 }
 0x101   :  { %v514_v46 = vadd.f32 %v513_v4, %v512_v1 }
 0x103   :  { %v516_v13 = vadd.f32 %v515_v10, %v514_v46 }
 0x105   :  { %v483_v9 = vpop.f32.mrf.mxu2 }
 0x106   :  { %v1316_v11 = vadd.f32 %v483_v9, %v435_v8 }
 0x108   :  { %v517_v14 = vsel %vm314_vm0, %v1316_v11, 0.0 }
 0x109   :  { %v518_v52 = vadd.f32 %v517_v14, %v516_v13 }
 0x10b   :  { %v519_v15 = vrot.slane %v518_v52, 4 }
 0x10d   :  { %v520_v17 = vadd.f32 %v519_v15, %v518_v52 }
 0x10f   :  { %v521_v18 = vrot.slane %v520_v17, 2 }
 0x111   :  { %v522_v19 = vadd.f32 %v521_v18, %v520_v17 }
 0x113   :  { %v523_v21 = vrot.slane %v522_v19, 1 }
 0x115   :  { %v524_v22 = vadd.f32 %v523_v21, %v522_v19 }
 0x117   :  { %535 = vrot.lane.b32.xlu1 %v524_v22, %s1006_s0  ;;  %527 = vrot.lane.b32.xlu0 %v524_v22, %s1007_s14 }
 0x11f   :  { %531 = vrot.lane.b32.xlu0 %v524_v22, %s1008_s1 }
 0x189   :  { %v528_v27 = vpop.permute.xlu0 %527  ;;  %v536_v35 = vpop.permute.xlu1 %535 }
 0x18a   :  { %v530_v30 = vadd.f32 %v528_v27, %v524_v22 }
 0x191   :  { %v532_v31 = vpop.permute.xlu0 %531 }
 0x192   :  { %v534_v34 = vadd.f32 %v532_v31, %v530_v30 }
 0x194   :  { %v538_v38 = vadd.f32 %v536_v35, %v534_v34 }
 0x196   :  { %v1326_v39 = vmul.f32 %v1323_v36, %v538_v38 }
 0x198   :  { %551 = vrot.lane.b32.xlu2 %v1326_v39, %s1010_s15  ;;  %548 = vrot.lane.b32.xlu1 %v1326_v39, %s1011_s16 }
 0x1a0   :  { %554 = vrot.lane.b32.xlu2 %v1326_v39, %s1012_s17 }
 0x1f2   :  { %v552_v41 = vpop.permute.xlu2 %551 }
 0x1fa   :  { %v555_v45 = vpop.permute.xlu2 %554 }
 0x20a   :  { %v549_v43 = vpop.permute.xlu1 %548 }
 0x20b   :  { %v558_v44 = vsel %vm557_vm2, %v1326_v39, %v549_v43 }
 0x20c   :  { %v560_v47 = vsel %vm559_vm3, %v558_v44, %v552_v41 }
 0x20d   :  { %v562_v48 = vsel %vm561_vm4, %v560_v47, %v555_v45 }
 0x20e   :  { %v563_v49 = vperm.slane %v562_v48, 0 }
 0x210   :  { %v564_v50 = vsub.f32 %v1244_v32, %v563_v49  ;;  %v565_v51 = vsub.f32 %v1254_v63, %v563_v49  ;;  %v566_v53 = vsub.f32 %v1256_v2, %v563_v49  ;;  %v567_v54 = vsub.f32 %v1260_v6, %v563_v49 }
 0x211   :  { %v568_v60 = vsub.f32 %v1266_v12, %v563_v49  ;;  %v569_v62 = vsub.f32 %v1270_v16, %v563_v49  ;;  %v570_v4 = vsub.f32 %v1274_v20, %v563_v49  ;;  %v571_v10 = vsub.f32 %v1278_v26, %v563_v49 }
 0x212   :  { %v580_v58 = vmul.f32 %v564_v50, %v564_v50  ;;  %v581_v59 = vmul.f32 %v565_v51, %v565_v51  ;;  %v582_v61 = vmul.f32 %v566_v53, %v566_v53  ;;  %v583_v42 = vmul.f32 %v567_v54, %v567_v54 }
 0x213   :  { %v584_v46 = vmul.f32 %v568_v60, %v568_v60  ;;  %v585_v13 = vmul.f32 %v569_v62, %v569_v62  ;;  %v572_v15 = vsub.f32 %v1282_v33, %v563_v49  ;;  %v586_v17 = vmul.f32 %v570_v4, %v570_v4 }
 0x214   :  { %v596_v1 = vsel %vm314_vm0, %v580_v58, 0.0  ;;  %v597_v3 = vsel %vm314_vm0, %v581_v59, 0.0  ;;  %v599_v8 = vsel %vm314_vm0, %v582_v61, 0.0  ;;  %v601_v14 = vsel %vm314_vm0, %v583_v42, 0.0 }
 0x215   :  { %v598_v5 = vadd.f32 %v597_v3, %v596_v1  ;;  %v603_v18 = vsel %vm314_vm0, %v584_v46, 0.0  ;;  %v573_v21 = vsub.f32 %v1286_v37, %v563_v49  ;;  %v587_v22 = vmul.f32 %v571_v10, %v571_v10 }
 0x216   :  { %v605_v57 = vsel %vm314_vm0, %v585_v13, 0.0  ;;  %v574_v24 = vsub.f32 %v1290_v40, %v563_v49  ;;  %v588_v25 = vmul.f32 %v572_v15, %v572_v15  ;;  %v607_v27 = vsel %vm314_vm0, %v586_v17, 0.0 }
 0x217   :  { %v600_v9 = vadd.f32 %v599_v8, %v598_v5  ;;  %v575_v29 = vsub.f32 %v1299_v56, %v563_v49  ;;  %v589_v30 = vmul.f32 %v573_v21, %v573_v21  ;;  %v609_v31 = vsel %vm314_vm0, %v587_v22, 0.0 }
 0x218   :  { %v576_v35 = vsub.f32 %v1297_v55, %v563_v49  ;;  %v590_v38 = vmul.f32 %v574_v24, %v574_v24  ;;  %v611_v41 = vsel %vm314_vm0, %v588_v25, 0.0  ;;  %v577_v44 = vsub.f32 %v1306_v0, %v563_v49 }
 0x219   :  { %v602_v52 = vadd.f32 %v601_v14, %v600_v9  ;;  %v591_v45 = vmul.f32 %v575_v29, %v575_v29  ;;  %v613_v47 = vsel %vm314_vm0, %v589_v30, 0.0  ;;  %v578_v50 = vsub.f32 %v1311_v7, %v563_v49 }
 0x21a   :  { %v592_v51 = vmul.f32 %v576_v35, %v576_v35  ;;  %v615_v53 = vsel %vm314_vm0, %v590_v38, 0.0  ;;  %v579_v58 = vsub.f32 %v1316_v11, %v563_v49  ;;  %v593_v59 = vmul.f32 %v577_v44, %v577_v44  ;;  %v487_v44 = vld [vmem:[%s1476_s3] sm:$0x1] }
 0x21b   :  { %v604_v19 = vadd.f32 %v603_v18, %v602_v52  ;;  %v617_v60 = vsel %vm314_vm0, %v591_v45, 0.0  ;;  %v594_v62 = vmul.f32 %v578_v50, %v578_v50 }
 0x21c   :  { %v619_v42 = vsel %vm314_vm0, %v592_v51, 0.0  ;;  %v595_v3 = vmul.f32 %v579_v58, %v579_v58  ;;  %v621_v5 = vsel %vm314_vm0, %v593_v59, 0.0 }
 0x21d   :  { %v606_v23 = vadd.f32 %v605_v57, %v604_v19  ;;  %v623_v46 = vsel %vm314_vm0, %v594_v62, 0.0 }
 0x21e   :  { %v625_v9 = vsel %vm314_vm0, %v595_v3, 0.0 }
 0x21f   :  { %v608_v28 = vadd.f32 %v607_v27, %v606_v23 }
 0x221   :  { %v610_v34 = vadd.f32 %v609_v31, %v608_v28 }
 0x223   :  { %v612_v43 = vadd.f32 %v611_v41, %v610_v34  ;;  %v486_v34 = vld [vmem:[%s1475_s2] sm:$0x1] }
 0x225   :  { %v614_v48 = vadd.f32 %v613_v47, %v612_v43 }
 0x227   :  { %v616_v54 = vadd.f32 %v615_v53, %v614_v48 }
 0x229   :  { %v618_v61 = vadd.f32 %v617_v60, %v616_v54 }
 0x22b   :  { %v620_v1 = vadd.f32 %v619_v42, %v618_v61 }
 0x22d   :  { %v622_v4 = vadd.f32 %v621_v5, %v620_v1 }
 0x22f   :  { %v624_v8 = vadd.f32 %v623_v46, %v622_v4 }
 0x231   :  { %v626_v10 = vadd.f32 %v625_v9, %v624_v8 }
 0x233   :  { %v627_v13 = vrot.slane %v626_v10, 4 }
 0x235   :  { %v628_v49 = vadd.f32 %v627_v13, %v626_v10 }
 0x237   :  { %v629_v14 = vrot.slane %v628_v49, 2 }
 0x239   :  { %v630_v52 = vadd.f32 %v629_v14, %v628_v49 }
 0x23b   :  { %v631_v15 = vrot.slane %v630_v52, 1 }
 0x23d   :  { %v632_v17 = vadd.f32 %v631_v15, %v630_v52 }
 0x23f   :  { %643 = vrot.lane.b32.xlu2 %v632_v17, %s1006_s0  ;;  %639 = vrot.lane.b32.xlu1 %v632_v17, %s1008_s1 }
 0x240   :  { %635 = vrot.lane.b32.xlu0 %v632_v17, %s1007_s14 }
 0x299   :  { %v644_v57 = vpop.permute.xlu2 %643 }
 0x2b1   :  { %v640_v21 = vpop.permute.xlu1 %639 }
 0x2b2   :  { %v636_v18 = vpop.permute.xlu0 %635 }
 0x2b3   :  { %v638_v19 = vadd.f32 %v636_v18, %v632_v17 }
 0x2b5   :  { %v642_v22 = vadd.f32 %v640_v21, %v638_v19 }
 0x2b7   :  { %v646_v23 = vadd.f32 %v644_v57, %v642_v22 }
 0x2b9   :  { %v647_v24 = vmul.f32 %v646_v23, %v1323_v36 }
 0x2bb   :  { %v648_v25 = vadd.f32 1e-05, %v647_v24 }
 0x2bd   :  { %1004 = vrsqrt.f32 %v648_v25  ;;  %vm655_vm6 = vweird.f32 %v648_v25 }
 0x2c3   :  { %v1005_v27 = vpop.eup %1004 }
 0x2c4   :  { %v650_v28 = vmul.f32 %v1005_v27, %v648_v25  ;;  %vm656_vm5 = vweird.f32 %v1005_v27 }
 0x2c5   :  { %vm657_vm7 = vmor %vm655_vm6, %vm656_vm5 }
 0x2c6   :  { %v651_v29 = vmul.f32 %v1005_v27, %v650_v28 }
 0x2c8   :  { %v652_v30 = vmul.f32 0.5, %v651_v29 }
 0x2ca   :  { %v653_v31 = vsub.f32 1.5, %v652_v30 }
 0x2cc   :  { %v654_v35 = vmul.f32 %v1005_v27, %v653_v31 }
 0x2ce   :  { %v658_v38 = vsel %vm657_vm7, %v1005_v27, %v654_v35 }
 0x2cf   :  { %v659_v41 = vmul.f32 %v658_v38, %v486_v34 }
 0x2d1   :  { %v663_v43 = vperm.slane %v659_v41, 0  ;;  %v660_v36 = vmul.f32 %v659_v41, %v1326_v39 }
 0x2d3   :  { %670 = vrot.lane.b32.xlu2 %v663_v43, %s1012_s17  ;;  %667 = vrot.lane.b32.xlu1 %v663_v43, %s1010_s15  ;;  %v661_v45 = vsub.f32 %v487_v44, %v660_v36 }
 0x2d4   :  { %664 = vrot.lane.b32.xlu0 %v663_v43, %s1011_s16 }
 0x2d5   :  { %v677_v47 = vperm.slane %v661_v45, 0 }
 0x2db   :  { %684 = vrot.lane.b32.xlu2 %v677_v47, %s1012_s17  ;;  %681 = vrot.lane.b32.xlu1 %v677_v47, %s1010_s15 }
 0x2dc   :  { %678 = vrot.lane.b32.xlu0 %v677_v47, %s1011_s16 }
 0x32d   :  { %v671_v50 = vpop.permute.xlu2 %670 }
 0x335   :  { %v685_v62 = vpop.permute.xlu2 %684 }
 0x345   :  { %v668_v48 = vpop.permute.xlu1 %667 }
 0x346   :  { %v665_v39 = vpop.permute.xlu0 %664 }
 0x347   :  { %v673_v51 = vsel %vm557_vm2, %v659_v41, %v665_v39 }
 0x348   :  { %v674_v53 = vsel %vm559_vm3, %v673_v51, %v668_v48 }
 0x349   :  { %v675_v54 = vsel %vm561_vm4, %v674_v53, %v671_v50 }
 0x34a   :  { %v690_v60 = vperm.slane %v675_v54, 0 }
 0x34c   :  { %v691_v3 = vmul.f32 %v690_v60, %v1244_v32  ;;  %v692_v5 = vmul.f32 %v690_v60, %v1254_v63  ;;  %v693_v4 = vmul.f32 %v690_v60, %v1256_v2  ;;  %v694_v8 = vmul.f32 %v690_v60, %v1260_v6 }
 0x34d   :  { %v682_v58 = vpop.permute.xlu1 %681  ;;  %v695_v9 = vmul.f32 %v690_v60, %v1266_v12  ;;  %v696_v14 = vmul.f32 %v690_v60, %v1270_v16  ;;  %v697_v15 = vmul.f32 %v690_v60, %v1274_v20  ;;  %v698_v32 = vmul.f32 %v690_v60, %v1278_v26 }
 0x34e   :  { %v679_v59 = vpop.permute.xlu0 %678  ;;  %v699_v63 = vmul.f32 %v690_v60, %v1282_v33  ;;  %v700_v12 = vmul.f32 %v690_v60, %v1286_v37  ;;  %v701_v16 = vmul.f32 %v690_v60, %v1290_v40  ;;  %v702_v20 = vmul.f32 %v690_v60, %v1299_v56 }
 0x34f   :  { %v687_v61 = vsel %vm557_vm2, %v661_v45, %v679_v59  ;;  %v703_v37 = vmul.f32 %v690_v60, %v1297_v55  ;;  %v704_v27 = vmul.f32 %v690_v60, %v1306_v0  ;;  %v705_v29 = vmul.f32 %v690_v60, %v1311_v7 }
 0x350   :  { %v688_v42 = vsel %vm559_vm3, %v687_v61, %v682_v58  ;;  %v706_v31 = vmul.f32 %v690_v60, %v1316_v11 }
 0x351   :  { %v689_v1 = vsel %vm561_vm4, %v688_v42, %v685_v62 }
 0x352   :  { %v707_v46 = vperm.slane %v689_v1, 0 }
 0x354   :  { %v708_v10 = vadd.f32 %v707_v46, %v691_v3  ;;  %v709_v13 = vadd.f32 %v707_v46, %v692_v5  ;;  %v710_v49 = vadd.f32 %v707_v46, %v693_v4  ;;  %v711_v52 = vadd.f32 %v707_v46, %v694_v8 }
 0x355   :  { %v712_v17 = vadd.f32 %v707_v46, %v695_v9  ;;  %v713_v2 = vadd.f32 %v707_v46, %v696_v14  ;;  %v714_v18 = vadd.f32 %v707_v46, %v697_v15  ;;  %v715_v22 = vadd.f32 %v707_v46, %v698_v32 }
 0x356   :  { %v724_v19 = vpack.c.bf16 %v708_v10, %v708_v10  ;;  %v725_v6 = vpack.c.bf16 %v709_v13, %v709_v13  ;;  %v726_v21 = vpack.c.bf16 %v710_v49, %v710_v49  ;;  %v727_v57 = vpack.c.bf16 %v711_v52, %v711_v52 }
 0x357   :  { %v716_v23 = vadd.f32 %v707_v46, %v699_v63  ;;  %v728_v24 = vpack.c.bf16 %v712_v17, %v712_v17  ;;  %v717_v26 = vadd.f32 %v707_v46, %v700_v12  ;;  %v729_v33 = vpack.c.bf16 %v713_v2, %v713_v2 }
 0x358   :  { %741 = vst.msk [vmem:[%s1477_s4] sm:$0xf] %vm740_vm8, %v724_v19  ;;  %v718_v25 = vadd.f32 %v707_v46, %v701_v16  ;;  %v730_v40 = vpack.c.bf16 %v714_v18, %v714_v18  ;;  %v719_v28 = vadd.f32 %v707_v46, %v702_v20  ;;  %v731_v56 = vpack.c.bf16 %v715_v22, %v715_v22 }
 0x359   :  { %742 = vst.msk [vmem:[%s1477_s4 + $0x4] sm:$0xf] %vm740_vm8, %v725_v6  ;;  %v720_v30 = vadd.f32 %v707_v46, %v703_v37  ;;  %v732_v55 = vpack.c.bf16 %v716_v23, %v716_v23  ;;  %v721_v34 = vadd.f32 %v707_v46, %v704_v27  ;;  %v733_v0 = vpack.c.bf16 %v717_v26, %v717_v26 }
 0x35a   :  { %743 = vst.msk [vmem:[%s1477_s4 + $0x8] sm:$0xf] %vm740_vm8, %v726_v21  ;;  %v722_v35 = vadd.f32 %v707_v46, %v705_v29  ;;  %v734_v38 = vpack.c.bf16 %v718_v25, %v718_v25  ;;  %v723_v7 = vadd.f32 %v707_v46, %v706_v31  ;;  %v735_v41 = vpack.c.bf16 %v719_v28, %v719_v28 }
 0x35b   :  { %744 = vst.msk [vmem:[%s1477_s4 + $0xc] sm:$0xf] %vm740_vm8, %v727_v57  ;;  %v736_v11 = vpack.c.bf16 %v720_v30, %v720_v30  ;;  %v737_v43 = vpack.c.bf16 %v721_v34, %v721_v34 }
 0x35c   :  { %745 = vst.msk [vmem:[%s1477_s4 + $0x10] sm:$0xf] %vm740_vm8, %v728_v24  ;;  %v738_v36 = vpack.c.bf16 %v722_v35, %v722_v35  ;;  %v739_v44 = vpack.c.bf16 %v723_v7, %v723_v7 }
 0x35d   :  { %746 = vst.msk [vmem:[%s1477_s4 + $0x14] sm:$0xf] %vm740_vm8, %v729_v33 }
 0x35e   :  { %747 = vst.msk [vmem:[%s1477_s4 + $0x18] sm:$0xf] %vm740_vm8, %v730_v40 }
 0x35f   :  { %748 = vst.msk [vmem:[%s1477_s4 + $0x1c] sm:$0xf] %vm740_vm8, %v731_v56 }
 0x360   :  { %749 = vst.msk [vmem:[%s1477_s4 + $0x20] sm:$0xf] %vm740_vm8, %v732_v55 }
 0x361   :  { %750 = vst.msk [vmem:[%s1477_s4 + $0x24] sm:$0xf] %vm740_vm8, %v733_v0 }
 0x362   :  { %751 = vst.msk [vmem:[%s1477_s4 + $0x28] sm:$0xf] %vm740_vm8, %v734_v38 }
 0x363   :  { %752 = vst.msk [vmem:[%s1477_s4 + $0x2c] sm:$0xf] %vm740_vm8, %v735_v41 }
 0x364   :  { %753 = vst.msk [vmem:[%s1477_s4 + $0x30] sm:$0xf] %vm740_vm8, %v736_v11 }
 0x365   :  { %754 = vst.msk [vmem:[%s1477_s4 + $0x34] sm:$0xf] %vm740_vm8, %v737_v43 }
 0x366   :  { %755 = vst.msk [vmem:[%s1477_s4 + $0x38] sm:$0xf] %vm740_vm8, %v738_v36 }
 0x367   :  { %756 = vst.msk [vmem:[%s1477_s4 + $0x3c] sm:$0xf] %vm740_vm8, %v739_v44 }

// kernel: _lambda_.13
= control target key start
LH: loop header
LB: loop body
LE: loop exit
PB: predicated region body
PF: predicated region fallthrough
CT: control target
= control target key end

     0   :  { %s1795_s12 = smov 0   ;;  %s2418_s0 = inlined_call_operand.vmem [shape: bf16[512,144], index: 0, kind: input, shape index: {}]   ;;  %s2419_s1 = inlined_call_operand.vmem [shape: bf16[144,12], index: 1, kind: input, shape index: {}]   ;;  %s2420_s2 = inlined_call_operand.vmem [shape: f32[1,12], index: 2, kind: input, shape index: {}]   ;;  %s2421_s3 = inlined_call_operand.vmem [shape: f32[512,12], index: 3, kind: output, shape index: {}]  }
   0x1 LB: > { %s1354_s13 = sadd.s32 4294967295, %s1773_s12   ;;  %p1358_p0 = scmp.ge.s32.totalorder %s1773_s12, 1  ;;  %s1773_s12 = sphi %s1795_s12, %s13_s12  }
   0x2   : > { %p139_p1 = scmp.lt.s32.totalorder %s1773_s12, 3 }
   0x4   : > { %p140_p2 = pnand %p1358_p0, %p139_p1 }
   0x5   : > { %s1359_s18 = sshll.u32 (!%p140_p2), %s1354_s13, 5 }
   0x6   : > { %143 = sbr.rel (%p140_p2) target bundleno = 345 (0x159), region = 32  ;;  %p165_p3 = scmp.lt.s32.totalorder (!%p140_p2), %s1359_s18, 63 }
   0xb   : > { %v1618_v0 = vld [vmem:[%s2419_s1 + $0x38] sm:$0xff]  ;;  %v1619_v1 = vld [vmem:[%s2419_s1 + $0x40] sm:$0xff]  ;;  %v1617_v2 = vld [vmem:[%s2419_s1 + $0x30] sm:$0xff]  ;;  %s2453_s18 = smov (!%p165_p3, %s1359_s18), 63  ;;  %vm430_vm0 = vcmask 130048   ;;  %vm1265_vm4 = vcmask 97280  }
   0xc   : > { %479 = vmatpush.bf16.msra.mxu0 %v1618_v0  ;;  %1620 = vmatpush.bf16.msra.mxu2 %v1618_v0  ;;  %s1578_s21 = sshll.u32 %s2453_s18, 3  ;;  %v1616_v3 = vld [vmem:[%s2419_s1 + $0x28] sm:$0xff]  ;;  %v1615_v7 = vld [vmem:[%s2419_s1 + $0x20] sm:$0xff]  ;;  %v1614_v11 = vld [vmem:[%s2419_s1 + $0x18] sm:$0xff] }
   0xd   : > { %575 = vmatpush.bf16.msra.mxu1 %v1619_v1  ;;  %1628 = vmatpush.bf16.msra.mxu3 %v1619_v1  ;;  %s1820_s24 = scalar_lea.vmem %s2418_s0, %s1578_s21  ;;  %v1613_v12 = vld [vmem:[%s2419_s1 + $0x10] sm:$0xff]  ;;  %v1612_v16 = vld [vmem:[%s2419_s1 + $0x8] sm:$0xff]  ;;  %v1611_v19 = vld [vmem:[%s2419_s1] sm:$0xff]  ;;  %s1945_s15 = scalar_lea.vmem %s2421_s3, %s1578_s21 }
   0xe   : > { %v1579_v4 = vld [vmem:[%s1820_s24 + $0x4] sm:$0xf]  ;;  %v1368_v5 = vld [vmem:[%s1820_s24 + $0x8] sm:$0xf0]  ;;  %v1597_v8 = vld [vmem:[%s1820_s24 + $0x94] sm:$0xf] }
   0xf   : > { %v1371_v6 = vor.u32 %v1579_v4, %v1368_v5  ;;  %v1440_v9 = vld [vmem:[%s1820_s24 + $0x98] sm:$0xf0]  ;;  %v1581_v13 = vld [vmem:[%s1820_s24 + $0x14] sm:$0xf]  ;;  %v1599_v17 = vld [vmem:[%s1820_s24 + $0xa4] sm:$0xf] }
  0x10   : > { %480 = vmatpush.bf16.msra.mxu0 %v1617_v2  ;;  %1621 = vmatpush.bf16.msra.mxu2 %v1617_v2  ;;  %v1443_v10 = vor.u32 %v1597_v8, %v1440_v9  ;;  %v1376_v14 = vld [vmem:[%s1820_s24 + $0x18] sm:$0xf0]  ;;  %v1448_v18 = vld [vmem:[%s1820_s24 + $0xa8] sm:$0xf0]  ;;  %v1366_v20 = vld [vmem:[%s1820_s24] sm:$0xf] }
  0x11   : > { %1528 = vmatmul.msk.bf16.vlgmr.msra.gmra.mxu1 %vm430_vm0, %v1371_v6  ;;  %v1379_v15 = vor.u32 %v1581_v13, %v1376_v14  ;;  %v1580_v21 = vld [vmem:[%s1820_s24 + $0x4] sm:$0xf0]  ;;  %v1451_v22 = vor.u32 %v1599_v17, %v1448_v18  ;;  %v1430_v23 = vld [vmem:[%s1820_s24 + $0x80] sm:$0xf]  ;;  %v1583_v27 = vld [vmem:[%s1820_s24 + $0x24] sm:$0xf] }
  0x12   : > { %1537 = vmatmul.msk.bf16.vlgmr.msra.gmra.mxu3 %vm430_vm0, %v1443_v10  ;;  %v1596_v24 = vld [vmem:[%s1820_s24 + $0x84] sm:$0xf0]  ;;  %v1367_v25 = vor.u32 %v1580_v21, %v1366_v20  ;;  %v1384_v28 = vld [vmem:[%s1820_s24 + $0x28] sm:$0xf0]  ;;  %v1601_v30 = vld [vmem:[%s1820_s24 + $0xb4] sm:$0xf] }
  0x13   : > { %v1431_v26 = vor.u32 %v1596_v24, %v1430_v23  ;;  %v1387_v29 = vor.u32 %v1583_v27, %v1384_v28  ;;  %v1456_v31 = vld [vmem:[%s1820_s24 + $0xb8] sm:$0xf0]  ;;  %v1374_v32 = vld [vmem:[%s1820_s24 + $0x10] sm:$0xf]  ;;  %v1582_v33 = vld [vmem:[%s1820_s24 + $0x14] sm:$0xf0] }
  0x14   : > { %481 = vmatpush.bf16.msra.mxu0 %v1616_v3  ;;  %1622 = vmatpush.bf16.msra.mxu2 %v1616_v3  ;;  %v1459_v34 = vor.u32 %v1601_v30, %v1456_v31  ;;  %v1438_v35 = vld [vmem:[%s1820_s24 + $0x90] sm:$0xf]  ;;  %v1598_v36 = vld [vmem:[%s1820_s24 + $0x94] sm:$0xf0]  ;;  %v1375_v37 = vor.u32 %v1582_v33, %v1374_v32  ;;  %v1585_v39 = vld [vmem:[%s1820_s24 + $0x34] sm:$0xf] }
  0x15   : > { %v1439_v38 = vor.u32 %v1598_v36, %v1438_v35  ;;  %v1392_v40 = vld [vmem:[%s1820_s24 + $0x38] sm:$0xf0]  ;;  %v1603_v42 = vld [vmem:[%s1820_s24 + $0xc4] sm:$0xf]  ;;  %v1464_v43 = vld [vmem:[%s1820_s24 + $0xc8] sm:$0xf0] }
  0x16   : > { %v1395_v41 = vor.u32 %v1585_v39, %v1392_v40  ;;  %v1382_v44 = vld [vmem:[%s1820_s24 + $0x20] sm:$0xf]  ;;  %v1584_v45 = vld [vmem:[%s1820_s24 + $0x24] sm:$0xf0]  ;;  %v1467_v46 = vor.u32 %v1603_v42, %v1464_v43  ;;  %v1587_v51 = vld [vmem:[%s1820_s24 + $0x44] sm:$0xf] }
  0x17   : > { %v1446_v47 = vld [vmem:[%s1820_s24 + $0xa0] sm:$0xf]  ;;  %v1600_v48 = vld [vmem:[%s1820_s24 + $0xa4] sm:$0xf0]  ;;  %v1383_v49 = vor.u32 %v1584_v45, %v1382_v44  ;;  %v1400_v52 = vld [vmem:[%s1820_s24 + $0x48] sm:$0xf0] }
  0x18   : > { %482 = vmatpush.bf16.msra.mxu0 %v1615_v7  ;;  %1623 = vmatpush.bf16.msra.mxu2 %v1615_v7  ;;  %v1447_v50 = vor.u32 %v1600_v48, %v1446_v47  ;;  %v1403_v53 = vor.u32 %v1587_v51, %v1400_v52  ;;  %v1605_v54 = vld [vmem:[%s1820_s24 + $0xd4] sm:$0xf]  ;;  %v1472_v55 = vld [vmem:[%s1820_s24 + $0xd8] sm:$0xf0]  ;;  %v1390_v56 = vld [vmem:[%s1820_s24 + $0x30] sm:$0xf] }
  0x19   : > { %v1586_v57 = vld [vmem:[%s1820_s24 + $0x34] sm:$0xf0]  ;;  %v1475_v58 = vor.u32 %v1605_v54, %v1472_v55  ;;  %v1454_v59 = vld [vmem:[%s1820_s24 + $0xb0] sm:$0xf]  ;;  %v1589_v63 = vld [vmem:[%s1820_s24 + $0x54] sm:$0xf] }
  0x1a   : > { %v1602_v60 = vld [vmem:[%s1820_s24 + $0xb4] sm:$0xf0]  ;;  %v1391_v61 = vor.u32 %v1586_v57, %v1390_v56  ;;  %v1408_v0 = vld [vmem:[%s1820_s24 + $0x58] sm:$0xf0]  ;;  %v1607_v2 = vld [vmem:[%s1820_s24 + $0xe4] sm:$0xf] }
  0x1b   : > { %v1455_v62 = vor.u32 %v1602_v60, %v1454_v59  ;;  %v1411_v1 = vor.u32 %v1589_v63, %v1408_v0  ;;  %v1480_v3 = vld [vmem:[%s1820_s24 + $0xe8] sm:$0xf0]  ;;  %v1398_v4 = vld [vmem:[%s1820_s24 + $0x40] sm:$0xf]  ;;  %v1588_v5 = vld [vmem:[%s1820_s24 + $0x44] sm:$0xf0] }
  0x1c   : > { %483 = vmatpush.bf16.msra.mxu0 %v1614_v11  ;;  %1624 = vmatpush.bf16.msra.mxu2 %v1614_v11  ;;  %v1483_v6 = vor.u32 %v1607_v2, %v1480_v3  ;;  %v1462_v7 = vld [vmem:[%s1820_s24 + $0xc0] sm:$0xf]  ;;  %v1604_v8 = vld [vmem:[%s1820_s24 + $0xc4] sm:$0xf0]  ;;  %v1399_v9 = vor.u32 %v1588_v5, %v1398_v4  ;;  %v1591_v11 = vld [vmem:[%s1820_s24 + $0x64] sm:$0xf] }
  0x1d   : > { %v1463_v10 = vor.u32 %v1604_v8, %v1462_v7  ;;  %v1609_v14 = vld [vmem:[%s1820_s24 + $0xf4] sm:$0xf]  ;;  %v1590_v17 = vld [vmem:[%s1820_s24 + $0x54] sm:$0xf0]  ;;  %v1424_v24 = vld [vmem:[%s1820_s24 + $0x78] sm:$0xf0] }
  0x1e   : > { %v1606_v20 = vld [vmem:[%s1820_s24 + $0xd4] sm:$0xf0]  ;;  %v1593_v23 = vld [vmem:[%s1820_s24 + $0x74] sm:$0xf]  ;;  %v1592_v27 = vld [vmem:[%s1820_s24 + $0x64] sm:$0xf0] }
  0x1f   : > { %v1478_v28 = vld [vmem:[%s1820_s24 + $0xe0] sm:$0xf]  ;;  %v1595_v32 = vld [vmem:[%s1820_s24 + $0x84] sm:$0xf]  ;;  %v1432_v33 = vld [vmem:[%s1820_s24 + $0x88] sm:$0xf0] }
  0x20   : > { %484 = vmatpush.bf16.msra.mxu0 %v1613_v12  ;;  %1625 = vmatpush.bf16.msra.mxu2 %v1613_v12  ;;  %v1416_v12 = vld [vmem:[%s1820_s24 + $0x68] sm:$0xf0]  ;;  %v1422_v36 = vld [vmem:[%s1820_s24 + $0x70] sm:$0xf]  ;;  %v1610_v39 = vld [vmem:[%s1820_s24 + $0xf4] sm:$0xf0] }
  0x21   : > { %1529 = vmatmul.msk.bf16.gmra.mxu1 %vm430_vm0, %v1379_v15  ;;  %v1419_v13 = vor.u32 %v1591_v11, %v1416_v12  ;;  %v1488_v15 = vld [vmem:[%s1820_s24 + $0xf8] sm:$0xf0]  ;;  %v1923_v44 = vld [vmem:[%s2420_s2] ss:$0 sm:$0xff] }
  0x22   : > { %1538 = vmatmul.msk.bf16.gmra.mxu3 %vm430_vm0, %v1451_v22  ;;  %v1491_v18 = vor.u32 %v1609_v14, %v1488_v15 }
  0x24   : > { %485 = vmatpush.bf16.msra.mxu0 %v1612_v16  ;;  %1626 = vmatpush.bf16.msra.mxu2 %v1612_v16  ;;  %v1406_v16 = vld [vmem:[%s1820_s24 + $0x50] sm:$0xf] }
  0x25   : > { %v1407_v21 = vor.u32 %v1590_v17, %v1406_v16 }
  0x28   : > { %486 = vmatpush.bf16.msra.mxu0 %v1611_v19  ;;  %1627 = vmatpush.bf16.msra.mxu2 %v1611_v19  ;;  %v1470_v19 = vld [vmem:[%s1820_s24 + $0xd0] sm:$0xf] }
  0x29   : > { %v1471_v22 = vor.u32 %v1606_v20, %v1470_v19 }
  0x2b   : > { %487 = vmatmul.bf16.vlgmr.msra.gmra.mxu0 %v1367_v25  ;;  %527 = vmatmul.bf16.vlgmr.msra.gmra.mxu2 %v1431_v26  ;;  %v1427_v25 = vor.u32 %v1593_v23, %v1424_v24  ;;  %v1414_v26 = vld [vmem:[%s1820_s24 + $0x60] sm:$0xf] }
  0x2c   : > { %v1415_v30 = vor.u32 %v1592_v27, %v1414_v26 }
  0x31   : > { %1530 = vmatmul.msk.bf16.gmra.mxu1 %vm430_vm0, %v1387_v29  ;;  %v1608_v29 = vld [vmem:[%s1820_s24 + $0xe4] sm:$0xf0] }
  0x32   : > { %1539 = vmatmul.msk.bf16.gmra.mxu3 %vm430_vm0, %v1459_v34  ;;  %v1479_v31 = vor.u32 %v1608_v29, %v1478_v28  ;;  %v1435_v34 = vor.u32 %v1595_v32, %v1432_v33 }
  0x3b   : > { %492 = vmatmul.bf16.gmra.mxu0 %v1375_v37  ;;  %532 = vmatmul.bf16.gmra.mxu2 %v1439_v38  ;;  %v1594_v37 = vld [vmem:[%s1820_s24 + $0x74] sm:$0xf0]  ;;  %v1486_v38 = vld [vmem:[%s1820_s24 + $0xf0] sm:$0xf] }
  0x3c   : > { %v1423_v40 = vor.u32 %v1594_v37, %v1422_v36 }
  0x41   : > { %1531 = vmatmul.msk.bf16.gmra.mxu1 %vm430_vm0, %v1395_v41  ;;  %v1487_v41 = vor.u32 %v1610_v39, %v1486_v38 }
  0x42   : > { %1540 = vmatmul.msk.bf16.gmra.mxu3 %vm430_vm0, %v1467_v46 }
  0x4b   : > { %497 = vmatmul.bf16.gmra.mxu0 %v1383_v49  ;;  %537 = vmatmul.bf16.gmra.mxu2 %v1447_v50 }
  0x51   : > { %1532 = vmatmul.msk.bf16.gmra.mxu1 %vm430_vm0, %v1403_v53 }
  0x52   : > { %1541 = vmatmul.msk.bf16.gmra.mxu3 %vm430_vm0, %v1475_v58 }
  0x5b   : > { %502 = vmatmul.bf16.gmra.mxu0 %v1391_v61  ;;  %542 = vmatmul.bf16.gmra.mxu2 %v1455_v62 }
  0x61   : > { %1533 = vmatmul.msk.bf16.gmra.mxu1 %vm430_vm0, %v1411_v1 }
  0x62   : > { %1542 = vmatmul.msk.bf16.gmra.mxu3 %vm430_vm0, %v1483_v6 }
  0x6b   : > { %507 = vmatmul.bf16.gmra.mxu0 %v1399_v9  ;;  %547 = vmatmul.bf16.gmra.mxu2 %v1463_v10 }
  0x71   : > { %1534 = vmatmul.msk.bf16.gmra.mxu1 %vm430_vm0, %v1419_v13 }
  0x72   : > { %1543 = vmatmul.msk.bf16.gmra.mxu3 %vm430_vm0, %v1491_v18 }
  0x7b   : > { %512 = vmatmul.bf16.gmra.mxu0 %v1407_v21  ;;  %552 = vmatmul.bf16.gmra.mxu2 %v1471_v22 }
  0x81   : > { %1535 = vmatmul.msk.bf16.gmra.mxu1 %vm430_vm0, %v1427_v25 }
  0x8b   : > { %517 = vmatmul.bf16.gmra.mxu0 %v1415_v30  ;;  %557 = vmatmul.bf16.gmra.mxu2 %v1479_v31 }
  0x8e   : > { %v577_v35 = vpop.f32.mrf.mxu1 }
  0x91   : > { %1536 = vmatmul.msk.bf16.gmra.mxu1 %vm430_vm0, %v1435_v34 }
  0x95   : > { %v622_v55 = vpop.f32.mrf.mxu3 }
  0x96   : > { %v579_v42 = vpop.f32.mrf.mxu1 }
  0x9b   : > { %522 = vmatmul.bf16.gmra.mxu0 %v1423_v40  ;;  %562 = vmatmul.bf16.gmra.mxu2 %v1487_v41 }
  0x9d   : > { %v624_v2 = vpop.f32.mrf.mxu3 }
  0x9e   : > { %v582_v43 = vpop.f32.mrf.mxu1 }
  0xa5   : > { %v627_v27 = vpop.f32.mrf.mxu3 }
  0xa6   : > { %v584_v47 = vpop.f32.mrf.mxu1 }
  0xa8   : > { %v488_v45 = vpop.f32.mrf.mxu0 }
  0xa9   : > { %v489_v46 = vadd.f32 %v1923_v44, %v488_v45 }
  0xab   : > { %v578_v48 = vadd.f32 %v577_v35, %v489_v46 }
  0xad   : > { %v1544_v49 = vmul.f32 -1.442695, %v578_v48 }
  0xae   : > { %v1926_v50 = vpop.f32.mrf.mxu2  ;;  %v1929_v53 = vpop.f32.mrf.mxu1 }
  0xaf   : > { %1638 = vpow2.f32 %v1544_v49 }
  0xb0   : > { %v490_v51 = vpop.f32.mrf.mxu0 }
  0xb1   : > { %v491_v52 = vadd.f32 %v1923_v44, %v490_v51 }
  0xb3   : > { %v580_v54 = vadd.f32 %v579_v42, %v491_v52 }
  0xb5   : > { %v1639_v56 = vpop.eup %1638  ;;  %v1545_v57 = vmul.f32 -1.442695, %v580_v54 }
  0xb6   : > { %v753_v58 = vadd.f32 1.0, %v1639_v56  ;;  %v1931_v59 = vpop.f32.mrf.mxu2  ;;  %v1934_v62 = vpop.f32.mrf.mxu1 }
  0xb7   : > { %1640 = vpow2.f32 %v1545_v57  ;;  %v629_v57 = vpop.f32.mrf.mxu3 }
  0xb8   : > { %1642 = vrcp.f32 %v753_v58  ;;  %v493_v60 = vpop.f32.mrf.mxu0  ;;  %v794_v12 = vand.u32 2147483647, %v753_v58  ;;  %v796_v13 = vand.u32 2147483648, %v753_v58  ;;  %vm790_vm2 = vweird.f32 %v753_v58 }
  0xb9   : > { %v494_v61 = vadd.f32 %v1923_v44, %v493_v60 }
  0xba   : > { %v797_v22 = vor.u32 1.1754944e-38, %v796_v13  ;;  %vm795_vm5 = vcmp.eq.f32.partialorder %v794_v12, 8.507059e+37 }
  0xbb   : > { %v583_v63 = vadd.f32 %v582_v43, %v494_v61 }
  0xbd   : > { %v1641_v0 = vpop.eup %1640  ;;  %v1546_v1 = vmul.f32 -1.442695, %v583_v63 }
  0xbe   : > { %v1643_v3 = vpop.eup %1642  ;;  %v754_v4 = vadd.f32 1.0, %v1641_v0  ;;  %v533_v6 = vpop.f32.mrf.mxu2 }
  0xbf   : > { %v786_v5 = vmul.f32 %v1643_v3, %v753_v58  ;;  %1644 = vpow2.f32 %v1546_v1  ;;  %v534_v9 = vadd.f32 %v1923_v44, %v533_v6  ;;  %v1938_v11 = vpop.f32.mrf.mxu1  ;;  %vm791_vm1 = vweird.f32 %v1643_v3 }
  0xc0   : > { %1646 = vrcp.f32 %v754_v4  ;;  %v495_v7 = vpop.f32.mrf.mxu0  ;;  %vm792_vm3 = vmor %vm790_vm2, %vm791_vm1  ;;  %v811_v33 = vand.u32 2147483648, %v754_v4  ;;  %v809_v36 = vand.u32 2147483647, %v754_v4  ;;  %vm805_vm7 = vweird.f32 %v754_v4 }
  0xc1   : > { %v787_v8 = vsub.f32 1.0, %v786_v5  ;;  %v496_v10 = vadd.f32 %v1923_v44, %v495_v7  ;;  %v623_v15 = vadd.f32 %v622_v55, %v534_v9 }
  0xc2   : > { %v812_v43 = vor.u32 1.1754944e-38, %v811_v33  ;;  %vm810_vm9 = vcmp.eq.f32.partialorder %v809_v36, 8.507059e+37 }
  0xc3   : > { %v788_v14 = vmul.f32 %v1643_v3, %v787_v8  ;;  %v585_v16 = vadd.f32 %v584_v47, %v496_v10  ;;  %v1562_v19 = vmul.f32 -1.442695, %v623_v15 }
  0xc5   : > { %v1645_v17 = vpop.eup %1644  ;;  %v789_v18 = vadd.f32 %v1643_v3, %v788_v14  ;;  %v1547_v20 = vmul.f32 -1.442695, %v585_v16  ;;  %1648 = vpow2.f32 %v1562_v19 }
  0xc6   : > { %v1647_v21 = vpop.eup %1646  ;;  %v755_v23 = vadd.f32 1.0, %v1645_v17  ;;  %v535_v26 = vpop.f32.mrf.mxu2 }
  0xc7   : > { %v793_v24 = vsel %vm792_vm3, %v1643_v3, %v789_v18  ;;  %v801_v25 = vmul.f32 %v1647_v21, %v754_v4  ;;  %v536_v31 = vadd.f32 %v1923_v44, %v535_v26  ;;  %v1950_v32 = vpop.f32.mrf.mxu1  ;;  %vm806_vm6 = vweird.f32 %v1647_v21 }
  0xc8   : > { %v798_v28 = vsel %vm795_vm5, %v797_v22, %v793_v24  ;;  %1650 = vrcp.f32 %v755_v23  ;;  %v498_v29 = vpop.f32.mrf.mxu0  ;;  %vm807_vm8 = vmor %vm805_vm7, %vm806_vm6  ;;  %v824_v58 = vand.u32 2147483647, %v755_v23  ;;  %v826_v60 = vand.u32 2147483648, %v755_v23 }
  0xc9   : > { %1266 = vst.msk [vmem:[%s1945_s15] sm:$0xff] %vm1265_vm4, %v798_v28  ;;  %v802_v30 = vsub.f32 1.0, %v801_v25  ;;  %1652 = vpow2.f32 %v1547_v20  ;;  %v499_v34 = vadd.f32 %v1923_v44, %v498_v29  ;;  %v625_v37 = vadd.f32 %v624_v2, %v536_v31 }
  0xca   : > { %vm820_vm11 = vweird.f32 %v755_v23  ;;  %vm825_vm13 = vcmp.eq.f32.partialorder %v824_v58, 8.507059e+37  ;;  %v827_v6 = vor.u32 1.1754944e-38, %v826_v60 }
  0xcb   : > { %v803_v35 = vmul.f32 %v1647_v21, %v802_v30  ;;  %v588_v38 = vadd.f32 %v1929_v53, %v499_v34  ;;  %v1649_v39 = vpop.eup %1648  ;;  %v1563_v41 = vmul.f32 -1.442695, %v625_v37 }
  0xcc   : > { %v1954_v45 = vadd.f32 1.0, %v1649_v39 }
  0xcd   : > { %v804_v40 = vadd.f32 %v1647_v21, %v803_v35  ;;  %v1548_v46 = vmul.f32 -1.442695, %v588_v38  ;;  %1654 = vpow2.f32 %v1563_v41 }
  0xce   : > { %v1651_v42 = vpop.eup %1650  ;;  %v538_v51 = vpop.f32.mrf.mxu2  ;;  %1656 = vrcp.f32 %v1954_v45  ;;  %v1064_v13 = vand.u32 2147483647, %v1954_v45  ;;  %v1066_v16 = vand.u32 2147483648, %v1954_v45  ;;  %vm1060_vm14 = vweird.f32 %v1954_v45 }
  0xcf   : > { %v1653_v47 = vpop.eup %1652  ;;  %v808_v48 = vsel %vm807_vm8, %v1647_v21, %v804_v40  ;;  %v816_v49 = vmul.f32 %v1651_v42, %v755_v23  ;;  %1658 = vpow2.f32 %v1548_v46  ;;  %v1961_v56 = vpop.f32.mrf.mxu1  ;;  %v539_v61 = vadd.f32 %v1923_v44, %v538_v51 }
  0xd0   : > { %v813_v52 = vsel %vm810_vm9, %v812_v43, %v808_v48  ;;  %v500_v53 = vpop.f32.mrf.mxu0  ;;  %v1959_v55 = vadd.f32 1.0, %v1653_v47  ;;  %vm821_vm10 = vweird.f32 %v1651_v42  ;;  %vm1983_vm0 = vcmp.eq.f32.partialorder %v1064_v13, 8.507059e+37 }
  0xd1   : > { %1267 = vst.msk [vmem:[%s1945_s15 + $0x8] sm:$0xff] %vm1265_vm4, %v813_v52  ;;  %v817_v54 = vsub.f32 1.0, %v816_v49  ;;  %v501_v63 = vadd.f32 %v1923_v44, %v500_v53  ;;  %v628_v1 = vadd.f32 %v627_v27, %v539_v61  ;;  %vm822_vm12 = vmor %vm820_vm11, %vm821_vm10  ;;  %v632_v27 = vpop.f32.mrf.mxu3  ;;  %v1067_v28 = vor.u32 1.1754944e-38, %v1066_v16 }
  0xd2   : > { %1660 = vrcp.f32 %v1959_v55  ;;  %v839_v17 = vand.u32 2147483647, %v1959_v55  ;;  %v841_v21 = vand.u32 2147483648, %v1959_v55  ;;  %vm835_vm1 = vweird.f32 %v1959_v55 }
  0xd3   : > { %v818_v0 = vmul.f32 %v1651_v42, %v817_v54  ;;  %v590_v2 = vadd.f32 %v1934_v62, %v501_v63  ;;  %v1655_v3 = vpop.eup %1654  ;;  %v1564_v8 = vmul.f32 -1.442695, %v628_v1 }
  0xd4   : > { %v1657_v5 = vpop.eup %1656  ;;  %v1967_v7 = vadd.f32 1.0, %v1655_v3  ;;  %vm1990_vm2 = vcmp.eq.f32.partialorder %v839_v17, 8.507059e+37  ;;  %v842_v34 = vor.u32 1.1754944e-38, %v841_v21 }
  0xd5   : > { %v819_v4 = vadd.f32 %v1651_v42, %v818_v0  ;;  %v1659_v9 = vpop.eup %1658  ;;  %v1056_v12 = vmul.f32 %v1657_v5, %v1954_v45  ;;  %v1549_v14 = vmul.f32 -1.442695, %v590_v2  ;;  %vm1061_vm15 = vweird.f32 %v1657_v5 }
  0xd6   : > { %v540_v15 = vpop.f32.mrf.mxu2  ;;  %1662 = vrcp.f32 %v1967_v7  ;;  %v1977_v22 = vadd.f32 1.0, %v1659_v9  ;;  %vm1062_vm3 = vmor %vm1060_vm14, %vm1061_vm15  ;;  %v1079_v38 = vand.u32 2147483647, %v1967_v7  ;;  %v1081_v43 = vand.u32 2147483648, %v1967_v7 }
  0xd7   : > { %v823_v10 = vsel %vm822_vm12, %v1651_v42, %v819_v4  ;;  %v1057_v20 = vsub.f32 1.0, %v1056_v12  ;;  %1664 = vpow2.f32 %v1564_v8  ;;  %v1979_v23 = vpop.f32.mrf.mxu1  ;;  %v541_v30 = vadd.f32 %v1923_v44, %v540_v15 }
  0xd8   : > { %v828_v62 = vsel %vm825_vm13, %v827_v6, %v823_v10  ;;  %v503_v18 = vpop.f32.mrf.mxu0  ;;  %v1661_v19 = vpop.eup %1660  ;;  %1666 = vpow2.f32 %v1549_v14  ;;  %v854_v51 = vand.u32 2147483647, %v1977_v22  ;;  %vm1075_vm8 = vweird.f32 %v1967_v7 }
  0xd9   : > { %1268 = vst.msk [vmem:[%s1945_s15 + $0x10] sm:$0xff] %vm1265_vm4, %v828_v62  ;;  %v831_v24 = vmul.f32 %v1661_v19, %v1959_v55  ;;  %v1058_v25 = vmul.f32 %v1657_v5, %v1057_v20  ;;  %1668 = vrcp.f32 %v1977_v22  ;;  %v504_v35 = vadd.f32 %v1923_v44, %v503_v18  ;;  %v634_v8 = vpop.f32.mrf.mxu3 }
  0xda   : > { %vm836_vm5 = vweird.f32 %v1661_v19  ;;  %v630_v39 = vadd.f32 %v629_v57, %v541_v30  ;;  %v856_v57 = vand.u32 2147483648, %v1977_v22  ;;  %vm1080_vm9 = vcmp.eq.f32.partialorder %v1079_v38, 8.507059e+37 }
  0xdb   : > { %v832_v29 = vsub.f32 1.0, %v831_v24  ;;  %v1059_v31 = vadd.f32 %v1657_v5, %v1058_v25  ;;  %v593_v46 = vadd.f32 %v1938_v11, %v504_v35  ;;  %vm837_vm6 = vmor %vm835_vm1, %vm836_vm5  ;;  %v1082_v6 = vor.u32 1.1754944e-38, %v1081_v43 }
  0xdc   : > { %v1663_v36 = vpop.eup %1662  ;;  %v1565_v60 = vmul.f32 -1.442695, %v630_v39  ;;  %vm850_vm10 = vweird.f32 %v1977_v22  ;;  %vm2026_vm13 = vcmp.eq.f32.partialorder %v854_v51, 8.507059e+37 }
  0xdd   : > { %v833_v37 = vmul.f32 %v1661_v19, %v832_v29  ;;  %v1665_v40 = vpop.eup %1664  ;;  %v1063_v41 = vsel %vm1062_vm3, %v1657_v5, %v1059_v31  ;;  %v1071_v42 = vmul.f32 %v1663_v36, %v1967_v7  ;;  %vm1076_vm7 = vweird.f32 %v1663_v36 }
  0xde   : > { %v543_v47 = vpop.f32.mrf.mxu2  ;;  %v1667_v48 = vpop.eup %1666  ;;  %v1068_v45 = vsel %vm1983_vm0, %v1067_v28, %v1063_v41  ;;  %v2004_v52 = vadd.f32 1.0, %v1665_v40  ;;  %v1550_v3 = vmul.f32 -1.442695, %v593_v46  ;;  %vm1077_vm11 = vmor %vm1075_vm8, %vm1076_vm7  ;;  %v857_v7 = vor.u32 1.1754944e-38, %v856_v57 }
  0xdf   : > { %v834_v49 = vadd.f32 %v1661_v19, %v833_v37  ;;  %v1669_v54 = vpop.eup %1668  ;;  %1284 = vst.msk [vmem:[%s1945_s15 + $0x90] sm:$0xff] %vm1265_vm4, %v1068_v45  ;;  %v1072_v11 = vsub.f32 1.0, %v1071_v42  ;;  %v2012_v58 = vadd.f32 1.0, %v1667_v48  ;;  %v2014_v61 = vpop.f32.mrf.mxu1  ;;  %v544_v1 = vadd.f32 %v1923_v44, %v543_v47 }
  0xe0   : > { %v505_v53 = vpop.f32.mrf.mxu0  ;;  %v846_v0 = vmul.f32 %v1669_v54, %v1977_v22  ;;  %1670 = vrcp.f32 %v2004_v52  ;;  %vm851_vm12 = vweird.f32 %v1669_v54  ;;  %vm1090_vm15 = vweird.f32 %v2004_v52 }
  0xe1   : > { %v838_v63 = vsel %vm837_vm6, %v1661_v19, %v834_v49  ;;  %v1073_v55 = vmul.f32 %v1663_v36, %v1072_v11  ;;  %1672 = vrcp.f32 %v2012_v58  ;;  %v633_v10 = vadd.f32 %v632_v27, %v544_v1  ;;  %vm852_vm14 = vmor %vm850_vm10, %vm851_vm12  ;;  %v637_v45 = vpop.f32.mrf.mxu3 }
  0xe2   : > { %v843_v2 = vsel %vm1990_vm2, %v842_v34, %v838_v63  ;;  %v847_v4 = vsub.f32 1.0, %v846_v0  ;;  %1674 = vpow2.f32 %v1565_v60  ;;  %v506_v18 = vadd.f32 %v1923_v44, %v505_v53 }
  0xe3   : > { %1269 = vst.msk [vmem:[%s1945_s15 + $0x18] sm:$0xff] %vm1265_vm4, %v843_v2  ;;  %v1074_v5 = vadd.f32 %v1663_v36, %v1073_v55  ;;  %1676 = vpow2.f32 %v1550_v3  ;;  %v1566_v17 = vmul.f32 -1.442695, %v633_v10  ;;  %v1094_v27 = vand.u32 2147483647, %v2004_v52 }
  0xe4   : > { %v848_v9 = vmul.f32 %v1669_v54, %v847_v4  ;;  %v595_v28 = vadd.f32 %v1950_v32, %v506_v18  ;;  %v1096_v30 = vand.u32 2147483648, %v2004_v52  ;;  %v869_v35 = vand.u32 2147483647, %v2012_v58 }
  0xe5   : > { %v1078_v12 = vsel %vm1077_vm11, %v1663_v36, %v1074_v5  ;;  %1678 = vpow2.f32 %v1566_v17  ;;  %v871_v42 = vand.u32 2147483648, %v2012_v58  ;;  %vm865_vm3 = vweird.f32 %v2012_v58 }
  0xe6   : > { %v545_v14 = vpop.f32.mrf.mxu2  ;;  %v1671_v15 = vpop.eup %1670  ;;  %v1083_v62 = vsel %vm1080_vm9, %v1082_v6, %v1078_v12  ;;  %v849_v16 = vadd.f32 %v1669_v54, %v848_v9  ;;  %v1551_v36 = vmul.f32 -1.442695, %v595_v28  ;;  %vm1095_vm5 = vcmp.eq.f32.partialorder %v1094_v27, 8.507059e+37 }
  0xe7   : > { %1285 = vst.msk [vmem:[%s1945_s15 + $0x98] sm:$0xff] %vm1265_vm4, %v1083_v62  ;;  %v1086_v20 = vmul.f32 %v1671_v15, %v2004_v52  ;;  %v546_v21 = vadd.f32 %v1923_v44, %v545_v14  ;;  %v1673_v25 = vpop.eup %1672  ;;  %v2046_v33 = vpop.f32.mrf.mxu1  ;;  %vm1091_vm0 = vweird.f32 %v1671_v15  ;;  %v872_v63 = vor.u32 1.1754944e-38, %v871_v42 }
  0xe8   : > { %v508_v19 = vpop.f32.mrf.mxu0  ;;  %v853_v26 = vsel %vm852_vm14, %v1669_v54, %v849_v16  ;;  %v861_v31 = vmul.f32 %v1673_v25, %v2012_v58  ;;  %v1675_v34 = vpop.eup %1674  ;;  %vm866_vm1 = vweird.f32 %v1673_v25  ;;  %1680 = vpow2.f32 %v1551_v36  ;;  %vm1092_vm2 = vmor %vm1090_vm15, %vm1091_vm0 }
  0xe9   : > { %v509_v24 = vadd.f32 %v1923_v44, %v508_v19  ;;  %v858_v22 = vsel %vm2026_vm13, %v857_v7, %v853_v26  ;;  %v1087_v29 = vsub.f32 1.0, %v1086_v20  ;;  %v635_v37 = vadd.f32 %v634_v8, %v546_v21  ;;  %v1677_v38 = vpop.eup %1676  ;;  %vm867_vm6 = vmor %vm865_vm3, %vm866_vm1  ;;  %v639_v26 = vpop.f32.mrf.mxu3 }
  0xea   : > { %1270 = vst.msk [vmem:[%s1945_s15 + $0x20] sm:$0xff] %vm1265_vm4, %v858_v22  ;;  %v862_v39 = vsub.f32 1.0, %v861_v31  ;;  %v2051_v40 = vadd.f32 1.0, %v1675_v34  ;;  %v2055_v43 = vadd.f32 1.0, %v1677_v38  ;;  %vm870_vm7 = vcmp.eq.f32.partialorder %v869_v35, 8.507059e+37 }
  0xeb   : > { %v1088_v32 = vmul.f32 %v1671_v15, %v1087_v29  ;;  %v598_v41 = vadd.f32 %v1961_v56, %v509_v24  ;;  %v1567_v48 = vmul.f32 -1.442695, %v635_v37  ;;  %v1679_v51 = vpop.eup %1678  ;;  %v1097_v56 = vor.u32 1.1754944e-38, %v1096_v30 }
  0xec   : > { %v863_v47 = vmul.f32 %v1673_v25, %v862_v39  ;;  %1682 = vrcp.f32 %v2051_v40  ;;  %v2064_v0 = vadd.f32 1.0, %v1679_v51  ;;  %v1109_v58 = vand.u32 2147483647, %v2051_v40 }
  0xed   : > { %v1089_v46 = vadd.f32 %v1671_v15, %v1088_v32  ;;  %1684 = vrcp.f32 %v2055_v43  ;;  %v1552_v57 = vmul.f32 -1.442695, %v598_v41  ;;  %v1111_v55 = vand.u32 2147483648, %v2051_v40 }
  0xee   : > { %v548_v49 = vpop.f32.mrf.mxu2  ;;  %v864_v11 = vadd.f32 %v1673_v25, %v863_v47  ;;  %1686 = vpow2.f32 %v1567_v48  ;;  %v1681_v1 = vpop.eup %1680  ;;  %v884_v3 = vand.u32 2147483647, %v2055_v43  ;;  %v886_v5 = vand.u32 2147483648, %v2055_v43 }
  0xef   : > { %v1093_v54 = vsel %vm1092_vm2, %v1671_v15, %v1089_v46  ;;  %1688 = vrcp.f32 %v2064_v0  ;;  %v2075_v6 = vadd.f32 1.0, %v1681_v1  ;;  %v549_v8 = vadd.f32 %v1923_v44, %v548_v49  ;;  %v2078_v9 = vpop.f32.mrf.mxu1 }
  0xf0   : > { %v510_v53 = vpop.f32.mrf.mxu0  ;;  %v1098_v60 = vsel %vm1095_vm5, %v1097_v56, %v1093_v54  ;;  %v868_v52 = vsel %vm867_vm6, %v1673_v25, %v864_v11  ;;  %1690 = vpow2.f32 %v1552_v57  ;;  %vm1105_vm8 = vweird.f32 %v2051_v40 }
  0xf1   : > { %1286 = vst.msk [vmem:[%s1945_s15 + $0xa0] sm:$0xff] %vm1265_vm4, %v1098_v60  ;;  %v873_v2 = vsel %vm870_vm7, %v872_v63, %v868_v52  ;;  %vm880_vm9 = vweird.f32 %v2055_v43  ;;  %v1124_v7 = vand.u32 2147483647, %v2064_v0  ;;  %v1126_v14 = vand.u32 2147483648, %v2064_v0 }
  0xf2   : > { %v1683_v4 = vpop.eup %1682  ;;  %1271 = vst.msk [vmem:[%s1945_s15 + $0x28] sm:$0xff] %vm1265_vm4, %v873_v2  ;;  %1692 = vrcp.f32 %v2075_v6  ;;  %vm2087_vm10 = vcmp.eq.f32.partialorder %v1109_v58, 8.507059e+37  ;;  %v1112_v17 = vor.u32 1.1754944e-38, %v1111_v55  ;;  %vm2091_vm11 = vcmp.eq.f32.partialorder %v884_v3, 8.507059e+37 }
  0xf3   : > { %v1685_v10 = vpop.eup %1684  ;;  %v1101_v12 = vmul.f32 %v1683_v4, %v2051_v40  ;;  %v887_v24 = vor.u32 1.1754944e-38, %v886_v5  ;;  %vm1120_vm12 = vweird.f32 %v2064_v0  ;;  %v638_v25 = vadd.f32 %v637_v45, %v549_v8 }
  0xf4   : > { %v876_v13 = vmul.f32 %v1685_v10, %v2055_v43  ;;  %v1687_v20 = vpop.eup %1686  ;;  %vm1106_vm13 = vweird.f32 %v1683_v4  ;;  %v511_v29 = vadd.f32 %v1923_v44, %v510_v53  ;;  %vm881_vm14 = vweird.f32 %v1685_v10 }
  0xf5   : > { %v1102_v62 = vsub.f32 1.0, %v1101_v12  ;;  %v1689_v27 = vpop.eup %1688  ;;  %v2096_v22 = vadd.f32 1.0, %v1687_v20  ;;  %vm2100_vm15 = vcmp.eq.f32.partialorder %v1124_v7, 8.507059e+37  ;;  %v1127_v36 = vor.u32 1.1754944e-38, %v1126_v14  ;;  %vm1107_vm1 = vmor %vm1105_vm8, %vm1106_vm13  ;;  %v642_v12 = vpop.f32.mrf.mxu3 }
  0xf6   : > { %v550_v15 = vpop.f32.mrf.mxu2  ;;  %v877_v21 = vsub.f32 1.0, %v876_v13  ;;  %v1691_v30 = vpop.eup %1690  ;;  %v1116_v34 = vmul.f32 %v1689_v27, %v2064_v0  ;;  %vm895_vm0 = vweird.f32 %v2075_v6  ;;  %v899_v38 = vand.u32 2147483647, %v2075_v6  ;;  %vm882_vm2 = vmor %vm880_vm9, %vm881_vm14 }
  0xf7   : > { %v1103_v28 = vmul.f32 %v1683_v4, %v1102_v62  ;;  %v901_v32 = vand.u32 2147483648, %v2075_v6  ;;  %1694 = vrcp.f32 %v2096_v22  ;;  %v2111_v46 = vadd.f32 1.0, %v1691_v30  ;;  %v2121_v54 = vpop.f32.mrf.mxu1 }
  0xf8   : > { %v513_v19 = vpop.f32.mrf.mxu0  ;;  %v878_v31 = vmul.f32 %v1685_v10, %v877_v21  ;;  %v1693_v39 = vpop.eup %1692  ;;  %v1117_v42 = vsub.f32 1.0, %v1116_v34  ;;  %v1568_v47 = vmul.f32 -1.442695, %v638_v25  ;;  %v600_v49 = vadd.f32 %v1979_v23, %v511_v29 }
  0xf9   : > { %v1104_v37 = vadd.f32 %v1683_v4, %v1103_v28  ;;  %v891_v45 = vmul.f32 %v1693_v39, %v2075_v6  ;;  %v551_v51 = vadd.f32 %v1923_v44, %v550_v15  ;;  %vm1121_vm3 = vweird.f32 %v1689_v27 }
  0xfa   : > { %v879_v41 = vadd.f32 %v1685_v10, %v878_v31  ;;  %v1118_v53 = vmul.f32 %v1689_v27, %v1117_v42  ;;  %v1139_v60 = vand.u32 2147483647, %v2096_v22  ;;  %1696 = vrcp.f32 %v2111_v46  ;;  %vm1122_vm6 = vmor %vm1120_vm12, %vm1121_vm3 }
  0xfb   : > { %v1108_v48 = vsel %vm1107_vm1, %v1683_v4, %v1104_v37  ;;  %v892_v57 = vsub.f32 1.0, %v891_v45  ;;  %vm896_vm5 = vweird.f32 %v1693_v39  ;;  %v1141_v63 = vand.u32 2147483648, %v2096_v22 }
  0xfc   : > { %v1113_v40 = vsel %vm2087_vm10, %v1112_v17, %v1108_v48  ;;  %v883_v56 = vsel %vm882_vm2, %v1685_v10, %v879_v41  ;;  %v1119_v23 = vadd.f32 %v1689_v27, %v1118_v53  ;;  %1698 = vpow2.f32 %v1568_v47  ;;  %vm897_vm9 = vmor %vm895_vm0, %vm896_vm5 }
  0xfd   : > { %1287 = vst.msk [vmem:[%s1945_s15 + $0xa8] sm:$0xff] %vm1265_vm4, %v1113_v40  ;;  %v888_v43 = vsel %vm2091_vm11, %v887_v24, %v883_v56  ;;  %v1695_v58 = vpop.eup %1694  ;;  %v893_v1 = vmul.f32 %v1693_v39, %v892_v57  ;;  %v1553_v2 = vmul.f32 -1.442695, %v600_v49  ;;  %v640_v55 = vadd.f32 %v639_v26, %v551_v51 }
  0xfe   : > { %v553_v11 = vpop.f32.mrf.mxu2  ;;  %1272 = vst.msk [vmem:[%s1945_s15 + $0x30] sm:$0xff] %vm1265_vm4, %v888_v43  ;;  %v514_v3 = vadd.f32 %v1923_v44, %v513_v19  ;;  %v1123_v4 = vsel %vm1122_vm6, %v1689_v27, %v1119_v23  ;;  %vm2136_vm7 = vcmp.eq.f32.partialorder %v899_v38, 8.507059e+37  ;;  %v902_v8 = vor.u32 1.1754944e-38, %v901_v32 }
  0xff   : > { %v1131_v10 = vmul.f32 %v1695_v58, %v2096_v22  ;;  %v1128_v13 = vsel %vm2100_vm15, %v1127_v36, %v1123_v4  ;;  %v894_v7 = vadd.f32 %v1693_v39, %v893_v1  ;;  %vm1135_vm8 = vweird.f32 %v2096_v22  ;;  %v2165_v35 = vpop.f32.mrf.mxu1 }
 0x100   : > { %v515_v52 = vpop.f32.mrf.mxu0  ;;  %1700 = vpow2.f32 %v1553_v2  ;;  %1288 = vst.msk [vmem:[%s1945_s15 + $0xb0] sm:$0xff] %vm1265_vm4, %v1128_v13  ;;  %v1569_v14 = vmul.f32 -1.442695, %v640_v55  ;;  %v603_v15 = vadd.f32 %v2014_v61, %v514_v3  ;;  %v554_v62 = vadd.f32 %v1923_v44, %v553_v11  ;;  %v1697_v16 = vpop.eup %1696 }
 0x101   : > { %v1132_v0 = vsub.f32 1.0, %v1131_v10  ;;  %v898_v17 = vsel %vm897_vm9, %v1693_v39, %v894_v7  ;;  %vm2151_vm10 = vcmp.eq.f32.partialorder %v1139_v60, 8.507059e+37  ;;  %v1142_v19 = vor.u32 1.1754944e-38, %v1141_v63 }
 0x102   : > { %v516_v20 = vadd.f32 %v1923_v44, %v515_v52  ;;  %v1699_v21 = vpop.eup %1698  ;;  %v903_v6 = vsel %vm2136_vm7, %v902_v8, %v898_v17  ;;  %vm1136_vm11 = vweird.f32 %v1695_v58  ;;  %v906_v25 = vmul.f32 %v1697_v16, %v2111_v46 }
 0x103   : > { %v1133_v24 = vmul.f32 %v1695_v58, %v1132_v0  ;;  %1273 = vst.msk [vmem:[%s1945_s15 + $0x38] sm:$0xff] %vm1265_vm4, %v903_v6  ;;  %v2161_v26 = vadd.f32 1.0, %v1699_v21  ;;  %1702 = vpow2.f32 %v1569_v14  ;;  %v1554_v27 = vmul.f32 -1.442695, %v603_v15  ;;  %vm1137_vm12 = vmor %vm1135_vm8, %vm1136_vm11 }
 0x104   : > { %v643_v28 = vadd.f32 %v642_v12, %v554_v62  ;;  %v907_v30 = vsub.f32 1.0, %v906_v25  ;;  %v914_v31 = vand.u32 2147483647, %v2111_v46  ;;  %v916_v34 = vand.u32 2147483648, %v2111_v46 }
 0x105   : > { %v1134_v29 = vadd.f32 %v1695_v58, %v1133_v24  ;;  %vm911_vm13 = vweird.f32 %v1697_v16  ;;  %1704 = vrcp.f32 %v2161_v26  ;;  %v605_v37 = vadd.f32 %v2046_v33, %v516_v20  ;;  %v644_v33 = vpop.f32.mrf.mxu3 }
 0x106   : > { %v555_v61 = vpop.f32.mrf.mxu2  ;;  %v1701_v36 = vpop.eup %1700  ;;  %v908_v39 = vmul.f32 %v1697_v16, %v907_v30  ;;  %1706 = vpow2.f32 %v1554_v27  ;;  %v1570_v48 = vmul.f32 -1.442695, %v643_v28  ;;  %vm910_vm14 = vweird.f32 %v2111_v46 }
 0x107   : > { %v556_v38 = vadd.f32 %v1923_v44, %v555_v61  ;;  %v1138_v32 = vsel %vm1137_vm12, %v1695_v58, %v1134_v29  ;;  %v2172_v41 = vadd.f32 1.0, %v1701_v36  ;;  %vm915_vm15 = vcmp.eq.f32.partialorder %v914_v31, 8.507059e+37  ;;  %vm912_vm0 = vmor %vm910_vm14, %vm911_vm13  ;;  %v2207_v12 = vpop.f32.mrf.mxu1 }
 0x108   : > { %v518_v42 = vpop.f32.mrf.mxu0  ;;  %v1143_v47 = vsel %vm2151_vm10, %v1142_v19, %v1138_v32  ;;  %v909_v22 = vadd.f32 %v1697_v16, %v908_v39  ;;  %v917_v49 = vor.u32 1.1754944e-38, %v916_v34  ;;  %v1555_v51 = vmul.f32 -1.442695, %v605_v37 }
 0x109   : > { %1289 = vst.msk [vmem:[%s1945_s15 + $0xb8] sm:$0xff] %vm1265_vm4, %v1143_v47  ;;  %1708 = vrcp.f32 %v2172_v41  ;;  %v1703_v45 = vpop.eup %1702  ;;  %v645_v40 = vadd.f32 %v644_v33, %v556_v38  ;;  %v1154_v53 = vand.u32 2147483647, %v2161_v26  ;;  %v1156_v11 = vand.u32 2147483648, %v2161_v26 }
 0x10a   : > { %1710 = vpow2.f32 %v1570_v48  ;;  %v913_v56 = vsel %vm912_vm0, %v1697_v16, %v909_v22  ;;  %v2183_v43 = vadd.f32 1.0, %v1703_v45  ;;  %v929_v60 = vand.u32 2147483647, %v2172_v41 }
 0x10b   : > { %v1705_v46 = vpop.eup %1704  ;;  %v918_v57 = vsel %vm915_vm15, %v917_v49, %v913_v56  ;;  %1712 = vpow2.f32 %v1555_v51  ;;  %v1571_v23 = vmul.f32 -1.442695, %v645_v40  ;;  %v931_v58 = vand.u32 2147483648, %v2172_v41 }
 0x10c   : > { %v1707_v63 = vpop.eup %1706  ;;  %1274 = vst.msk [vmem:[%s1945_s15 + $0x40] sm:$0xff] %vm1265_vm4, %v918_v57  ;;  %v1146_v52 = vmul.f32 %v1705_v46, %v2161_v26  ;;  %1714 = vrcp.f32 %v2183_v43  ;;  %v2193_v1 = vadd.f32 %v1923_v44, %v1926_v50  ;;  %v2197_v2 = vadd.f32 %v1923_v44, %v1931_v59 }
 0x10d   : > { %v2199_v55 = vadd.f32 1.0, %v1707_v63  ;;  %v519_v3 = vadd.f32 %v1923_v44, %v518_v42  ;;  %vm1150_vm1 = vweird.f32 %v2161_v26  ;;  %vm2203_vm2 = vcmp.eq.f32.partialorder %v1154_v53, 8.507059e+37  ;;  %v647_v38 = vpop.f32.mrf.mxu3 }
 0x10e   : > { %v1147_v5 = vsub.f32 1.0, %v1146_v52  ;;  %v1157_v10 = vor.u32 1.1754944e-38, %v1156_v11  ;;  %vm925_vm3 = vweird.f32 %v2172_v41  ;;  %vm2211_vm5 = vcmp.eq.f32.partialorder %v929_v60, 8.507059e+37  ;;  %v558_v7 = vpop.f32.mrf.mxu2 }
 0x10f   : > { %v1709_v4 = vpop.eup %1708  ;;  %1716 = vpow2.f32 %v1571_v23  ;;  %vm1151_vm6 = vweird.f32 %v1705_v46  ;;  %v932_v14 = vor.u32 1.1754944e-38, %v931_v58  ;;  %vm1165_vm7 = vweird.f32 %v2183_v43  ;;  %v617_v49 = vpop.f32.mrf.mxu1 }
 0x110   : > { %v1711_v50 = vpop.eup %1710  ;;  %v921_v13 = vmul.f32 %v1709_v4, %v2172_v41  ;;  %v1148_v0 = vmul.f32 %v1705_v46, %v1147_v5  ;;  %1718 = vrcp.f32 %v2199_v55  ;;  %v520_v15 = vpop.f32.mrf.mxu0  ;;  %v1169_v17 = vand.u32 2147483647, %v2183_v43  ;;  %vm1152_vm8 = vmor %vm1150_vm1, %vm1151_vm6 }
 0x111   : > { %v1713_v62 = vpop.eup %1712  ;;  %v2218_v18 = vadd.f32 1.0, %v1711_v50  ;;  %v608_v19 = vadd.f32 %v2078_v9, %v519_v3  ;;  %v1171_v6 = vand.u32 2147483648, %v2183_v43  ;;  %v559_v25 = vadd.f32 %v1923_v44, %v558_v7 }
 0x112   : > { %v922_v16 = vsub.f32 1.0, %v921_v13  ;;  %v1715_v20 = vpop.eup %1714  ;;  %v1149_v21 = vadd.f32 %v1705_v46, %v1148_v0  ;;  %v2222_v24 = vadd.f32 1.0, %v1713_v62  ;;  %vm926_vm9 = vweird.f32 %v1709_v4 }
 0x113   : > { %v1161_v27 = vmul.f32 %v1715_v20, %v2183_v43  ;;  %v521_v28 = vadd.f32 %v1923_v44, %v520_v15  ;;  %v944_v29 = vand.u32 2147483647, %v2199_v55  ;;  %v946_v30 = vand.u32 2147483648, %v2199_v55  ;;  %vm927_vm10 = vmor %vm925_vm3, %vm926_vm9 }
 0x114   : > { %v923_v61 = vmul.f32 %v1709_v4, %v922_v16  ;;  %v1153_v9 = vsel %vm1152_vm8, %v1705_v46, %v1149_v21  ;;  %1720 = vrcp.f32 %v2218_v18  ;;  %v1556_v37 = vmul.f32 -1.442695, %v608_v19 }
 0x115   : > { %v1717_v31 = vpop.eup %1716  ;;  %v1158_v34 = vsel %vm2203_vm2, %v1157_v10, %v1153_v9  ;;  %v1162_v36 = vsub.f32 1.0, %v1161_v27  ;;  %vm2240_vm11 = vcmp.eq.f32.partialorder %v1169_v17, 8.507059e+37  ;;  %v1172_v39 = vor.u32 1.1754944e-38, %v1171_v6  ;;  %v2285_v17 = vld [vmem:[%s2420_s2] ss:$0 sm:$0xff] }
 0x116   : > { %v924_v26 = vadd.f32 %v1709_v4, %v923_v61  ;;  %v1719_v32 = vpop.eup %1718  ;;  %1290 = vst.msk [vmem:[%s1945_s15 + $0xc0] sm:$0xff] %vm1265_vm4, %v1158_v34  ;;  %1722 = vrcp.f32 %v2222_v24  ;;  %v648_v42 = vadd.f32 %v647_v38, %v559_v25  ;;  %vm1166_vm12 = vweird.f32 %v1715_v20  ;;  %v560_v50 = vpop.f32.mrf.mxu2 }
 0x117   : > { %v1163_v48 = vmul.f32 %v1715_v20, %v1162_v36  ;;  %v936_v22 = vmul.f32 %v1719_v32, %v2199_v55  ;;  %vm940_vm13 = vweird.f32 %v2199_v55  ;;  %vm2249_vm14 = vcmp.eq.f32.partialorder %v944_v29, 8.507059e+37  ;;  %vm1167_vm15 = vmor %vm1165_vm7, %vm1166_vm12 }
 0x118   : > { %v928_v47 = vsel %vm927_vm10, %v1709_v4, %v924_v26  ;;  %v947_v45 = vor.u32 1.1754944e-38, %v946_v30  ;;  %v2255_v56 = vadd.f32 1.0, %v1717_v31  ;;  %1724 = vpow2.f32 %v1556_v37  ;;  %v523_v31 = vpop.f32.mrf.mxu0 }
 0x119   : > { %v933_v33 = vsel %vm2211_vm5, %v932_v14, %v928_v47  ;;  %v1164_v51 = vadd.f32 %v1715_v20, %v1163_v48  ;;  %v937_v40 = vsub.f32 1.0, %v936_v22  ;;  %vm941_vm0 = vweird.f32 %v1719_v32  ;;  %v619_v48 = vpop.f32.mrf.mxu1 }
 0x11a   : > { %1275 = vst.msk [vmem:[%s1945_s15 + $0x48] sm:$0xff] %vm1265_vm4, %v933_v33  ;;  %v1721_v53 = vpop.eup %1720  ;;  %vm1180_vm1 = vweird.f32 %v2218_v18  ;;  %v1572_v11 = vmul.f32 -1.442695, %v648_v42  ;;  %v610_v46 = vadd.f32 %v2121_v54, %v521_v28  ;;  %v618_v63 = vadd.f32 %v617_v49, %v2193_v1  ;;  %vm942_vm2 = vmor %vm940_vm13, %vm941_vm0  ;;  %v649_v28 = vpop.f32.mrf.mxu3 }
 0x11b   : > { %v1168_v57 = vsel %vm1167_vm15, %v1715_v20, %v1164_v51  ;;  %v938_v60 = vmul.f32 %v1719_v32, %v937_v40  ;;  %v1176_v23 = vmul.f32 %v1721_v53, %v2218_v18  ;;  %v1184_v3 = vand.u32 2147483647, %v2218_v18 }
 0x11c   : > { %v1723_v52 = vpop.eup %1722  ;;  %v1173_v58 = vsel %vm2240_vm11, %v1172_v39, %v1168_v57  ;;  %v1186_v43 = vand.u32 2147483648, %v2218_v18  ;;  %1726 = vrcp.f32 %v2255_v56  ;;  %v959_v8 = vand.u32 2147483647, %v2222_v24 }
 0x11d   : > { %1291 = vst.msk [vmem:[%s1945_s15 + $0xc8] sm:$0xff] %vm1265_vm4, %v1173_v58  ;;  %v939_v4 = vadd.f32 %v1719_v32, %v938_v60  ;;  %v1177_v54 = vsub.f32 1.0, %v1176_v23  ;;  %v951_v5 = vmul.f32 %v1723_v52, %v2222_v24  ;;  %vm1181_vm3 = vweird.f32 %v1721_v53 }
 0x11e   : > { %v961_v1 = vand.u32 2147483648, %v2222_v24  ;;  %1728 = vpow2.f32 %v1572_v11  ;;  %v1557_v10 = vmul.f32 -1.442695, %v610_v46  ;;  %v1725_v13 = vpop.eup %1724  ;;  %v1560_v14 = vmul.f32 -1.442695, %v618_v63  ;;  %vm1182_vm6 = vmor %vm1180_vm1, %vm1181_vm3  ;;  %v563_v11 = vpop.f32.mrf.mxu2 }
 0x11f   : > { %v943_v59 = vsel %vm942_vm2, %v1719_v32, %v939_v4  ;;  %v1178_v7 = vmul.f32 %v1721_v53, %v1177_v54  ;;  %v952_v0 = vsub.f32 1.0, %v951_v5  ;;  %vm956_vm5 = vweird.f32 %v1723_v52 }
 0x120   : > { %v948_v15 = vsel %vm2249_vm14, %v947_v45, %v943_v59  ;;  %v2278_v62 = vadd.f32 1.0, %v1725_v13  ;;  %1730 = vpow2.f32 %v1557_v10  ;;  %v561_v19 = vadd.f32 %v2285_v17, %v560_v50  ;;  %v525_v13 = vpop.f32.mrf.mxu0 }
 0x121   : > { %1276 = vst.msk [vmem:[%s1945_s15 + $0x50] sm:$0xff] %vm1265_vm4, %v948_v15  ;;  %v1179_v55 = vadd.f32 %v1721_v53, %v1178_v7  ;;  %v953_v16 = vmul.f32 %v1723_v52, %v952_v0  ;;  %1732 = vpow2.f32 %v1560_v14  ;;  %vm1185_vm7 = vcmp.eq.f32.partialorder %v1184_v3, 8.507059e+37 }
 0x122   : > { %v1727_v20 = vpop.eup %1726  ;;  %v1187_v21 = vor.u32 1.1754944e-38, %v1186_v43  ;;  %v1199_v6 = vand.u32 2147483647, %v2255_v56  ;;  %1734 = vrcp.f32 %v2278_v62  ;;  %vm955_vm8 = vweird.f32 %v2222_v24  ;;  %v652_v54 = vpop.f32.mrf.mxu3 }
 0x123   : > { %v1183_v25 = vsel %vm1182_vm6, %v1721_v53, %v1179_v55  ;;  %v954_v61 = vadd.f32 %v1723_v52, %v953_v16  ;;  %v1191_v27 = vmul.f32 %v1727_v20, %v2255_v56  ;;  %vm957_vm9 = vmor %vm955_vm8, %vm956_vm5  ;;  %vm960_vm10 = vcmp.eq.f32.partialorder %v959_v8, 8.507059e+37 }
 0x124   : > { %v1729_v9 = vpop.eup %1728  ;;  %v1188_v29 = vsel %vm1185_vm7, %v1187_v21, %v1183_v25  ;;  %v962_v18 = vor.u32 1.1754944e-38, %v961_v1  ;;  %v650_v30 = vadd.f32 %v649_v28, %v561_v19  ;;  %v1201_v36 = vand.u32 2147483648, %v2255_v56 }
 0x125   : > { %1292 = vst.msk [vmem:[%s1945_s15 + $0xd0] sm:$0xff] %vm1265_vm4, %v1188_v29  ;;  %v958_v34 = vsel %vm957_vm9, %v1723_v52, %v954_v61  ;;  %v1192_v26 = vsub.f32 1.0, %v1191_v27  ;;  %v2299_v37 = vadd.f32 1.0, %v1729_v9  ;;  %vm1195_vm11 = vweird.f32 %v2255_v56 }
 0x126   : > { %v1731_v24 = vpop.eup %1730  ;;  %v963_v38 = vsel %vm960_vm10, %v962_v18, %v958_v34  ;;  %vm2302_vm12 = vcmp.eq.f32.partialorder %v1199_v6, 8.507059e+37  ;;  %v1573_v44 = vmul.f32 -1.442695, %v650_v30  ;;  %vm1196_vm13 = vweird.f32 %v1727_v20  ;;  %v565_v29 = vpop.f32.mrf.mxu2 }
 0x127   : > { %v1733_v39 = vpop.eup %1732  ;;  %1277 = vst.msk [vmem:[%s1945_s15 + $0x58] sm:$0xff] %vm1265_vm4, %v963_v38  ;;  %v1193_v42 = vmul.f32 %v1727_v20, %v1192_v26  ;;  %v974_v47 = vand.u32 2147483647, %v2278_v62  ;;  %1736 = vrcp.f32 %v2299_v37  ;;  %v976_v33 = vand.u32 2147483648, %v2278_v62  ;;  %vm1197_vm14 = vmor %vm1195_vm11, %vm1196_vm13 }
 0x128   : > { %v1735_v22 = vpop.eup %1734  ;;  %v2311_v41 = vadd.f32 1.0, %v1731_v24  ;;  %v2313_v45 = vadd.f32 1.0, %v1733_v39  ;;  %1738 = vpow2.f32 %v1573_v44  ;;  %v1202_v51 = vor.u32 1.1754944e-38, %v1201_v36 }
 0x129   : > { %v1194_v49 = vadd.f32 %v1727_v20, %v1193_v42  ;;  %v966_v40 = vmul.f32 %v1735_v22, %v2278_v62  ;;  %v524_v53 = vadd.f32 %v2285_v17, %v523_v31  ;;  %v1214_v46 = vand.u32 2147483647, %v2299_v37 }
 0x12a   : > { %v1216_v57 = vand.u32 2147483648, %v2299_v37  ;;  %1740 = vrcp.f32 %v2311_v41  ;;  %v620_v60 = vadd.f32 %v619_v48, %v2197_v2  ;;  %vm970_vm15 = vweird.f32 %v2278_v62  ;;  %v654_v48 = vpop.f32.mrf.mxu3 }
 0x12b   : > { %v1198_v23 = vsel %vm1197_vm14, %v1727_v20, %v1194_v49  ;;  %v967_v63 = vsub.f32 1.0, %v966_v40  ;;  %1742 = vrcp.f32 %v2313_v45  ;;  %vm2327_vm0 = vcmp.eq.f32.partialorder %v974_v47, 8.507059e+37 }
 0x12c   : > { %v1203_v52 = vsel %vm2302_vm12, %v1202_v51, %v1198_v23  ;;  %v977_v58 = vor.u32 1.1754944e-38, %v976_v33  ;;  %v564_v3 = vadd.f32 %v2285_v17, %v563_v11  ;;  %vm971_vm1 = vweird.f32 %v1735_v22 }
 0x12d   : > { %v1737_v43 = vpop.eup %1736  ;;  %1293 = vst.msk [vmem:[%s1945_s15 + $0xd8] sm:$0xff] %vm1265_vm4, %v1203_v52  ;;  %v968_v2 = vmul.f32 %v1735_v22, %v967_v63  ;;  %vm1210_vm2 = vweird.f32 %v2299_v37  ;;  %v613_v4 = vadd.f32 %v2165_v35, %v524_v53  ;;  %vm2337_vm3 = vcmp.eq.f32.partialorder %v1214_v46, 8.507059e+37  ;;  %vm972_vm6 = vmor %vm970_vm15, %vm971_vm1 }
 0x12e   : > { %v1739_v5 = vpop.eup %1738  ;;  %v1206_v8 = vmul.f32 %v1737_v43, %v2299_v37  ;;  %v1217_v10 = vor.u32 1.1754944e-38, %v1216_v57  ;;  %v1561_v50 = vmul.f32 -1.442695, %v620_v60  ;;  %vm985_vm5 = vweird.f32 %v2311_v41 }
 0x12f   : > { %v969_v59 = vadd.f32 %v1735_v22, %v968_v2  ;;  %v989_v7 = vand.u32 2147483647, %v2311_v41  ;;  %v991_v0 = vand.u32 2147483648, %v2311_v41  ;;  %v2344_v14 = vadd.f32 1.0, %v1739_v5 }
 0x130   : > { %v1741_v35 = vpop.eup %1740  ;;  %v1207_v15 = vsub.f32 1.0, %v1206_v8  ;;  %v1558_v55 = vmul.f32 -1.442695, %v613_v4  ;;  %1744 = vpow2.f32 %v1561_v50  ;;  %v653_v16 = vadd.f32 %v652_v54, %v564_v3 }
 0x131   : > { %v1743_v19 = vpop.eup %1742  ;;  %v973_v20 = vsel %vm972_vm6, %v1735_v22, %v969_v59  ;;  %v981_v21 = vmul.f32 %v1741_v35, %v2311_v41  ;;  %1746 = vrcp.f32 %v2344_v14  ;;  %v526_v6 = vadd.f32 %v2285_v17, %v525_v13 }
 0x132   : > { %v978_v25 = vsel %vm2327_vm0, %v977_v58, %v973_v20  ;;  %v1208_v61 = vmul.f32 %v1737_v43, %v1207_v15  ;;  %vm1211_vm7 = vweird.f32 %v1737_v43  ;;  %v1026_v62 = vmul.f32 %v1743_v19, %v2313_v45 }
 0x133   : > { %1278 = vst.msk [vmem:[%s1945_s15 + $0x60] sm:$0xff] %vm1265_vm4, %v978_v25  ;;  %v982_v27 = vsub.f32 1.0, %v981_v21  ;;  %vm1030_vm8 = vweird.f32 %v2313_v45  ;;  %v1034_v28 = vand.u32 2147483647, %v2313_v45  ;;  %v1036_v9 = vand.u32 2147483648, %v2313_v45  ;;  %vm1212_vm9 = vmor %vm1210_vm2, %vm1211_vm7 }
 0x134   : > { %v1209_v18 = vadd.f32 %v1737_v43, %v1208_v61  ;;  %v1027_v30 = vsub.f32 1.0, %v1026_v62  ;;  %1748 = vpow2.f32 %v1558_v55  ;;  %v1574_v31 = vmul.f32 -1.442695, %v653_v16 }
 0x135   : > { %v983_v34 = vmul.f32 %v1741_v35, %v982_v27  ;;  %vm986_vm10 = vweird.f32 %v1741_v35  ;;  %vm1031_vm11 = vweird.f32 %v1743_v19  ;;  %v615_v26 = vadd.f32 %v2207_v12, %v526_v6 }
 0x136   : > { %v1745_v36 = vpop.eup %1744  ;;  %v1213_v24 = vsel %vm1212_vm9, %v1737_v43, %v1209_v18  ;;  %v1028_v38 = vmul.f32 %v1743_v19, %v1027_v30  ;;  %1750 = vpow2.f32 %v1574_v31  ;;  %v566_v32 = vadd.f32 %v2285_v17, %v565_v29  ;;  %vm987_vm12 = vmor %vm985_vm5, %vm986_vm10 }
 0x137   : > { %v1747_v44 = vpop.eup %1746  ;;  %v1218_v39 = vsel %vm2337_vm3, %v1217_v10, %v1213_v24  ;;  %v984_v42 = vadd.f32 %v1741_v35, %v983_v34  ;;  %v2366_v47 = vadd.f32 1.0, %v1745_v36  ;;  %v1559_v37 = vmul.f32 -1.442695, %v615_v26  ;;  %vm1032_vm14 = vmor %vm1030_vm8, %vm1031_vm11 }
 0x138   : > { %1294 = vst.msk [vmem:[%s1945_s15 + $0xe0] sm:$0xff] %vm1265_vm4, %v1218_v39  ;;  %v992_v12 = vor.u32 1.1754944e-38, %v991_v0  ;;  %v1029_v22 = vadd.f32 %v1743_v19, %v1028_v38  ;;  %v1221_v17 = vmul.f32 %v1747_v44, %v2344_v14  ;;  %v655_v33 = vadd.f32 %v654_v48, %v566_v32 }
 0x139   : > { %v988_v49 = vsel %vm987_vm12, %v1741_v35, %v984_v42  ;;  %vm990_vm13 = vcmp.eq.f32.partialorder %v989_v7, 8.507059e+37  ;;  %v1037_v51 = vor.u32 1.1754944e-38, %v1036_v9  ;;  %1752 = vrcp.f32 %v2366_v47 }
 0x13a   : > { %v1749_v40 = vpop.eup %1748  ;;  %v993_v53 = vsel %vm990_vm13, %v992_v12, %v988_v49  ;;  %v1033_v41 = vsel %vm1032_vm14, %v1743_v19, %v1029_v22  ;;  %vm1035_vm15 = vcmp.eq.f32.partialorder %v1034_v28, 8.507059e+37  ;;  %v1222_v11 = vsub.f32 1.0, %v1221_v17 }
 0x13b   : > { %1279 = vst.msk [vmem:[%s1945_s15 + $0x68] sm:$0xff] %vm1265_vm4, %v993_v53  ;;  %v1038_v46 = vsel %vm1035_vm15, %v1037_v51, %v1033_v41  ;;  %v1231_v57 = vand.u32 2147483648, %v2344_v14  ;;  %v2381_v60 = vadd.f32 1.0, %v1749_v40  ;;  %1754 = vpow2.f32 %v1559_v37 }
 0x13c   : > { %v1751_v23 = vpop.eup %1750  ;;  %1282 = vst.msk [vmem:[%s1945_s15 + $0x80] sm:$0xff] %vm1265_vm4, %v1038_v46  ;;  %v1223_v45 = vmul.f32 %v1747_v44, %v1222_v11  ;;  %vm1226_vm0 = vweird.f32 %v1747_v44  ;;  %v1229_v63 = vand.u32 2147483647, %v2344_v14  ;;  %v1575_v52 = vmul.f32 -1.442695, %v655_v33 }
 0x13d   : > { %1756 = vrcp.f32 %v2381_v60  ;;  %vm1225_vm1 = vweird.f32 %v2344_v14  ;;  %v783_v58 = vadd.f32 1.0, %v1751_v23  ;;  %v1232_v43 = vor.u32 1.1754944e-38, %v1231_v57 }
 0x13e   : > { %v1224_v56 = vadd.f32 %v1747_v44, %v1223_v45  ;;  %1758 = vpow2.f32 %v1575_v52  ;;  %vm1227_vm2 = vmor %vm1225_vm1, %vm1226_vm0  ;;  %vm1230_vm3 = vcmp.eq.f32.partialorder %v1229_v63, 8.507059e+37  ;;  %v1049_v1 = vand.u32 2147483647, %v2366_v47 }
 0x13f   : > { %v1753_v3 = vpop.eup %1752  ;;  %1760 = vrcp.f32 %v783_v58  ;;  %v1051_v13 = vand.u32 2147483648, %v2366_v47  ;;  %vm1045_vm6 = vweird.f32 %v2366_v47  ;;  %v1004_v16 = vand.u32 2147483647, %v2381_v60 }
 0x140   : > { %v1228_v2 = vsel %vm1227_vm2, %v1747_v44, %v1224_v56  ;;  %v1041_v4 = vmul.f32 %v1753_v3, %v2366_v47  ;;  %vm1046_vm5 = vweird.f32 %v1753_v3  ;;  %vm1050_vm7 = vcmp.eq.f32.partialorder %v1049_v1, 8.507059e+37 }
 0x141   : > { %v1755_v54 = vpop.eup %1754  ;;  %v1233_v5 = vsel %vm1230_vm3, %v1232_v43, %v1228_v2  ;;  %v1006_v19 = vand.u32 2147483648, %v2381_v60  ;;  %vm1047_vm8 = vmor %vm1045_vm6, %vm1046_vm5  ;;  %v1052_v20 = vor.u32 1.1754944e-38, %v1051_v13  ;;  %vm1000_vm10 = vweird.f32 %v2381_v60 }
 0x142   : > { %1295 = vst.msk [vmem:[%s1945_s15 + $0xe8] sm:$0xff] %vm1265_vm4, %v1233_v5  ;;  %v1042_v8 = vsub.f32 1.0, %v1041_v4  ;;  %v768_v10 = vadd.f32 1.0, %v1755_v54  ;;  %v1244_v9 = vand.u32 2147483647, %v783_v58  ;;  %v1246_v29 = vand.u32 2147483648, %v783_v58 }
 0x143   : > { %v1757_v50 = vpop.eup %1756  ;;  %v1007_v18 = vor.u32 1.1754944e-38, %v1006_v19  ;;  %vm1005_vm13 = vcmp.eq.f32.partialorder %v1004_v16, 8.507059e+37  ;;  %vm1240_vm14 = vweird.f32 %v783_v58 }
 0x144   : > { %v1759_v59 = vpop.eup %1758  ;;  %v996_v7 = vmul.f32 %v1757_v50, %v2381_v60  ;;  %v1043_v0 = vmul.f32 %v1753_v3, %v1042_v8  ;;  %1762 = vrcp.f32 %v768_v10  ;;  %vm1001_vm9 = vweird.f32 %v1757_v50 }
 0x145   : > { %v2394_v14 = vadd.f32 1.0, %v1759_v59  ;;  %v1761_v35 = vpop.eup %1760  ;;  %vm1002_vm11 = vmor %vm1000_vm10, %vm1001_vm9  ;;  %vm1245_vm0 = vcmp.eq.f32.partialorder %v1244_v9, 8.507059e+37  ;;  %v1247_v32 = vor.u32 1.1754944e-38, %v1246_v29  ;;  %v1019_v44 = vand.u32 2147483647, %v768_v10 }
 0x146   : > { %v997_v15 = vsub.f32 1.0, %v996_v7  ;;  %v1044_v55 = vadd.f32 %v1753_v3, %v1043_v0  ;;  %v1236_v21 = vmul.f32 %v1761_v35, %v783_v58  ;;  %vm1241_vm12 = vweird.f32 %v1761_v35 }
 0x147   : > { %1764 = vrcp.f32 %v2394_v14  ;;  %vm1242_vm15 = vmor %vm1240_vm14, %vm1241_vm12  ;;  %v1021_v39 = vand.u32 2147483648, %v768_v10  ;;  %vm1015_vm2 = vweird.f32 %v768_v10  ;;  %vm1020_vm5 = vcmp.eq.f32.partialorder %v1019_v44, 8.507059e+37 }
 0x148   : > { %v998_v6 = vmul.f32 %v1757_v50, %v997_v15  ;;  %v1048_v25 = vsel %vm1047_vm8, %v1753_v3, %v1044_v55  ;;  %v1237_v62 = vsub.f32 1.0, %v1236_v21  ;;  %v1261_v33 = vand.u32 2147483648, %v2394_v14 }
 0x149   : > { %v1053_v61 = vsel %vm1050_vm7, %v1052_v20, %v1048_v25  ;;  %v1022_v17 = vor.u32 1.1754944e-38, %v1021_v39  ;;  %v1259_v40 = vand.u32 2147483647, %v2394_v14  ;;  %vm1255_vm7 = vweird.f32 %v2394_v14 }
 0x14a   : > { %v1763_v27 = vpop.eup %1762  ;;  %v999_v28 = vadd.f32 %v1757_v50, %v998_v6  ;;  %1283 = vst.msk [vmem:[%s1945_s15 + $0x88] sm:$0xff] %vm1265_vm4, %v1053_v61  ;;  %v1238_v30 = vmul.f32 %v1761_v35, %v1237_v62  ;;  %v1262_v11 = vor.u32 1.1754944e-38, %v1261_v33 }
 0x14b   : > { %v1011_v31 = vmul.f32 %v1763_v27, %v768_v10  ;;  %vm1016_vm1 = vweird.f32 %v1763_v27  ;;  %vm1260_vm9 = vcmp.eq.f32.partialorder %v1259_v40, 8.507059e+37 }
 0x14c   : > { %v1003_v34 = vsel %vm1002_vm11, %v1757_v50, %v999_v28  ;;  %v1239_v36 = vadd.f32 %v1761_v35, %v1238_v30  ;;  %vm1017_vm3 = vmor %vm1015_vm2, %vm1016_vm1 }
 0x14d   : > { %v1008_v26 = vsel %vm1005_vm13, %v1007_v18, %v1003_v34  ;;  %v1012_v24 = vsub.f32 1.0, %v1011_v31  ;;  %v1765_v38 = vpop.eup %1764 }
 0x14e   : > { %1280 = vst.msk [vmem:[%s1945_s15 + $0x70] sm:$0xff] %vm1265_vm4, %v1008_v26  ;;  %v1243_v42 = vsel %vm1242_vm15, %v1761_v35, %v1239_v36  ;;  %v1251_v37 = vmul.f32 %v1765_v38, %v2394_v14  ;;  %vm1256_vm6 = vweird.f32 %v1765_v38 }
 0x14f   : > { %v1013_v47 = vmul.f32 %v1763_v27, %v1012_v24  ;;  %v1248_v48 = vsel %vm1245_vm0, %v1247_v32, %v1243_v42  ;;  %vm1257_vm8 = vmor %vm1255_vm7, %vm1256_vm6 }
 0x150   : > { %1296 = vst.msk [vmem:[%s1945_s15 + $0xf0] sm:$0xff] %vm1265_vm4, %v1248_v48  ;;  %v1252_v22 = vsub.f32 1.0, %v1251_v37 }
 0x151   : > { %v1014_v12 = vadd.f32 %v1763_v27, %v1013_v47 }
 0x152   : > { %v1253_v51 = vmul.f32 %v1765_v38, %v1252_v22 }
 0x153   : > { %v1018_v49 = vsel %vm1017_vm3, %v1763_v27, %v1014_v12 }
 0x154   : > { %v1023_v53 = vsel %vm1020_vm5, %v1022_v17, %v1018_v49  ;;  %v1254_v41 = vadd.f32 %v1765_v38, %v1253_v51 }
 0x155   : > { %1281 = vst.msk [vmem:[%s1945_s15 + $0x78] sm:$0xff] %vm1265_vm4, %v1023_v53 }
 0x156   : > { %v1258_v46 = vsel %vm1257_vm8, %v1765_v38, %v1254_v41 }
 0x157   : > { %v1263_v57 = vsel %vm1260_vm9, %v1262_v11, %v1258_v46 }
 0x158   : > { %1297 = vst.msk [vmem:[%s1945_s15 + $0xf8] sm:$0xff] %vm1265_vm4, %v1263_v57 }
 0x159 PF: > { %s13_s12 = sadd.s32 1, %s1773_s12  }
 0x15a   : > { %p10_p4 = scmp.ge.s32.totalorder %s13_s12, 4  }
 0x15c   :  { %12 = sbr.rel (!%p10_p4) target bundleno = 1 (0x1), region = 62 }

</bundles_post_ra>
